<compile_context>
chip_gen: v5e
topology: v5e:2x2
jax: 0.10.0
libtpu: 0.0.40
codegen_flags: <defaults>
</compile_context>

<pallas_src>
import jax
import jax.numpy as jnp
from jax.experimental import pallas as pl
from jax.experimental.pallas import tpu as pltpu  # noqa: F401  (TPU backend)


# ---------------------------------------------------------------------------
# Fused Pallas kernel: conv(im2col) + ReLU -> LSTM -> mean -> tanh/Linear x2
# ---------------------------------------------------------------------------

def _clstm_fused_kernel(x_ref, wc_ref, bc_ref, wih_ref, whh_ref, bl_ref,
                        w1_ref, b1_ref, w2_ref, b2_ref, o_ref):
    K = 3                                   # self.kernel_sizes
    B, _L = o_ref.shape
    SB, E = x_ref.shape                     # x is time-major 2-D: row s*B + b
    S = SB // B
    T = S - K + 1
    Cp = wc_ref.shape[1]                    # padded conv channels (256)
    Hp = whh_ref.shape[0]                   # padded hidden (128)
    f32 = jnp.float32

    # --- conv as im2col-sum-of-dots, ReLU; output rows are time-major t*B+b --
    acc = jnp.dot(x_ref[0:T * B, :], wc_ref[0:E, :], preferred_element_type=f32)
    for dt in range(1, K):
        acc = acc + jnp.dot(x_ref[dt * B:(dt + T) * B, :],
                            wc_ref[dt * E:(dt + 1) * E, :],
                            preferred_element_type=f32)
    conv = jnp.maximum(acc + bc_ref[...], 0.0)                    # (T*B, Cp)

    # --- hoisted LSTM input projection: one matmul for all time steps --------
    gx = jnp.dot(conv, wih_ref[...],
                 preferred_element_type=f32) + bl_ref[...]        # (T*B, 4*Hp)

    # --- unrolled time recurrence (PyTorch gate order i, f, g, o) ------------
    h = jnp.zeros((B, Hp), f32)
    c = jnp.zeros((B, Hp), f32)
    h_sum = jnp.zeros((B, Hp), f32)
    for t in range(T):
        gates = gx[t * B:(t + 1) * B, :] + jnp.dot(
            h, whh_ref[...], preferred_element_type=f32)          # (B, 4*Hp)
        # Each gate slice is a full 128-lane tile -> no cross-lane moves.
        i_g = jax.nn.sigmoid(gates[:, 0 * Hp:1 * Hp])
        f_g = jax.nn.sigmoid(gates[:, 1 * Hp:2 * Hp])
        g_g = jnp.tanh(gates[:, 2 * Hp:3 * Hp])
        o_g = jax.nn.sigmoid(gates[:, 3 * Hp:4 * Hp])
        c = f_g * c + i_g * g_g
        h = o_g * jnp.tanh(c)
        h_sum = h_sum + h                                         # time-mean acc

    # --- head: mean over T -> tanh -> Linear -> tanh -> Linear ---------------
    pooled = h_sum * (1.0 / T)
    z = jnp.tanh(pooled)
    z = jnp.dot(z, w1_ref[...], preferred_element_type=f32) + b1_ref[...]
    z = jnp.tanh(z)
    z = jnp.dot(z, w2_ref[...], preferred_element_type=f32) + b2_ref[...]
    o_ref[...] = z


# ---------------------------------------------------------------------------
# Host-side glue
# ---------------------------------------------------------------------------

def pad_clstm_params(p, c_pad=256, h_pad=128):
    """Zero-pad params so conv channels and each LSTM gate are lane-dense.

    Padding is mathematically inert: padded conv channels see zero weights and
    zero bias (relu(0)=0), padded gate lanes see zero weights/bias so the
    padded cell/hidden lanes stay exactly 0 for all time steps.
    """
    C = p["w_conv"].shape[1]
    H = p["w_hh"].shape[0]

    def pad_gate_cols(w):                       # (.., 4*H) -> (.., 4*h_pad)
        lead = w.shape[0]
        w = w.reshape(lead, 4, H)
        w = jnp.pad(w, ((0, 0), (0, 0), (0, h_pad - H)))
        return w.reshape(lead, 4 * h_pad)

    return {
        "w_conv": jnp.pad(p["w_conv"], ((0, 0), (0, c_pad - C))),
        "b_conv": jnp.pad(p["b_conv"], ((0, 0), (0, c_pad - C))),
        "w_ih": pad_gate_cols(jnp.pad(p["w_ih"], ((0, c_pad - C), (0, 0)))),
        "w_hh": pad_gate_cols(jnp.pad(p["w_hh"], ((0, h_pad - H), (0, 0)))),
        "b_lstm": pad_gate_cols(p["b_lstm"]),
        "w1": jnp.pad(p["w1"], ((0, h_pad - H), (0, 0))),
        "b1": p["b1"],
        "w2": p["w2"],
        "b2": p["b2"],
    }


def clstm_forward(x, padded_params):
    """x: (B, S, E) float32 — stands in for BERT's last encoder layer output."""
    B, S, E = x.shape
    L = padded_params["w2"].shape[1]
    # Time-major 2-D view: row s*B + b == x[b, s, :]  (mirrors cnn_x.permute).
    x_tm = x.transpose(1, 0, 2).reshape(S * B, E)
    # No grid: single invocation, every operand is a whole-array VMEM block
    # (all operands total ~1.3 MB, far under the scoped VMEM limit).
    return pl.pallas_call(
        _clstm_fused_kernel,
        out_shape=jax.ShapeDtypeStruct((B, L), jnp.float32),
    )(x_tm,
      padded_params["w_conv"], padded_params["b_conv"],
      padded_params["w_ih"], padded_params["w_hh"], padded_params["b_lstm"],
      padded_params["w1"], padded_params["b1"],
      padded_params["w2"], padded_params["b2"])


# ---------------------------------------------------------------------------
# Pure-JAX reference for correctness checking (unpadded params)
# ---------------------------------------------------------------------------

def clstm_reference(x, params):
    B, S, E = x.shape
    K = 3
    T = S - K + 1
    windows = jnp.concatenate([x[:, dt:dt + T, :] for dt in range(K)],
                              axis=-1).reshape(B * T, K * E)
    conv = jnp.maximum(windows @ params["w_conv"] + params["b_conv"], 0.0)
    C = conv.shape[1]
    seq = conv.reshape(B, T, C).transpose(1, 0, 2)
    H = params["w_hh"].shape[0]

    def step(carry, xt):
        h, c = carry
        gates = xt @ params["w_ih"] + h @ params["w_hh"] + params["b_lstm"][0]
        i = jax.nn.sigmoid(gates[:, :H])
        f = jax.nn.sigmoid(gates[:, H:2 * H])
        g = jnp.tanh(gates[:, 2 * H:3 * H])
        o = jax.nn.sigmoid(gates[:, 3 * H:])
        c = f * c + i * g
        h = o * jnp.tanh(c)
        return (h, c), h

    (_, _), hs = jax.lax.scan(
        step, (jnp.zeros((B, H)), jnp.zeros((B, H))), seq)
    pooled = jnp.mean(hs, axis=0)
    z = jnp.tanh(pooled) @ params["w1"] + params["b1"]
    z = jnp.tanh(z) @ params["w2"] + params["b2"]
    return z


# ---------------------------------------------------------------------------
# Main
# ---------------------------------------------------------------------------

if __name__ == "__main__":
    # Synthetic config: embed_dim=128, kernel_nums=150 (fixed in the module),
    # hidden_dim=32, lstm_layers=1, label_size=4, lstm_mean='mean'.
    B, S, E = 2, 16, 128
    C = 150          # self.kernel_nums
    H = 32           # opt.hidden_dim
    L = 4            # opt.label_size
    K = 3            # self.kernel_sizes

    key = jax.random.PRNGKey(0)
    ks = jax.random.split(key, 10)
    sc = 0.05
    params = {
        "w_conv": sc * jax.random.normal(ks[0], (K * E, C), jnp.float32),
        "b_conv": sc * jax.random.normal(ks[1], (1, C), jnp.float32),
        "w_ih":   sc * jax.random.normal(ks[2], (C, 4 * H), jnp.float32),
        "w_hh":   sc * jax.random.normal(ks[3], (H, 4 * H), jnp.float32),
        "b_lstm": sc * jax.random.normal(ks[4], (1, 4 * H), jnp.float32),  # b_ih + b_hh
        "w1":     sc * jax.random.normal(ks[5], (H, H // 2), jnp.float32),
        "b1":     sc * jax.random.normal(ks[6], (1, H // 2), jnp.float32),
        "w2":     sc * jax.random.normal(ks[7], (H // 2, L), jnp.float32),
        "b2":     sc * jax.random.normal(ks[8], (1, L), jnp.float32),
    }
    x = jax.random.normal(ks[9], (B, S, E), jnp.float32)

    padded = pad_clstm_params(params)
    fwd = jax.jit(clstm_forward)

    logits = jax.block_until_ready(fwd(x, padded))
    ref = jax.block_until_ready(clstm_reference(x, params))

    assert logits.shape == (B, L), logits.shape
    assert jnp.allclose(logits, ref, atol=2e-4, rtol=2e-4), (logits, ref)
    print("KERNEL_OK")
</pallas_src>

<mosaic_0001>
module attributes {stable_mosaic.version = 11 : i64} {
  func.func @_clstm_fused_kernel(%arg0: memref<32x128xf32, #tpu.memory_space<vmem>>, %arg1: memref<384x256xf32, #tpu.memory_space<vmem>>, %arg2: memref<1x256xf32, #tpu.memory_space<vmem>>, %arg3: memref<256x512xf32, #tpu.memory_space<vmem>>, %arg4: memref<128x512xf32, #tpu.memory_space<vmem>>, %arg5: memref<1x512xf32, #tpu.memory_space<vmem>>, %arg6: memref<128x16xf32, #tpu.memory_space<vmem>>, %arg7: memref<1x16xf32, #tpu.memory_space<vmem>>, %arg8: memref<16x4xf32, #tpu.memory_space<vmem>>, %arg9: memref<1x4xf32, #tpu.memory_space<vmem>>, %arg10: memref<2x4xf32, #tpu.memory_space<vmem>>) attributes {dimension_semantics = [], scalar_prefetch = 0 : i64, scratch_operands = 0 : i64, tpu.core_type = #tpu.core_type<tc>} {
    %c0 = arith.constant 0 : index
    %c0_0 = arith.constant 0 : index
    %0 = vector.load %arg0[%c0, %c0_0] : memref<32x128xf32, #tpu.memory_space<vmem>>, vector<28x128xf32>
    %c0_1 = arith.constant 0 : index
    %c0_2 = arith.constant 0 : index
    %1 = vector.load %arg1[%c0_1, %c0_2] : memref<384x256xf32, #tpu.memory_space<vmem>>, vector<128x256xf32>
    %cst = arith.constant dense<0.000000e+00> : vector<28x256xf32>
    %2 = tpu.matmul %0, %1, %cst {dimension_numbers = #tpu.dot_dimension_numbers<[1], [0], [0], [1], [0, 0, 1, 1], [], []>} : vector<28x128xf32>, vector<128x256xf32>, vector<28x256xf32> -> vector<28x256xf32>
    %c2 = arith.constant 2 : index
    %c0_3 = arith.constant 0 : index
    %3 = vector.load %arg0[%c2, %c0_3] : memref<32x128xf32, #tpu.memory_space<vmem>>, vector<28x128xf32>
    %c128 = arith.constant 128 : index
    %c0_4 = arith.constant 0 : index
    %4 = vector.load %arg1[%c128, %c0_4] : memref<384x256xf32, #tpu.memory_space<vmem>>, vector<128x256xf32>
    %cst_5 = arith.constant dense<0.000000e+00> : vector<28x256xf32>
    %5 = tpu.matmul %3, %4, %cst_5 {dimension_numbers = #tpu.dot_dimension_numbers<[1], [0], [0], [1], [0, 0, 1, 1], [], []>} : vector<28x128xf32>, vector<128x256xf32>, vector<28x256xf32> -> vector<28x256xf32>
    %6 = arith.addf %2, %5 : vector<28x256xf32>
    %c4 = arith.constant 4 : index
    %c0_6 = arith.constant 0 : index
    %7 = vector.load %arg0[%c4, %c0_6] : memref<32x128xf32, #tpu.memory_space<vmem>>, vector<28x128xf32>
    %c256 = arith.constant 256 : index
    %c0_7 = arith.constant 0 : index
    %8 = vector.load %arg1[%c256, %c0_7] : memref<384x256xf32, #tpu.memory_space<vmem>>, vector<128x256xf32>
    %cst_8 = arith.constant dense<0.000000e+00> : vector<28x256xf32>
    %9 = tpu.matmul %7, %8, %cst_8 {dimension_numbers = #tpu.dot_dimension_numbers<[1], [0], [0], [1], [0, 0, 1, 1], [], []>} : vector<28x128xf32>, vector<128x256xf32>, vector<28x256xf32> -> vector<28x256xf32>
    %10 = arith.addf %6, %9 : vector<28x256xf32>
    %c0_9 = arith.constant 0 : index
    %c0_10 = arith.constant 0 : index
    %11 = vector.load %arg2[%c0_9, %c0_10] : memref<1x256xf32, #tpu.memory_space<vmem>>, vector<1x256xf32>
    %12 = vector.broadcast %11 : vector<1x256xf32> to vector<28x256xf32>
    %13 = arith.addf %10, %12 : vector<28x256xf32>
    %cst_11 = arith.constant 0.000000e+00 : f32
    %14 = vector.broadcast %cst_11 : f32 to vector<28x256xf32>
    %15 = arith.maximumf %13, %14 : vector<28x256xf32>
    %c0_12 = arith.constant 0 : index
    %c0_13 = arith.constant 0 : index
    %16 = vector.load %arg3[%c0_12, %c0_13] : memref<256x512xf32, #tpu.memory_space<vmem>>, vector<256x512xf32>
    %cst_14 = arith.constant dense<0.000000e+00> : vector<28x512xf32>
    %17 = tpu.matmul %15, %16, %cst_14 {dimension_numbers = #tpu.dot_dimension_numbers<[1], [0], [0], [1], [0, 0, 1, 1], [], []>} : vector<28x256xf32>, vector<256x512xf32>, vector<28x512xf32> -> vector<28x512xf32>
    %c0_15 = arith.constant 0 : index
    %c0_16 = arith.constant 0 : index
    %18 = vector.load %arg5[%c0_15, %c0_16] : memref<1x512xf32, #tpu.memory_space<vmem>>, vector<1x512xf32>
    %19 = vector.broadcast %18 : vector<1x512xf32> to vector<28x512xf32>
    %20 = arith.addf %17, %19 : vector<28x512xf32>
    %cst_17 = arith.constant 0.000000e+00 : f32
    %21 = vector.broadcast %cst_17 : f32 to vector<2x128xf32>
    %cst_18 = arith.constant 0.000000e+00 : f32
    %22 = vector.broadcast %cst_18 : f32 to vector<2x128xf32>
    %cst_19 = arith.constant 0.000000e+00 : f32
    %23 = vector.broadcast %cst_19 : f32 to vector<2x128xf32>
    %24 = vector.extract_strided_slice %20 {offsets = [0, 0], sizes = [2, 512], strides = [1, 1]} : vector<28x512xf32> to vector<2x512xf32>
    %c0_20 = arith.constant 0 : index
    %c0_21 = arith.constant 0 : index
    %25 = vector.load %arg4[%c0_20, %c0_21] : memref<128x512xf32, #tpu.memory_space<vmem>>, vector<128x512xf32>
    %cst_22 = arith.constant dense<0.000000e+00> : vector<2x512xf32>
    %26 = tpu.matmul %21, %25, %cst_22 {dimension_numbers = #tpu.dot_dimension_numbers<[1], [0], [0], [1], [0, 0, 1, 1], [], []>} : vector<2x128xf32>, vector<128x512xf32>, vector<2x512xf32> -> vector<2x512xf32>
    %27 = arith.addf %24, %26 : vector<2x512xf32>
    %28 = vector.extract_strided_slice %27 {offsets = [0, 0], sizes = [2, 128], strides = [1, 1]} : vector<2x512xf32> to vector<2x128xf32>
    %29 = arith.negf %28 : vector<2x128xf32>
    %30 = math.exp %29 : vector<2x128xf32>
    %cst_23 = arith.constant 1.000000e+00 : f32
    %31 = vector.broadcast %cst_23 : f32 to vector<2x128xf32>
    %32 = arith.addf %31, %30 : vector<2x128xf32>
    %33 = arith.divf %31, %32 : vector<2x128xf32>
    %34 = vector.extract_strided_slice %27 {offsets = [0, 128], sizes = [2, 128], strides = [1, 1]} : vector<2x512xf32> to vector<2x128xf32>
    %35 = arith.negf %34 : vector<2x128xf32>
    %36 = math.exp %35 : vector<2x128xf32>
    %cst_24 = arith.constant 1.000000e+00 : f32
    %37 = vector.broadcast %cst_24 : f32 to vector<2x128xf32>
    %38 = arith.addf %37, %36 : vector<2x128xf32>
    %39 = arith.divf %37, %38 : vector<2x128xf32>
    %40 = vector.extract_strided_slice %27 {offsets = [0, 256], sizes = [2, 128], strides = [1, 1]} : vector<2x512xf32> to vector<2x128xf32>
    %41 = math.tanh %40 : vector<2x128xf32>
    %42 = vector.extract_strided_slice %27 {offsets = [0, 384], sizes = [2, 128], strides = [1, 1]} : vector<2x512xf32> to vector<2x128xf32>
    %43 = arith.negf %42 : vector<2x128xf32>
    %44 = math.exp %43 : vector<2x128xf32>
    %cst_25 = arith.constant 1.000000e+00 : f32
    %45 = vector.broadcast %cst_25 : f32 to vector<2x128xf32>
    %46 = arith.addf %45, %44 : vector<2x128xf32>
    %47 = arith.divf %45, %46 : vector<2x128xf32>
    %48 = arith.mulf %39, %22 : vector<2x128xf32>
    %49 = arith.mulf %33, %41 : vector<2x128xf32>
    %50 = arith.addf %48, %49 : vector<2x128xf32>
    %51 = math.tanh %50 : vector<2x128xf32>
    %52 = arith.mulf %47, %51 : vector<2x128xf32>
    %53 = arith.addf %23, %52 : vector<2x128xf32>
    %54 = vector.extract_strided_slice %20 {offsets = [2, 0], sizes = [2, 512], strides = [1, 1]} : vector<28x512xf32> to vector<2x512xf32>
    %c0_26 = arith.constant 0 : index
    %c0_27 = arith.constant 0 : index
    %55 = vector.load %arg4[%c0_26, %c0_27] : memref<128x512xf32, #tpu.memory_space<vmem>>, vector<128x512xf32>
    %cst_28 = arith.constant dense<0.000000e+00> : vector<2x512xf32>
    %56 = tpu.matmul %52, %55, %cst_28 {dimension_numbers = #tpu.dot_dimension_numbers<[1], [0], [0], [1], [0, 0, 1, 1], [], []>} : vector<2x128xf32>, vector<128x512xf32>, vector<2x512xf32> -> vector<2x512xf32>
    %57 = arith.addf %54, %56 : vector<2x512xf32>
    %58 = vector.extract_strided_slice %57 {offsets = [0, 0], sizes = [2, 128], strides = [1, 1]} : vector<2x512xf32> to vector<2x128xf32>
    %59 = arith.negf %58 : vector<2x128xf32>
    %60 = math.exp %59 : vector<2x128xf32>
    %cst_29 = arith.constant 1.000000e+00 : f32
    %61 = vector.broadcast %cst_29 : f32 to vector<2x128xf32>
    %62 = arith.addf %61, %60 : vector<2x128xf32>
    %63 = arith.divf %61, %62 : vector<2x128xf32>
    %64 = vector.extract_strided_slice %57 {offsets = [0, 128], sizes = [2, 128], strides = [1, 1]} : vector<2x512xf32> to vector<2x128xf32>
    %65 = arith.negf %64 : vector<2x128xf32>
    %66 = math.exp %65 : vector<2x128xf32>
    %cst_30 = arith.constant 1.000000e+00 : f32
    %67 = vector.broadcast %cst_30 : f32 to vector<2x128xf32>
    %68 = arith.addf %67, %66 : vector<2x128xf32>
    %69 = arith.divf %67, %68 : vector<2x128xf32>
    %70 = vector.extract_strided_slice %57 {offsets = [0, 256], sizes = [2, 128], strides = [1, 1]} : vector<2x512xf32> to vector<2x128xf32>
    %71 = math.tanh %70 : vector<2x128xf32>
    %72 = vector.extract_strided_slice %57 {offsets = [0, 384], sizes = [2, 128], strides = [1, 1]} : vector<2x512xf32> to vector<2x128xf32>
    %73 = arith.negf %72 : vector<2x128xf32>
    %74 = math.exp %73 : vector<2x128xf32>
    %cst_31 = arith.constant 1.000000e+00 : f32
    %75 = vector.broadcast %cst_31 : f32 to vector<2x128xf32>
    %76 = arith.addf %75, %74 : vector<2x128xf32>
    %77 = arith.divf %75, %76 : vector<2x128xf32>
    %78 = arith.mulf %69, %50 : vector<2x128xf32>
    %79 = arith.mulf %63, %71 : vector<2x128xf32>
    %80 = arith.addf %78, %79 : vector<2x128xf32>
    %81 = math.tanh %80 : vector<2x128xf32>
    %82 = arith.mulf %77, %81 : vector<2x128xf32>
    %83 = arith.addf %53, %82 : vector<2x128xf32>
    %84 = vector.extract_strided_slice %20 {offsets = [4, 0], sizes = [2, 512], strides = [1, 1]} : vector<28x512xf32> to vector<2x512xf32>
    %c0_32 = arith.constant 0 : index
    %c0_33 = arith.constant 0 : index
    %85 = vector.load %arg4[%c0_32, %c0_33] : memref<128x512xf32, #tpu.memory_space<vmem>>, vector<128x512xf32>
    %cst_34 = arith.constant dense<0.000000e+00> : vector<2x512xf32>
    %86 = tpu.matmul %82, %85, %cst_34 {dimension_numbers = #tpu.dot_dimension_numbers<[1], [0], [0], [1], [0, 0, 1, 1], [], []>} : vector<2x128xf32>, vector<128x512xf32>, vector<2x512xf32> -> vector<2x512xf32>
    %87 = arith.addf %84, %86 : vector<2x512xf32>
    %88 = vector.extract_strided_slice %87 {offsets = [0, 0], sizes = [2, 128], strides = [1, 1]} : vector<2x512xf32> to vector<2x128xf32>
    %89 = arith.negf %88 : vector<2x128xf32>
    %90 = math.exp %89 : vector<2x128xf32>
    %cst_35 = arith.constant 1.000000e+00 : f32
    %91 = vector.broadcast %cst_35 : f32 to vector<2x128xf32>
    %92 = arith.addf %91, %90 : vector<2x128xf32>
    %93 = arith.divf %91, %92 : vector<2x128xf32>
    %94 = vector.extract_strided_slice %87 {offsets = [0, 128], sizes = [2, 128], strides = [1, 1]} : vector<2x512xf32> to vector<2x128xf32>
    %95 = arith.negf %94 : vector<2x128xf32>
    %96 = math.exp %95 : vector<2x128xf32>
    %cst_36 = arith.constant 1.000000e+00 : f32
    %97 = vector.broadcast %cst_36 : f32 to vector<2x128xf32>
    %98 = arith.addf %97, %96 : vector<2x128xf32>
    %99 = arith.divf %97, %98 : vector<2x128xf32>
    %100 = vector.extract_strided_slice %87 {offsets = [0, 256], sizes = [2, 128], strides = [1, 1]} : vector<2x512xf32> to vector<2x128xf32>
    %101 = math.tanh %100 : vector<2x128xf32>
    %102 = vector.extract_strided_slice %87 {offsets = [0, 384], sizes = [2, 128], strides = [1, 1]} : vector<2x512xf32> to vector<2x128xf32>
    %103 = arith.negf %102 : vector<2x128xf32>
    %104 = math.exp %103 : vector<2x128xf32>
    %cst_37 = arith.constant 1.000000e+00 : f32
    %105 = vector.broadcast %cst_37 : f32 to vector<2x128xf32>
    %106 = arith.addf %105, %104 : vector<2x128xf32>
    %107 = arith.divf %105, %106 : vector<2x128xf32>
    %108 = arith.mulf %99, %80 : vector<2x128xf32>
    %109 = arith.mulf %93, %101 : vector<2x128xf32>
    %110 = arith.addf %108, %109 : vector<2x128xf32>
    %111 = math.tanh %110 : vector<2x128xf32>
    %112 = arith.mulf %107, %111 : vector<2x128xf32>
    %113 = arith.addf %83, %112 : vector<2x128xf32>
    %114 = vector.extract_strided_slice %20 {offsets = [6, 0], sizes = [2, 512], strides = [1, 1]} : vector<28x512xf32> to vector<2x512xf32>
    %c0_38 = arith.constant 0 : index
    %c0_39 = arith.constant 0 : index
    %115 = vector.load %arg4[%c0_38, %c0_39] : memref<128x512xf32, #tpu.memory_space<vmem>>, vector<128x512xf32>
    %cst_40 = arith.constant dense<0.000000e+00> : vector<2x512xf32>
    %116 = tpu.matmul %112, %115, %cst_40 {dimension_numbers = #tpu.dot_dimension_numbers<[1], [0], [0], [1], [0, 0, 1, 1], [], []>} : vector<2x128xf32>, vector<128x512xf32>, vector<2x512xf32> -> vector<2x512xf32>
    %117 = arith.addf %114, %116 : vector<2x512xf32>
    %118 = vector.extract_strided_slice %117 {offsets = [0, 0], sizes = [2, 128], strides = [1, 1]} : vector<2x512xf32> to vector<2x128xf32>
    %119 = arith.negf %118 : vector<2x128xf32>
    %120 = math.exp %119 : vector<2x128xf32>
    %cst_41 = arith.constant 1.000000e+00 : f32
    %121 = vector.broadcast %cst_41 : f32 to vector<2x128xf32>
    %122 = arith.addf %121, %120 : vector<2x128xf32>
    %123 = arith.divf %121, %122 : vector<2x128xf32>
    %124 = vector.extract_strided_slice %117 {offsets = [0, 128], sizes = [2, 128], strides = [1, 1]} : vector<2x512xf32> to vector<2x128xf32>
    %125 = arith.negf %124 : vector<2x128xf32>
    %126 = math.exp %125 : vector<2x128xf32>
    %cst_42 = arith.constant 1.000000e+00 : f32
    %127 = vector.broadcast %cst_42 : f32 to vector<2x128xf32>
    %128 = arith.addf %127, %126 : vector<2x128xf32>
    %129 = arith.divf %127, %128 : vector<2x128xf32>
    %130 = vector.extract_strided_slice %117 {offsets = [0, 256], sizes = [2, 128], strides = [1, 1]} : vector<2x512xf32> to vector<2x128xf32>
    %131 = math.tanh %130 : vector<2x128xf32>
    %132 = vector.extract_strided_slice %117 {offsets = [0, 384], sizes = [2, 128], strides = [1, 1]} : vector<2x512xf32> to vector<2x128xf32>
    %133 = arith.negf %132 : vector<2x128xf32>
    %134 = math.exp %133 : vector<2x128xf32>
    %cst_43 = arith.constant 1.000000e+00 : f32
    %135 = vector.broadcast %cst_43 : f32 to vector<2x128xf32>
    %136 = arith.addf %135, %134 : vector<2x128xf32>
    %137 = arith.divf %135, %136 : vector<2x128xf32>
    %138 = arith.mulf %129, %110 : vector<2x128xf32>
    %139 = arith.mulf %123, %131 : vector<2x128xf32>
    %140 = arith.addf %138, %139 : vector<2x128xf32>
    %141 = math.tanh %140 : vector<2x128xf32>
    %142 = arith.mulf %137, %141 : vector<2x128xf32>
    %143 = arith.addf %113, %142 : vector<2x128xf32>
    %144 = vector.extract_strided_slice %20 {offsets = [8, 0], sizes = [2, 512], strides = [1, 1]} : vector<28x512xf32> to vector<2x512xf32>
    %c0_44 = arith.constant 0 : index
    %c0_45 = arith.constant 0 : index
    %145 = vector.load %arg4[%c0_44, %c0_45] : memref<128x512xf32, #tpu.memory_space<vmem>>, vector<128x512xf32>
    %cst_46 = arith.constant dense<0.000000e+00> : vector<2x512xf32>
    %146 = tpu.matmul %142, %145, %cst_46 {dimension_numbers = #tpu.dot_dimension_numbers<[1], [0], [0], [1], [0, 0, 1, 1], [], []>} : vector<2x128xf32>, vector<128x512xf32>, vector<2x512xf32> -> vector<2x512xf32>
    %147 = arith.addf %144, %146 : vector<2x512xf32>
    %148 = vector.extract_strided_slice %147 {offsets = [0, 0], sizes = [2, 128], strides = [1, 1]} : vector<2x512xf32> to vector<2x128xf32>
    %149 = arith.negf %148 : vector<2x128xf32>
    %150 = math.exp %149 : vector<2x128xf32>
    %cst_47 = arith.constant 1.000000e+00 : f32
    %151 = vector.broadcast %cst_47 : f32 to vector<2x128xf32>
    %152 = arith.addf %151, %150 : vector<2x128xf32>
    %153 = arith.divf %151, %152 : vector<2x128xf32>
    %154 = vector.extract_strided_slice %147 {offsets = [0, 128], sizes = [2, 128], strides = [1, 1]} : vector<2x512xf32> to vector<2x128xf32>
    %155 = arith.negf %154 : vector<2x128xf32>
    %156 = math.exp %155 : vector<2x128xf32>
    %cst_48 = arith.constant 1.000000e+00 : f32
    %157 = vector.broadcast %cst_48 : f32 to vector<2x128xf32>
    %158 = arith.addf %157, %156 : vector<2x128xf32>
    %159 = arith.divf %157, %158 : vector<2x128xf32>
    %160 = vector.extract_strided_slice %147 {offsets = [0, 256], sizes = [2, 128], strides = [1, 1]} : vector<2x512xf32> to vector<2x128xf32>
    %161 = math.tanh %160 : vector<2x128xf32>
    %162 = vector.extract_strided_slice %147 {offsets = [0, 384], sizes = [2, 128], strides = [1, 1]} : vector<2x512xf32> to vector<2x128xf32>
    %163 = arith.negf %162 : vector<2x128xf32>
    %164 = math.exp %163 : vector<2x128xf32>
    %cst_49 = arith.constant 1.000000e+00 : f32
    %165 = vector.broadcast %cst_49 : f32 to vector<2x128xf32>
    %166 = arith.addf %165, %164 : vector<2x128xf32>
    %167 = arith.divf %165, %166 : vector<2x128xf32>
    %168 = arith.mulf %159, %140 : vector<2x128xf32>
    %169 = arith.mulf %153, %161 : vector<2x128xf32>
    %170 = arith.addf %168, %169 : vector<2x128xf32>
    %171 = math.tanh %170 : vector<2x128xf32>
    %172 = arith.mulf %167, %171 : vector<2x128xf32>
    %173 = arith.addf %143, %172 : vector<2x128xf32>
    %174 = vector.extract_strided_slice %20 {offsets = [10, 0], sizes = [2, 512], strides = [1, 1]} : vector<28x512xf32> to vector<2x512xf32>
    %c0_50 = arith.constant 0 : index
    %c0_51 = arith.constant 0 : index
    %175 = vector.load %arg4[%c0_50, %c0_51] : memref<128x512xf32, #tpu.memory_space<vmem>>, vector<128x512xf32>
    %cst_52 = arith.constant dense<0.000000e+00> : vector<2x512xf32>
    %176 = tpu.matmul %172, %175, %cst_52 {dimension_numbers = #tpu.dot_dimension_numbers<[1], [0], [0], [1], [0, 0, 1, 1], [], []>} : vector<2x128xf32>, vector<128x512xf32>, vector<2x512xf32> -> vector<2x512xf32>
    %177 = arith.addf %174, %176 : vector<2x512xf32>
    %178 = vector.extract_strided_slice %177 {offsets = [0, 0], sizes = [2, 128], strides = [1, 1]} : vector<2x512xf32> to vector<2x128xf32>
    %179 = arith.negf %178 : vector<2x128xf32>
    %180 = math.exp %179 : vector<2x128xf32>
    %cst_53 = arith.constant 1.000000e+00 : f32
    %181 = vector.broadcast %cst_53 : f32 to vector<2x128xf32>
    %182 = arith.addf %181, %180 : vector<2x128xf32>
    %183 = arith.divf %181, %182 : vector<2x128xf32>
    %184 = vector.extract_strided_slice %177 {offsets = [0, 128], sizes = [2, 128], strides = [1, 1]} : vector<2x512xf32> to vector<2x128xf32>
    %185 = arith.negf %184 : vector<2x128xf32>
    %186 = math.exp %185 : vector<2x128xf32>
    %cst_54 = arith.constant 1.000000e+00 : f32
    %187 = vector.broadcast %cst_54 : f32 to vector<2x128xf32>
    %188 = arith.addf %187, %186 : vector<2x128xf32>
    %189 = arith.divf %187, %188 : vector<2x128xf32>
    %190 = vector.extract_strided_slice %177 {offsets = [0, 256], sizes = [2, 128], strides = [1, 1]} : vector<2x512xf32> to vector<2x128xf32>
    %191 = math.tanh %190 : vector<2x128xf32>
    %192 = vector.extract_strided_slice %177 {offsets = [0, 384], sizes = [2, 128], strides = [1, 1]} : vector<2x512xf32> to vector<2x128xf32>
    %193 = arith.negf %192 : vector<2x128xf32>
    %194 = math.exp %193 : vector<2x128xf32>
    %cst_55 = arith.constant 1.000000e+00 : f32
    %195 = vector.broadcast %cst_55 : f32 to vector<2x128xf32>
    %196 = arith.addf %195, %194 : vector<2x128xf32>
    %197 = arith.divf %195, %196 : vector<2x128xf32>
    %198 = arith.mulf %189, %170 : vector<2x128xf32>
    %199 = arith.mulf %183, %191 : vector<2x128xf32>
    %200 = arith.addf %198, %199 : vector<2x128xf32>
    %201 = math.tanh %200 : vector<2x128xf32>
    %202 = arith.mulf %197, %201 : vector<2x128xf32>
    %203 = arith.addf %173, %202 : vector<2x128xf32>
    %204 = vector.extract_strided_slice %20 {offsets = [12, 0], sizes = [2, 512], strides = [1, 1]} : vector<28x512xf32> to vector<2x512xf32>
    %c0_56 = arith.constant 0 : index
    %c0_57 = arith.constant 0 : index
    %205 = vector.load %arg4[%c0_56, %c0_57] : memref<128x512xf32, #tpu.memory_space<vmem>>, vector<128x512xf32>
    %cst_58 = arith.constant dense<0.000000e+00> : vector<2x512xf32>
    %206 = tpu.matmul %202, %205, %cst_58 {dimension_numbers = #tpu.dot_dimension_numbers<[1], [0], [0], [1], [0, 0, 1, 1], [], []>} : vector<2x128xf32>, vector<128x512xf32>, vector<2x512xf32> -> vector<2x512xf32>
    %207 = arith.addf %204, %206 : vector<2x512xf32>
    %208 = vector.extract_strided_slice %207 {offsets = [0, 0], sizes = [2, 128], strides = [1, 1]} : vector<2x512xf32> to vector<2x128xf32>
    %209 = arith.negf %208 : vector<2x128xf32>
    %210 = math.exp %209 : vector<2x128xf32>
    %cst_59 = arith.constant 1.000000e+00 : f32
    %211 = vector.broadcast %cst_59 : f32 to vector<2x128xf32>
    %212 = arith.addf %211, %210 : vector<2x128xf32>
    %213 = arith.divf %211, %212 : vector<2x128xf32>
    %214 = vector.extract_strided_slice %207 {offsets = [0, 128], sizes = [2, 128], strides = [1, 1]} : vector<2x512xf32> to vector<2x128xf32>
    %215 = arith.negf %214 : vector<2x128xf32>
    %216 = math.exp %215 : vector<2x128xf32>
    %cst_60 = arith.constant 1.000000e+00 : f32
    %217 = vector.broadcast %cst_60 : f32 to vector<2x128xf32>
    %218 = arith.addf %217, %216 : vector<2x128xf32>
    %219 = arith.divf %217, %218 : vector<2x128xf32>
    %220 = vector.extract_strided_slice %207 {offsets = [0, 256], sizes = [2, 128], strides = [1, 1]} : vector<2x512xf32> to vector<2x128xf32>
    %221 = math.tanh %220 : vector<2x128xf32>
    %222 = vector.extract_strided_slice %207 {offsets = [0, 384], sizes = [2, 128], strides = [1, 1]} : vector<2x512xf32> to vector<2x128xf32>
    %223 = arith.negf %222 : vector<2x128xf32>
    %224 = math.exp %223 : vector<2x128xf32>
    %cst_61 = arith.constant 1.000000e+00 : f32
    %225 = vector.broadcast %cst_61 : f32 to vector<2x128xf32>
    %226 = arith.addf %225, %224 : vector<2x128xf32>
    %227 = arith.divf %225, %226 : vector<2x128xf32>
    %228 = arith.mulf %219, %200 : vector<2x128xf32>
    %229 = arith.mulf %213, %221 : vector<2x128xf32>
    %230 = arith.addf %228, %229 : vector<2x128xf32>
    %231 = math.tanh %230 : vector<2x128xf32>
    %232 = arith.mulf %227, %231 : vector<2x128xf32>
    %233 = arith.addf %203, %232 : vector<2x128xf32>
    %234 = vector.extract_strided_slice %20 {offsets = [14, 0], sizes = [2, 512], strides = [1, 1]} : vector<28x512xf32> to vector<2x512xf32>
    %c0_62 = arith.constant 0 : index
    %c0_63 = arith.constant 0 : index
    %235 = vector.load %arg4[%c0_62, %c0_63] : memref<128x512xf32, #tpu.memory_space<vmem>>, vector<128x512xf32>
    %cst_64 = arith.constant dense<0.000000e+00> : vector<2x512xf32>
    %236 = tpu.matmul %232, %235, %cst_64 {dimension_numbers = #tpu.dot_dimension_numbers<[1], [0], [0], [1], [0, 0, 1, 1], [], []>} : vector<2x128xf32>, vector<128x512xf32>, vector<2x512xf32> -> vector<2x512xf32>
    %237 = arith.addf %234, %236 : vector<2x512xf32>
    %238 = vector.extract_strided_slice %237 {offsets = [0, 0], sizes = [2, 128], strides = [1, 1]} : vector<2x512xf32> to vector<2x128xf32>
    %239 = arith.negf %238 : vector<2x128xf32>
    %240 = math.exp %239 : vector<2x128xf32>
    %cst_65 = arith.constant 1.000000e+00 : f32
    %241 = vector.broadcast %cst_65 : f32 to vector<2x128xf32>
    %242 = arith.addf %241, %240 : vector<2x128xf32>
    %243 = arith.divf %241, %242 : vector<2x128xf32>
    %244 = vector.extract_strided_slice %237 {offsets = [0, 128], sizes = [2, 128], strides = [1, 1]} : vector<2x512xf32> to vector<2x128xf32>
    %245 = arith.negf %244 : vector<2x128xf32>
    %246 = math.exp %245 : vector<2x128xf32>
    %cst_66 = arith.constant 1.000000e+00 : f32
    %247 = vector.broadcast %cst_66 : f32 to vector<2x128xf32>
    %248 = arith.addf %247, %246 : vector<2x128xf32>
    %249 = arith.divf %247, %248 : vector<2x128xf32>
    %250 = vector.extract_strided_slice %237 {offsets = [0, 256], sizes = [2, 128], strides = [1, 1]} : vector<2x512xf32> to vector<2x128xf32>
    %251 = math.tanh %250 : vector<2x128xf32>
    %252 = vector.extract_strided_slice %237 {offsets = [0, 384], sizes = [2, 128], strides = [1, 1]} : vector<2x512xf32> to vector<2x128xf32>
    %253 = arith.negf %252 : vector<2x128xf32>
    %254 = math.exp %253 : vector<2x128xf32>
    %cst_67 = arith.constant 1.000000e+00 : f32
    %255 = vector.broadcast %cst_67 : f32 to vector<2x128xf32>
    %256 = arith.addf %255, %254 : vector<2x128xf32>
    %257 = arith.divf %255, %256 : vector<2x128xf32>
    %258 = arith.mulf %249, %230 : vector<2x128xf32>
    %259 = arith.mulf %243, %251 : vector<2x128xf32>
    %260 = arith.addf %258, %259 : vector<2x128xf32>
    %261 = math.tanh %260 : vector<2x128xf32>
    %262 = arith.mulf %257, %261 : vector<2x128xf32>
    %263 = arith.addf %233, %262 : vector<2x128xf32>
    %264 = vector.extract_strided_slice %20 {offsets = [16, 0], sizes = [2, 512], strides = [1, 1]} : vector<28x512xf32> to vector<2x512xf32>
    %c0_68 = arith.constant 0 : index
    %c0_69 = arith.constant 0 : index
    %265 = vector.load %arg4[%c0_68, %c0_69] : memref<128x512xf32, #tpu.memory_space<vmem>>, vector<128x512xf32>
    %cst_70 = arith.constant dense<0.000000e+00> : vector<2x512xf32>
    %266 = tpu.matmul %262, %265, %cst_70 {dimension_numbers = #tpu.dot_dimension_numbers<[1], [0], [0], [1], [0, 0, 1, 1], [], []>} : vector<2x128xf32>, vector<128x512xf32>, vector<2x512xf32> -> vector<2x512xf32>
    %267 = arith.addf %264, %266 : vector<2x512xf32>
    %268 = vector.extract_strided_slice %267 {offsets = [0, 0], sizes = [2, 128], strides = [1, 1]} : vector<2x512xf32> to vector<2x128xf32>
    %269 = arith.negf %268 : vector<2x128xf32>
    %270 = math.exp %269 : vector<2x128xf32>
    %cst_71 = arith.constant 1.000000e+00 : f32
    %271 = vector.broadcast %cst_71 : f32 to vector<2x128xf32>
    %272 = arith.addf %271, %270 : vector<2x128xf32>
    %273 = arith.divf %271, %272 : vector<2x128xf32>
    %274 = vector.extract_strided_slice %267 {offsets = [0, 128], sizes = [2, 128], strides = [1, 1]} : vector<2x512xf32> to vector<2x128xf32>
    %275 = arith.negf %274 : vector<2x128xf32>
    %276 = math.exp %275 : vector<2x128xf32>
    %cst_72 = arith.constant 1.000000e+00 : f32
    %277 = vector.broadcast %cst_72 : f32 to vector<2x128xf32>
    %278 = arith.addf %277, %276 : vector<2x128xf32>
    %279 = arith.divf %277, %278 : vector<2x128xf32>
    %280 = vector.extract_strided_slice %267 {offsets = [0, 256], sizes = [2, 128], strides = [1, 1]} : vector<2x512xf32> to vector<2x128xf32>
    %281 = math.tanh %280 : vector<2x128xf32>
    %282 = vector.extract_strided_slice %267 {offsets = [0, 384], sizes = [2, 128], strides = [1, 1]} : vector<2x512xf32> to vector<2x128xf32>
    %283 = arith.negf %282 : vector<2x128xf32>
    %284 = math.exp %283 : vector<2x128xf32>
    %cst_73 = arith.constant 1.000000e+00 : f32
    %285 = vector.broadcast %cst_73 : f32 to vector<2x128xf32>
    %286 = arith.addf %285, %284 : vector<2x128xf32>
    %287 = arith.divf %285, %286 : vector<2x128xf32>
    %288 = arith.mulf %279, %260 : vector<2x128xf32>
    %289 = arith.mulf %273, %281 : vector<2x128xf32>
    %290 = arith.addf %288, %289 : vector<2x128xf32>
    %291 = math.tanh %290 : vector<2x128xf32>
    %292 = arith.mulf %287, %291 : vector<2x128xf32>
    %293 = arith.addf %263, %292 : vector<2x128xf32>
    %294 = vector.extract_strided_slice %20 {offsets = [18, 0], sizes = [2, 512], strides = [1, 1]} : vector<28x512xf32> to vector<2x512xf32>
    %c0_74 = arith.constant 0 : index
    %c0_75 = arith.constant 0 : index
    %295 = vector.load %arg4[%c0_74, %c0_75] : memref<128x512xf32, #tpu.memory_space<vmem>>, vector<128x512xf32>
    %cst_76 = arith.constant dense<0.000000e+00> : vector<2x512xf32>
    %296 = tpu.matmul %292, %295, %cst_76 {dimension_numbers = #tpu.dot_dimension_numbers<[1], [0], [0], [1], [0, 0, 1, 1], [], []>} : vector<2x128xf32>, vector<128x512xf32>, vector<2x512xf32> -> vector<2x512xf32>
    %297 = arith.addf %294, %296 : vector<2x512xf32>
    %298 = vector.extract_strided_slice %297 {offsets = [0, 0], sizes = [2, 128], strides = [1, 1]} : vector<2x512xf32> to vector<2x128xf32>
    %299 = arith.negf %298 : vector<2x128xf32>
    %300 = math.exp %299 : vector<2x128xf32>
    %cst_77 = arith.constant 1.000000e+00 : f32
    %301 = vector.broadcast %cst_77 : f32 to vector<2x128xf32>
    %302 = arith.addf %301, %300 : vector<2x128xf32>
    %303 = arith.divf %301, %302 : vector<2x128xf32>
    %304 = vector.extract_strided_slice %297 {offsets = [0, 128], sizes = [2, 128], strides = [1, 1]} : vector<2x512xf32> to vector<2x128xf32>
    %305 = arith.negf %304 : vector<2x128xf32>
    %306 = math.exp %305 : vector<2x128xf32>
    %cst_78 = arith.constant 1.000000e+00 : f32
    %307 = vector.broadcast %cst_78 : f32 to vector<2x128xf32>
    %308 = arith.addf %307, %306 : vector<2x128xf32>
    %309 = arith.divf %307, %308 : vector<2x128xf32>
    %310 = vector.extract_strided_slice %297 {offsets = [0, 256], sizes = [2, 128], strides = [1, 1]} : vector<2x512xf32> to vector<2x128xf32>
    %311 = math.tanh %310 : vector<2x128xf32>
    %312 = vector.extract_strided_slice %297 {offsets = [0, 384], sizes = [2, 128], strides = [1, 1]} : vector<2x512xf32> to vector<2x128xf32>
    %313 = arith.negf %312 : vector<2x128xf32>
    %314 = math.exp %313 : vector<2x128xf32>
    %cst_79 = arith.constant 1.000000e+00 : f32
    %315 = vector.broadcast %cst_79 : f32 to vector<2x128xf32>
    %316 = arith.addf %315, %314 : vector<2x128xf32>
    %317 = arith.divf %315, %316 : vector<2x128xf32>
    %318 = arith.mulf %309, %290 : vector<2x128xf32>
    %319 = arith.mulf %303, %311 : vector<2x128xf32>
    %320 = arith.addf %318, %319 : vector<2x128xf32>
    %321 = math.tanh %320 : vector<2x128xf32>
    %322 = arith.mulf %317, %321 : vector<2x128xf32>
    %323 = arith.addf %293, %322 : vector<2x128xf32>
    %324 = vector.extract_strided_slice %20 {offsets = [20, 0], sizes = [2, 512], strides = [1, 1]} : vector<28x512xf32> to vector<2x512xf32>
    %c0_80 = arith.constant 0 : index
    %c0_81 = arith.constant 0 : index
    %325 = vector.load %arg4[%c0_80, %c0_81] : memref<128x512xf32, #tpu.memory_space<vmem>>, vector<128x512xf32>
    %cst_82 = arith.constant dense<0.000000e+00> : vector<2x512xf32>
    %326 = tpu.matmul %322, %325, %cst_82 {dimension_numbers = #tpu.dot_dimension_numbers<[1], [0], [0], [1], [0, 0, 1, 1], [], []>} : vector<2x128xf32>, vector<128x512xf32>, vector<2x512xf32> -> vector<2x512xf32>
    %327 = arith.addf %324, %326 : vector<2x512xf32>
    %328 = vector.extract_strided_slice %327 {offsets = [0, 0], sizes = [2, 128], strides = [1, 1]} : vector<2x512xf32> to vector<2x128xf32>
    %329 = arith.negf %328 : vector<2x128xf32>
    %330 = math.exp %329 : vector<2x128xf32>
    %cst_83 = arith.constant 1.000000e+00 : f32
    %331 = vector.broadcast %cst_83 : f32 to vector<2x128xf32>
    %332 = arith.addf %331, %330 : vector<2x128xf32>
    %333 = arith.divf %331, %332 : vector<2x128xf32>
    %334 = vector.extract_strided_slice %327 {offsets = [0, 128], sizes = [2, 128], strides = [1, 1]} : vector<2x512xf32> to vector<2x128xf32>
    %335 = arith.negf %334 : vector<2x128xf32>
    %336 = math.exp %335 : vector<2x128xf32>
    %cst_84 = arith.constant 1.000000e+00 : f32
    %337 = vector.broadcast %cst_84 : f32 to vector<2x128xf32>
    %338 = arith.addf %337, %336 : vector<2x128xf32>
    %339 = arith.divf %337, %338 : vector<2x128xf32>
    %340 = vector.extract_strided_slice %327 {offsets = [0, 256], sizes = [2, 128], strides = [1, 1]} : vector<2x512xf32> to vector<2x128xf32>
    %341 = math.tanh %340 : vector<2x128xf32>
    %342 = vector.extract_strided_slice %327 {offsets = [0, 384], sizes = [2, 128], strides = [1, 1]} : vector<2x512xf32> to vector<2x128xf32>
    %343 = arith.negf %342 : vector<2x128xf32>
    %344 = math.exp %343 : vector<2x128xf32>
    %cst_85 = arith.constant 1.000000e+00 : f32
    %345 = vector.broadcast %cst_85 : f32 to vector<2x128xf32>
    %346 = arith.addf %345, %344 : vector<2x128xf32>
    %347 = arith.divf %345, %346 : vector<2x128xf32>
    %348 = arith.mulf %339, %320 : vector<2x128xf32>
    %349 = arith.mulf %333, %341 : vector<2x128xf32>
    %350 = arith.addf %348, %349 : vector<2x128xf32>
    %351 = math.tanh %350 : vector<2x128xf32>
    %352 = arith.mulf %347, %351 : vector<2x128xf32>
    %353 = arith.addf %323, %352 : vector<2x128xf32>
    %354 = vector.extract_strided_slice %20 {offsets = [22, 0], sizes = [2, 512], strides = [1, 1]} : vector<28x512xf32> to vector<2x512xf32>
    %c0_86 = arith.constant 0 : index
    %c0_87 = arith.constant 0 : index
    %355 = vector.load %arg4[%c0_86, %c0_87] : memref<128x512xf32, #tpu.memory_space<vmem>>, vector<128x512xf32>
    %cst_88 = arith.constant dense<0.000000e+00> : vector<2x512xf32>
    %356 = tpu.matmul %352, %355, %cst_88 {dimension_numbers = #tpu.dot_dimension_numbers<[1], [0], [0], [1], [0, 0, 1, 1], [], []>} : vector<2x128xf32>, vector<128x512xf32>, vector<2x512xf32> -> vector<2x512xf32>
    %357 = arith.addf %354, %356 : vector<2x512xf32>
    %358 = vector.extract_strided_slice %357 {offsets = [0, 0], sizes = [2, 128], strides = [1, 1]} : vector<2x512xf32> to vector<2x128xf32>
    %359 = arith.negf %358 : vector<2x128xf32>
    %360 = math.exp %359 : vector<2x128xf32>
    %cst_89 = arith.constant 1.000000e+00 : f32
    %361 = vector.broadcast %cst_89 : f32 to vector<2x128xf32>
    %362 = arith.addf %361, %360 : vector<2x128xf32>
    %363 = arith.divf %361, %362 : vector<2x128xf32>
    %364 = vector.extract_strided_slice %357 {offsets = [0, 128], sizes = [2, 128], strides = [1, 1]} : vector<2x512xf32> to vector<2x128xf32>
    %365 = arith.negf %364 : vector<2x128xf32>
    %366 = math.exp %365 : vector<2x128xf32>
    %cst_90 = arith.constant 1.000000e+00 : f32
    %367 = vector.broadcast %cst_90 : f32 to vector<2x128xf32>
    %368 = arith.addf %367, %366 : vector<2x128xf32>
    %369 = arith.divf %367, %368 : vector<2x128xf32>
    %370 = vector.extract_strided_slice %357 {offsets = [0, 256], sizes = [2, 128], strides = [1, 1]} : vector<2x512xf32> to vector<2x128xf32>
    %371 = math.tanh %370 : vector<2x128xf32>
    %372 = vector.extract_strided_slice %357 {offsets = [0, 384], sizes = [2, 128], strides = [1, 1]} : vector<2x512xf32> to vector<2x128xf32>
    %373 = arith.negf %372 : vector<2x128xf32>
    %374 = math.exp %373 : vector<2x128xf32>
    %cst_91 = arith.constant 1.000000e+00 : f32
    %375 = vector.broadcast %cst_91 : f32 to vector<2x128xf32>
    %376 = arith.addf %375, %374 : vector<2x128xf32>
    %377 = arith.divf %375, %376 : vector<2x128xf32>
    %378 = arith.mulf %369, %350 : vector<2x128xf32>
    %379 = arith.mulf %363, %371 : vector<2x128xf32>
    %380 = arith.addf %378, %379 : vector<2x128xf32>
    %381 = math.tanh %380 : vector<2x128xf32>
    %382 = arith.mulf %377, %381 : vector<2x128xf32>
    %383 = arith.addf %353, %382 : vector<2x128xf32>
    %384 = vector.extract_strided_slice %20 {offsets = [24, 0], sizes = [2, 512], strides = [1, 1]} : vector<28x512xf32> to vector<2x512xf32>
    %c0_92 = arith.constant 0 : index
    %c0_93 = arith.constant 0 : index
    %385 = vector.load %arg4[%c0_92, %c0_93] : memref<128x512xf32, #tpu.memory_space<vmem>>, vector<128x512xf32>
    %cst_94 = arith.constant dense<0.000000e+00> : vector<2x512xf32>
    %386 = tpu.matmul %382, %385, %cst_94 {dimension_numbers = #tpu.dot_dimension_numbers<[1], [0], [0], [1], [0, 0, 1, 1], [], []>} : vector<2x128xf32>, vector<128x512xf32>, vector<2x512xf32> -> vector<2x512xf32>
    %387 = arith.addf %384, %386 : vector<2x512xf32>
    %388 = vector.extract_strided_slice %387 {offsets = [0, 0], sizes = [2, 128], strides = [1, 1]} : vector<2x512xf32> to vector<2x128xf32>
    %389 = arith.negf %388 : vector<2x128xf32>
    %390 = math.exp %389 : vector<2x128xf32>
    %cst_95 = arith.constant 1.000000e+00 : f32
    %391 = vector.broadcast %cst_95 : f32 to vector<2x128xf32>
    %392 = arith.addf %391, %390 : vector<2x128xf32>
    %393 = arith.divf %391, %392 : vector<2x128xf32>
    %394 = vector.extract_strided_slice %387 {offsets = [0, 128], sizes = [2, 128], strides = [1, 1]} : vector<2x512xf32> to vector<2x128xf32>
    %395 = arith.negf %394 : vector<2x128xf32>
    %396 = math.exp %395 : vector<2x128xf32>
    %cst_96 = arith.constant 1.000000e+00 : f32
    %397 = vector.broadcast %cst_96 : f32 to vector<2x128xf32>
    %398 = arith.addf %397, %396 : vector<2x128xf32>
    %399 = arith.divf %397, %398 : vector<2x128xf32>
    %400 = vector.extract_strided_slice %387 {offsets = [0, 256], sizes = [2, 128], strides = [1, 1]} : vector<2x512xf32> to vector<2x128xf32>
    %401 = math.tanh %400 : vector<2x128xf32>
    %402 = vector.extract_strided_slice %387 {offsets = [0, 384], sizes = [2, 128], strides = [1, 1]} : vector<2x512xf32> to vector<2x128xf32>
    %403 = arith.negf %402 : vector<2x128xf32>
    %404 = math.exp %403 : vector<2x128xf32>
    %cst_97 = arith.constant 1.000000e+00 : f32
    %405 = vector.broadcast %cst_97 : f32 to vector<2x128xf32>
    %406 = arith.addf %405, %404 : vector<2x128xf32>
    %407 = arith.divf %405, %406 : vector<2x128xf32>
    %408 = arith.mulf %399, %380 : vector<2x128xf32>
    %409 = arith.mulf %393, %401 : vector<2x128xf32>
    %410 = arith.addf %408, %409 : vector<2x128xf32>
    %411 = math.tanh %410 : vector<2x128xf32>
    %412 = arith.mulf %407, %411 : vector<2x128xf32>
    %413 = arith.addf %383, %412 : vector<2x128xf32>
    %414 = vector.extract_strided_slice %20 {offsets = [26, 0], sizes = [2, 512], strides = [1, 1]} : vector<28x512xf32> to vector<2x512xf32>
    %c0_98 = arith.constant 0 : index
    %c0_99 = arith.constant 0 : index
    %415 = vector.load %arg4[%c0_98, %c0_99] : memref<128x512xf32, #tpu.memory_space<vmem>>, vector<128x512xf32>
    %cst_100 = arith.constant dense<0.000000e+00> : vector<2x512xf32>
    %416 = tpu.matmul %412, %415, %cst_100 {dimension_numbers = #tpu.dot_dimension_numbers<[1], [0], [0], [1], [0, 0, 1, 1], [], []>} : vector<2x128xf32>, vector<128x512xf32>, vector<2x512xf32> -> vector<2x512xf32>
    %417 = arith.addf %414, %416 : vector<2x512xf32>
    %418 = vector.extract_strided_slice %417 {offsets = [0, 0], sizes = [2, 128], strides = [1, 1]} : vector<2x512xf32> to vector<2x128xf32>
    %419 = arith.negf %418 : vector<2x128xf32>
    %420 = math.exp %419 : vector<2x128xf32>
    %cst_101 = arith.constant 1.000000e+00 : f32
    %421 = vector.broadcast %cst_101 : f32 to vector<2x128xf32>
    %422 = arith.addf %421, %420 : vector<2x128xf32>
    %423 = arith.divf %421, %422 : vector<2x128xf32>
    %424 = vector.extract_strided_slice %417 {offsets = [0, 128], sizes = [2, 128], strides = [1, 1]} : vector<2x512xf32> to vector<2x128xf32>
    %425 = arith.negf %424 : vector<2x128xf32>
    %426 = math.exp %425 : vector<2x128xf32>
    %cst_102 = arith.constant 1.000000e+00 : f32
    %427 = vector.broadcast %cst_102 : f32 to vector<2x128xf32>
    %428 = arith.addf %427, %426 : vector<2x128xf32>
    %429 = arith.divf %427, %428 : vector<2x128xf32>
    %430 = vector.extract_strided_slice %417 {offsets = [0, 256], sizes = [2, 128], strides = [1, 1]} : vector<2x512xf32> to vector<2x128xf32>
    %431 = math.tanh %430 : vector<2x128xf32>
    %432 = vector.extract_strided_slice %417 {offsets = [0, 384], sizes = [2, 128], strides = [1, 1]} : vector<2x512xf32> to vector<2x128xf32>
    %433 = arith.negf %432 : vector<2x128xf32>
    %434 = math.exp %433 : vector<2x128xf32>
    %cst_103 = arith.constant 1.000000e+00 : f32
    %435 = vector.broadcast %cst_103 : f32 to vector<2x128xf32>
    %436 = arith.addf %435, %434 : vector<2x128xf32>
    %437 = arith.divf %435, %436 : vector<2x128xf32>
    %438 = arith.mulf %429, %410 : vector<2x128xf32>
    %439 = arith.mulf %423, %431 : vector<2x128xf32>
    %440 = arith.addf %438, %439 : vector<2x128xf32>
    %441 = math.tanh %440 : vector<2x128xf32>
    %442 = arith.mulf %437, %441 : vector<2x128xf32>
    %443 = arith.addf %413, %442 : vector<2x128xf32>
    %cst_104 = arith.constant 0.0714285746 : f32
    %444 = vector.broadcast %cst_104 : f32 to vector<2x128xf32>
    %445 = arith.mulf %443, %444 : vector<2x128xf32>
    %446 = math.tanh %445 : vector<2x128xf32>
    %c0_105 = arith.constant 0 : index
    %c0_106 = arith.constant 0 : index
    %447 = vector.load %arg6[%c0_105, %c0_106] : memref<128x16xf32, #tpu.memory_space<vmem>>, vector<128x16xf32>
    %cst_107 = arith.constant dense<0.000000e+00> : vector<2x16xf32>
    %448 = tpu.matmul %446, %447, %cst_107 {dimension_numbers = #tpu.dot_dimension_numbers<[1], [0], [0], [1], [0, 0, 1, 1], [], []>} : vector<2x128xf32>, vector<128x16xf32>, vector<2x16xf32> -> vector<2x16xf32>
    %c0_108 = arith.constant 0 : index
    %c0_109 = arith.constant 0 : index
    %449 = vector.load %arg7[%c0_108, %c0_109] : memref<1x16xf32, #tpu.memory_space<vmem>>, vector<1x16xf32>
    %450 = vector.broadcast %449 : vector<1x16xf32> to vector<2x16xf32>
    %451 = arith.addf %448, %450 : vector<2x16xf32>
    %452 = math.tanh %451 : vector<2x16xf32>
    %c0_110 = arith.constant 0 : index
    %c0_111 = arith.constant 0 : index
    %453 = vector.load %arg8[%c0_110, %c0_111] : memref<16x4xf32, #tpu.memory_space<vmem>>, vector<16x4xf32>
    %cst_112 = arith.constant dense<0.000000e+00> : vector<2x4xf32>
    %454 = tpu.matmul %452, %453, %cst_112 {dimension_numbers = #tpu.dot_dimension_numbers<[1], [0], [0], [1], [0, 0, 1, 1], [], []>} : vector<2x16xf32>, vector<16x4xf32>, vector<2x4xf32> -> vector<2x4xf32>
    %c0_113 = arith.constant 0 : index
    %c0_114 = arith.constant 0 : index
    %455 = vector.load %arg9[%c0_113, %c0_114] : memref<1x4xf32, #tpu.memory_space<vmem>>, vector<1x4xf32>
    %456 = vector.broadcast %455 : vector<1x4xf32> to vector<2x4xf32>
    %457 = arith.addf %454, %456 : vector<2x4xf32>
    %c0_115 = arith.constant 0 : index
    %c0_116 = arith.constant 0 : index
    %458 = vector.load %arg10[%c0_115, %c0_116] : memref<2x4xf32, #tpu.memory_space<vmem>>, vector<2x4xf32>
    tpu.vector_store %arg10[%c0_115, %c0_116], %457 {strides = array<i32>} : memref<2x4xf32, #tpu.memory_space<vmem>>, vector<2x4xf32>,
    return
  }
}

</mosaic_0001>

<bundles_post_ra>
// kernel: clstm_forward.1
= control target key start
LH: loop header
LB: loop body
LE: loop exit
PB: predicated region body
PF: predicated region fallthrough
CT: control target
= control target key end

     0   :  { %15 = vsyncpa [#allocation3], 0  ;;  %s5605_s0 = inlined_call_operand.vmem [shape: f32[32,128], index: 0, kind: input, shape index: {}]   ;;  %s5606_s1 = inlined_call_operand.hbm [shape: f32[384,256], index: 1, kind: input, shape index: {}]   ;;  %s5607_s2 = inlined_call_operand.vmem [shape: f32[1,256], index: 2, kind: input, shape index: {}]   ;;  %s5608_s3 = inlined_call_operand.hbm [shape: f32[256,512], index: 3, kind: input, shape index: {}]   ;;  %s5609_s4 = inlined_call_operand.hbm [shape: f32[128,512], index: 4, kind: input, shape index: {}]   ;;  %s5610_s5 = inlined_call_operand.vmem [shape: f32[1,512], index: 5, kind: input, shape index: {}]   ;;  %s5611_s6 = inlined_call_operand.vmem [shape: f32[128,16], index: 6, kind: input, shape index: {}]   ;;  %s5612_s7 = inlined_call_operand.vmem [shape: f32[1,16], index: 7, kind: input, shape index: {}]   ;;  %s5613_s8 = inlined_call_operand.vmem [shape: f32[16,4], index: 8, kind: input, shape index: {}]   ;;  %s5614_s9 = inlined_call_operand.vmem [shape: f32[1,4], index: 9, kind: input, shape index: {}]   ;;  %s5615_s10 = inlined_call_operand.hbm [shape: f32[2,4], index: 10, kind: output, shape index: {}]  }
   0x1   :  { %16 = vsyncpa [#allocation6], 0  ;;  %s39_s15 = sshll.u32 %s5608_s3, 4  ;;  %s40_s15 = int_to_ptr.hbm [resolvable:$true] %s39_s15 }
   0x2   :  { %17 = vsyncpa [#allocation4], 0  ;;  %s3759_s16 = smov [#allocation5]   ;;  %s24_s20 = sshll.u32 %s5606_s1, 4  ;;  %s25_s20 = int_to_ptr.hbm [resolvable:$true] %s24_s20 }
   0x3   :  { %s41_s17 = sshll.u32 %s3759_s16, 4  ;;  %s3760_s21 = smov 512   ;;  %s42_s17 = int_to_ptr.vmem [resolvable:$true] %s41_s17 }
   0x4   :  { %s3761_s22 = smov 32   ;;  %s3762_s23 = smov [#allocation2]  }
   0x5   :  { %47 = dma.hbm_to_vmem [thread:$0]  %s40_s15, 16384, %s42_s17, [#allocation6], %s3760_s21, %s3760_s21, %s3761_s22  }
   0x6   :  { %s26_s24 = sshll.u32 %s3762_s23, 4  ;;  %s3763_s25 = smov 256   ;;  %s27_s24 = int_to_ptr.vmem [resolvable:$true] %s26_s24 }
   0x7   :  { %s3764_s26 = smov 16   ;;  %s52_s28 = sshll.u32 %s5609_s4, 4  ;;  %s53_s28 = int_to_ptr.hbm [resolvable:$true] %s52_s28 }
   0x8   :  { %32 = dma.hbm_to_vmem [thread:$0]  %s25_s20, 12288, %s27_s24, [#allocation3], %s3763_s25, %s3763_s25, %s3764_s26  }
   0x9   :  { %s3765_s29 = smov [#allocation7]  }
   0xa   :  { %s54_s30 = sshll.u32 %s3765_s29, 4  ;;  %s55_s30 = int_to_ptr.vmem [resolvable:$true] %s54_s30 }
   0xb   :  { %60 = dma.hbm_to_vmem [thread:$0]  %s53_s28, 8192, %s55_s30, [#allocation6], %s3760_s21, %s3760_s21, %s3761_s22  }
   0xc   :  { %3753 = dma.done.wait [#allocation3], 12288  }
   0xd   :  { %3754 = vsyncadd [#allocation3], 4294955008 }
   0xe   :  { %3755 = dma.done.wait [#allocation6], 24576  }
   0xf   :  { %3756 = vsyncadd [#allocation6], 4294942720  ;;  %v153_v0 = vld [vmem:[#allocation2 + $0x1f0] sm:$0xff]  ;;  %v154_v1 = vld [vmem:[#allocation2 + $0x1f8] sm:$0xff]  ;;  %s3767_s24 = smov [#allocation8]   ;;  %s3172_s3 = sshll.u32 %s5615_s10, 4  ;;  %s3173_s3 = int_to_ptr.hbm [resolvable:$true] %s3172_s3 }
  0x10   :  { %v117_v2 = vld [vmem:[#allocation2 + $0xf0] sm:$0xff]  ;;  %155 = vmatpush.msra.mxu0 %v153_v0  ;;  %184 = vmatpush.msra.mxu1 %v154_v1  ;;  %v118_v3 = vld [vmem:[#allocation2 + $0xf8] sm:$0xff]  ;;  %v151_v4 = vld [vmem:[#allocation2 + $0x1e0] sm:$0xff]  ;;  %s3170_s25 = sshll.u32 %s3767_s24, 4  ;;  %s3171_s25 = int_to_ptr.vmem [resolvable:$true] %s3170_s25 }
  0x11   :  { %v152_v5 = vld [vmem:[#allocation2 + $0x1e8] sm:$0xff]  ;;  %213 = vmatpush.msra.mxu2 %v117_v2  ;;  %242 = vmatpush.msra.mxu3 %v118_v3  ;;  %v115_v6 = vld [vmem:[#allocation2 + $0xe0] sm:$0xff]  ;;  %v149_v8 = vld [vmem:[#allocation2 + $0x1d0] sm:$0xff] }
  0x12   :  { %v116_v7 = vld [vmem:[#allocation2 + $0xe8] sm:$0xff]  ;;  %156 = vmatpush.msra.mxu0 %v151_v4  ;;  %185 = vmatpush.msra.mxu1 %v152_v5  ;;  %v150_v9 = vld [vmem:[#allocation2 + $0x1d8] sm:$0xff]  ;;  %v113_v10 = vld [vmem:[#allocation2 + $0xd0] sm:$0xff] }
  0x13   :  { %v114_v11 = vld [vmem:[#allocation2 + $0xd8] sm:$0xff]  ;;  %214 = vmatpush.msra.mxu2 %v115_v6  ;;  %243 = vmatpush.msra.mxu3 %v116_v7  ;;  %v147_v12 = vld [vmem:[#allocation2 + $0x1c0] sm:$0xff]  ;;  %v148_v13 = vld [vmem:[#allocation2 + $0x1c8] sm:$0xff] }
  0x14   :  { %157 = vmatpush.msra.mxu0 %v149_v8  ;;  %186 = vmatpush.msra.mxu1 %v150_v9  ;;  %v111_v14 = vld [vmem:[#allocation2 + $0xc0] sm:$0xff]  ;;  %v112_v15 = vld [vmem:[#allocation2 + $0xc8] sm:$0xff]  ;;  %v145_v16 = vld [vmem:[#allocation2 + $0x1b0] sm:$0xff] }
  0x15   :  { %215 = vmatpush.msra.mxu2 %v113_v10  ;;  %244 = vmatpush.msra.mxu3 %v114_v11  ;;  %v146_v17 = vld [vmem:[#allocation2 + $0x1b8] sm:$0xff]  ;;  %v109_v18 = vld [vmem:[#allocation2 + $0xb0] sm:$0xff]  ;;  %v143_v20 = vld [vmem:[#allocation2 + $0x1a0] sm:$0xff] }
  0x16   :  { %158 = vmatpush.msra.mxu0 %v147_v12  ;;  %187 = vmatpush.msra.mxu1 %v148_v13  ;;  %v110_v19 = vld [vmem:[#allocation2 + $0xb8] sm:$0xff]  ;;  %v144_v21 = vld [vmem:[#allocation2 + $0x1a8] sm:$0xff]  ;;  %v107_v22 = vld [vmem:[#allocation2 + $0xa0] sm:$0xff] }
  0x17   :  { %216 = vmatpush.msra.mxu2 %v111_v14  ;;  %245 = vmatpush.msra.mxu3 %v112_v15  ;;  %v108_v23 = vld [vmem:[#allocation2 + $0xa8] sm:$0xff]  ;;  %v141_v24 = vld [vmem:[#allocation2 + $0x190] sm:$0xff]  ;;  %v142_v25 = vld [vmem:[#allocation2 + $0x198] sm:$0xff] }
  0x18   :  { %159 = vmatpush.msra.mxu0 %v145_v16  ;;  %188 = vmatpush.msra.mxu1 %v146_v17  ;;  %v105_v26 = vld [vmem:[#allocation2 + $0x90] sm:$0xff]  ;;  %v106_v27 = vld [vmem:[#allocation2 + $0x98] sm:$0xff]  ;;  %v139_v28 = vld [vmem:[#allocation2 + $0x180] sm:$0xff] }
  0x19   :  { %217 = vmatpush.msra.mxu2 %v109_v18  ;;  %246 = vmatpush.msra.mxu3 %v110_v19  ;;  %v140_v29 = vld [vmem:[#allocation2 + $0x188] sm:$0xff]  ;;  %v103_v30 = vld [vmem:[#allocation2 + $0x80] sm:$0xff]  ;;  %v137_v32 = vld [vmem:[#allocation2 + $0x170] sm:$0xff] }
  0x1a   :  { %160 = vmatpush.msra.mxu0 %v143_v20  ;;  %189 = vmatpush.msra.mxu1 %v144_v21  ;;  %v104_v31 = vld [vmem:[#allocation2 + $0x88] sm:$0xff]  ;;  %v138_v33 = vld [vmem:[#allocation2 + $0x178] sm:$0xff]  ;;  %v101_v34 = vld [vmem:[#allocation2 + $0x70] sm:$0xff] }
  0x1b   :  { %218 = vmatpush.msra.mxu2 %v107_v22  ;;  %247 = vmatpush.msra.mxu3 %v108_v23  ;;  %v102_v35 = vld [vmem:[#allocation2 + $0x78] sm:$0xff]  ;;  %v135_v36 = vld [vmem:[#allocation2 + $0x160] sm:$0xff]  ;;  %v136_v37 = vld [vmem:[#allocation2 + $0x168] sm:$0xff] }
  0x1c   :  { %161 = vmatpush.msra.mxu0 %v141_v24  ;;  %190 = vmatpush.msra.mxu1 %v142_v25  ;;  %v99_v38 = vld [vmem:[#allocation2 + $0x60] sm:$0xff]  ;;  %v100_v39 = vld [vmem:[#allocation2 + $0x68] sm:$0xff]  ;;  %v133_v40 = vld [vmem:[#allocation2 + $0x150] sm:$0xff] }
  0x1d   :  { %219 = vmatpush.msra.mxu2 %v105_v26  ;;  %248 = vmatpush.msra.mxu3 %v106_v27  ;;  %v134_v41 = vld [vmem:[#allocation2 + $0x158] sm:$0xff]  ;;  %v97_v42 = vld [vmem:[#allocation2 + $0x50] sm:$0xff]  ;;  %v131_v44 = vld [vmem:[#allocation2 + $0x140] sm:$0xff] }
  0x1e   :  { %162 = vmatpush.msra.mxu0 %v139_v28  ;;  %191 = vmatpush.msra.mxu1 %v140_v29  ;;  %v98_v43 = vld [vmem:[#allocation2 + $0x58] sm:$0xff]  ;;  %v132_v45 = vld [vmem:[#allocation2 + $0x148] sm:$0xff]  ;;  %v95_v46 = vld [vmem:[#allocation2 + $0x40] sm:$0xff] }
  0x1f   :  { %220 = vmatpush.msra.mxu2 %v103_v30  ;;  %249 = vmatpush.msra.mxu3 %v104_v31  ;;  %v96_v47 = vld [vmem:[#allocation2 + $0x48] sm:$0xff]  ;;  %v129_v48 = vld [vmem:[#allocation2 + $0x130] sm:$0xff]  ;;  %v130_v49 = vld [vmem:[#allocation2 + $0x138] sm:$0xff] }
  0x20   :  { %163 = vmatpush.msra.mxu0 %v137_v32  ;;  %192 = vmatpush.msra.mxu1 %v138_v33  ;;  %v93_v50 = vld [vmem:[#allocation2 + $0x30] sm:$0xff]  ;;  %v94_v51 = vld [vmem:[#allocation2 + $0x38] sm:$0xff]  ;;  %v127_v52 = vld [vmem:[#allocation2 + $0x120] sm:$0xff] }
  0x21   :  { %221 = vmatpush.msra.mxu2 %v101_v34  ;;  %250 = vmatpush.msra.mxu3 %v102_v35  ;;  %v128_v53 = vld [vmem:[#allocation2 + $0x128] sm:$0xff]  ;;  %v91_v54 = vld [vmem:[#allocation2 + $0x20] sm:$0xff]  ;;  %v125_v56 = vld [vmem:[#allocation2 + $0x110] sm:$0xff] }
  0x22   :  { %164 = vmatpush.msra.mxu0 %v135_v36  ;;  %193 = vmatpush.msra.mxu1 %v136_v37  ;;  %v92_v55 = vld [vmem:[#allocation2 + $0x28] sm:$0xff]  ;;  %v126_v57 = vld [vmem:[#allocation2 + $0x118] sm:$0xff]  ;;  %v89_v58 = vld [vmem:[#allocation2 + $0x10] sm:$0xff] }
  0x23   :  { %222 = vmatpush.msra.mxu2 %v99_v38  ;;  %251 = vmatpush.msra.mxu3 %v100_v39  ;;  %v90_v59 = vld [vmem:[#allocation2 + $0x18] sm:$0xff]  ;;  %v123_v60 = vld [vmem:[#allocation2 + $0x100] sm:$0xff]  ;;  %v124_v61 = vld [vmem:[#allocation2 + $0x108] sm:$0xff] }
  0x24   :  { %165 = vmatpush.msra.mxu0 %v133_v40  ;;  %194 = vmatpush.msra.mxu1 %v134_v41  ;;  %v87_v62 = vld [vmem:[#allocation2] sm:$0xff]  ;;  %v88_v63 = vld [vmem:[#allocation2 + $0x8] sm:$0xff]  ;;  %v305_v2 = vld [vmem:[#allocation2 + $0x2f0] sm:$0xff] }
  0x25   :  { %223 = vmatpush.msra.mxu2 %v97_v42  ;;  %252 = vmatpush.msra.mxu3 %v98_v43  ;;  %v119_v0 = vld [vmem:[%s5605_s0 + $0x2] sm:$0xff]  ;;  %v306_v3 = vld [vmem:[#allocation2 + $0x2f8] sm:$0xff]  ;;  %v301_v6 = vld [vmem:[#allocation2 + $0x2d0] sm:$0xff] }
  0x26   :  { %166 = vmatpush.msra.mxu0 %v131_v44  ;;  %195 = vmatpush.msra.mxu1 %v132_v45  ;;  %v83_v1 = vld [vmem:[%s5605_s0] sm:$0xff]  ;;  %v304_v5 = vld [vmem:[#allocation2 + $0x2e8] sm:$0xff]  ;;  %v302_v7 = vld [vmem:[#allocation2 + $0x2d8] sm:$0xff] }
  0x27   :  { %224 = vmatpush.msra.mxu2 %v95_v46  ;;  %253 = vmatpush.msra.mxu3 %v96_v47  ;;  %v303_v4 = vld [vmem:[#allocation2 + $0x2e0] sm:$0xff]  ;;  %v300_v9 = vld [vmem:[#allocation2 + $0x2c8] sm:$0xff]  ;;  %v297_v12 = vld [vmem:[#allocation2 + $0x2b0] sm:$0xff] }
  0x28   :  { %167 = vmatpush.msra.mxu0 %v129_v48  ;;  %196 = vmatpush.msra.mxu1 %v130_v49  ;;  %v299_v8 = vld [vmem:[#allocation2 + $0x2c0] sm:$0xff]  ;;  %v120_v10 = vld [vmem:[%s5605_s0 + $0xa] sm:$0xff]  ;;  %v298_v13 = vld [vmem:[#allocation2 + $0x2b8] sm:$0xff] }
  0x29   :  { %225 = vmatpush.msra.mxu2 %v93_v50  ;;  %254 = vmatpush.msra.mxu3 %v94_v51  ;;  %v84_v11 = vld [vmem:[%s5605_s0 + $0x8] sm:$0xff]  ;;  %v295_v14 = vld [vmem:[#allocation2 + $0x2a0] sm:$0xff]  ;;  %v293_v16 = vld [vmem:[#allocation2 + $0x290] sm:$0xff] }
  0x2a   :  { %168 = vmatpush.msra.mxu0 %v127_v52  ;;  %197 = vmatpush.msra.mxu1 %v128_v53  ;;  %v296_v15 = vld [vmem:[#allocation2 + $0x2a8] sm:$0xff]  ;;  %v294_v17 = vld [vmem:[#allocation2 + $0x298] sm:$0xff]  ;;  %v291_v18 = vld [vmem:[#allocation2 + $0x280] sm:$0xff] }
  0x2b   :  { %226 = vmatpush.msra.mxu2 %v91_v54  ;;  %255 = vmatpush.msra.mxu3 %v92_v55  ;;  %v292_v19 = vld [vmem:[#allocation2 + $0x288] sm:$0xff]  ;;  %v121_v20 = vld [vmem:[%s5605_s0 + $0x12] sm:$0xff]  ;;  %v287_v24 = vld [vmem:[#allocation2 + $0x260] sm:$0xff] }
  0x2c   :  { %169 = vmatpush.msra.mxu0 %v125_v56  ;;  %198 = vmatpush.msra.mxu1 %v126_v57  ;;  %v85_v21 = vld [vmem:[%s5605_s0 + $0x10] sm:$0xff]  ;;  %v290_v23 = vld [vmem:[#allocation2 + $0x278] sm:$0xff]  ;;  %v288_v25 = vld [vmem:[#allocation2 + $0x268] sm:$0xff] }
  0x2d   :  { %227 = vmatpush.msra.mxu2 %v89_v58  ;;  %256 = vmatpush.msra.mxu3 %v90_v59  ;;  %v289_v22 = vld [vmem:[#allocation2 + $0x270] sm:$0xff]  ;;  %v286_v27 = vld [vmem:[#allocation2 + $0x258] sm:$0xff]  ;;  %v283_v28 = vld [vmem:[#allocation2 + $0x240] sm:$0xff] }
  0x2e   :  { %170 = vmatpush.msra.mxu0 %v123_v60  ;;  %199 = vmatpush.msra.mxu1 %v124_v61  ;;  %v285_v26 = vld [vmem:[#allocation2 + $0x250] sm:$0xff]  ;;  %v284_v29 = vld [vmem:[#allocation2 + $0x248] sm:$0xff]  ;;  %v122_v30 = vld [vmem:[%s5605_s0 + $0x1a] sm:$0xf] }
  0x2f   :  { %228 = vmatpush.msra.mxu2 %v87_v62  ;;  %257 = vmatpush.msra.mxu3 %v88_v63  ;;  %v86_v31 = vld [vmem:[%s5605_s0 + $0x18] sm:$0xf]  ;;  %v281_v32 = vld [vmem:[#allocation2 + $0x230] sm:$0xff]  ;;  %v279_v34 = vld [vmem:[#allocation2 + $0x220] sm:$0xff] }
  0x30   :  { %171 = vmatmul.f32.vlgmr.msra.gmra.mxu0 %v119_v0  ;;  %200 = vmatmul.f32.vlgmr.msra.gmra.mxu1 %v119_v0  ;;  %v282_v33 = vld [vmem:[#allocation2 + $0x238] sm:$0xff]  ;;  %v280_v35 = vld [vmem:[#allocation2 + $0x228] sm:$0xff]  ;;  %v277_v36 = vld [vmem:[#allocation2 + $0x210] sm:$0xff] }
  0x31   :  { %229 = vmatmul.f32.vlgmr.msra.gmra.mxu2 %v83_v1  ;;  %258 = vmatmul.f32.vlgmr.msra.gmra.mxu3 %v83_v1  ;;  %v278_v37 = vld [vmem:[#allocation2 + $0x218] sm:$0xff]  ;;  %v275_v38 = vld [vmem:[#allocation2 + $0x200] sm:$0xff]  ;;  %v276_v39 = vld [vmem:[#allocation2 + $0x208] sm:$0xff] }
  0x32   :  { %307 = vmatpush.msrb.mxu0 %v305_v2  ;;  %336 = vmatpush.msrb.mxu1 %v306_v3  ;;  %v271_v40 = vld [vmem:[%s5605_s0 + $0x4] sm:$0xff]  ;;  %v272_v41 = vld [vmem:[%s5605_s0 + $0xc] sm:$0xff]  ;;  %v273_v42 = vld [vmem:[%s5605_s0 + $0x14] sm:$0xff] }
  0x33   :  { %v274_v43 = vld [vmem:[%s5605_s0 + $0x1c] sm:$0xf]  ;;  %v455_v44 = vld [vmem:[#allocation5 + $0x1e0] sm:$0xff]  ;;  %v456_v46 = vld [vmem:[#allocation5 + $0x1e8] sm:$0xff] }
  0x34   :  { %308 = vmatpush.msrb.mxu0 %v303_v4  ;;  %337 = vmatpush.msrb.mxu1 %v304_v5  ;;  %v519_v45 = vld [vmem:[#allocation5 + $0x3e0] sm:$0xff]  ;;  %v520_v47 = vld [vmem:[#allocation5 + $0x3e8] sm:$0xff] }
  0x35   :  { %533 = vmatpush.msrb.mxu2 %v455_v44  ;;  %562 = vmatpush.msrb.mxu3 %v519_v45  ;;  %v451_v48 = vld [vmem:[#allocation5 + $0x1c0] sm:$0xff]  ;;  %v452_v50 = vld [vmem:[#allocation5 + $0x1c8] sm:$0xff] }
  0x36   :  { %309 = vmatpush.msrb.mxu0 %v301_v6  ;;  %338 = vmatpush.msrb.mxu1 %v302_v7  ;;  %v515_v49 = vld [vmem:[#allocation5 + $0x3c0] sm:$0xff]  ;;  %v516_v51 = vld [vmem:[#allocation5 + $0x3c8] sm:$0xff] }
  0x37   :  { %534 = vmatpush.msrb.mxu2 %v451_v48  ;;  %563 = vmatpush.msrb.mxu3 %v515_v49  ;;  %v447_v52 = vld [vmem:[#allocation5 + $0x1a0] sm:$0xff]  ;;  %v448_v54 = vld [vmem:[#allocation5 + $0x1a8] sm:$0xff]  ;;  %v457_v48 = vld [vmem:[#allocation5 + $0x1f0] sm:$0xff] }
  0x38   :  { %310 = vmatpush.msrb.mxu0 %v299_v8  ;;  %339 = vmatpush.msrb.mxu1 %v300_v9  ;;  %v511_v53 = vld [vmem:[#allocation5 + $0x3a0] sm:$0xff]  ;;  %v512_v55 = vld [vmem:[#allocation5 + $0x3a8] sm:$0xff]  ;;  %v521_v49 = vld [vmem:[#allocation5 + $0x3f0] sm:$0xff] }
  0x39   :  { %174 = vmatmul.f32.gmra.mxu0 %v120_v10  ;;  %203 = vmatmul.f32.gmra.mxu1 %v120_v10  ;;  %v443_v56 = vld [vmem:[#allocation5 + $0x180] sm:$0xff]  ;;  %v444_v58 = vld [vmem:[#allocation5 + $0x188] sm:$0xff] }
  0x3a   :  { %232 = vmatmul.f32.gmra.mxu2 %v84_v11  ;;  %261 = vmatmul.f32.gmra.mxu3 %v84_v11  ;;  %v507_v57 = vld [vmem:[#allocation5 + $0x380] sm:$0xff]  ;;  %v508_v59 = vld [vmem:[#allocation5 + $0x388] sm:$0xff] }
  0x3b   :  { %311 = vmatpush.msrb.mxu0 %v297_v12  ;;  %340 = vmatpush.msrb.mxu1 %v298_v13  ;;  %v439_v60 = vld [vmem:[#allocation5 + $0x160] sm:$0xff]  ;;  %v440_v62 = vld [vmem:[#allocation5 + $0x168] sm:$0xff] }
  0x3c   :  { %535 = vmatpush.msrb.mxu2 %v447_v52  ;;  %564 = vmatpush.msrb.mxu3 %v511_v53  ;;  %v503_v61 = vld [vmem:[#allocation5 + $0x360] sm:$0xff]  ;;  %v504_v63 = vld [vmem:[#allocation5 + $0x368] sm:$0xff]  ;;  %v453_v52 = vld [vmem:[#allocation5 + $0x1d0] sm:$0xff] }
  0x3d   :  { %312 = vmatpush.msrb.mxu0 %v295_v14  ;;  %341 = vmatpush.msrb.mxu1 %v296_v15  ;;  %v435_v0 = vld [vmem:[#allocation5 + $0x140] sm:$0xff]  ;;  %v436_v2 = vld [vmem:[#allocation5 + $0x148] sm:$0xff]  ;;  %v517_v53 = vld [vmem:[#allocation5 + $0x3d0] sm:$0xff] }
  0x3e   :  { %536 = vmatpush.msrb.mxu2 %v443_v56  ;;  %565 = vmatpush.msrb.mxu3 %v507_v57  ;;  %v499_v1 = vld [vmem:[#allocation5 + $0x340] sm:$0xff]  ;;  %v500_v3 = vld [vmem:[#allocation5 + $0x348] sm:$0xff]  ;;  %v449_v56 = vld [vmem:[#allocation5 + $0x1b0] sm:$0xff] }
  0x3f   :  { %313 = vmatpush.msrb.mxu0 %v293_v16  ;;  %342 = vmatpush.msrb.mxu1 %v294_v17  ;;  %v431_v4 = vld [vmem:[#allocation5 + $0x120] sm:$0xff]  ;;  %v432_v6 = vld [vmem:[#allocation5 + $0x128] sm:$0xff]  ;;  %v513_v57 = vld [vmem:[#allocation5 + $0x3b0] sm:$0xff] }
  0x40   :  { %537 = vmatpush.msrb.mxu2 %v439_v60  ;;  %566 = vmatpush.msrb.mxu3 %v503_v61  ;;  %v495_v5 = vld [vmem:[#allocation5 + $0x320] sm:$0xff]  ;;  %v496_v7 = vld [vmem:[#allocation5 + $0x328] sm:$0xff]  ;;  %v445_v60 = vld [vmem:[#allocation5 + $0x190] sm:$0xff] }
  0x41   :  { %314 = vmatpush.msrb.mxu0 %v291_v18  ;;  %343 = vmatpush.msrb.mxu1 %v292_v19  ;;  %v427_v8 = vld [vmem:[#allocation5 + $0x100] sm:$0xff]  ;;  %v428_v10 = vld [vmem:[#allocation5 + $0x108] sm:$0xff]  ;;  %v509_v61 = vld [vmem:[#allocation5 + $0x390] sm:$0xff] }
  0x42   :  { %177 = vmatmul.f32.gmra.mxu0 %v121_v20  ;;  %206 = vmatmul.f32.gmra.mxu1 %v121_v20  ;;  %v491_v9 = vld [vmem:[#allocation5 + $0x300] sm:$0xff]  ;;  %v492_v11 = vld [vmem:[#allocation5 + $0x308] sm:$0xff] }
  0x43   :  { %235 = vmatmul.f32.gmra.mxu2 %v85_v21  ;;  %264 = vmatmul.f32.gmra.mxu3 %v85_v21  ;;  %v423_v12 = vld [vmem:[#allocation5 + $0xe0] sm:$0xff]  ;;  %v424_v14 = vld [vmem:[#allocation5 + $0xe8] sm:$0xff] }
  0x44   :  { %315 = vmatpush.msrb.mxu0 %v289_v22  ;;  %344 = vmatpush.msrb.mxu1 %v290_v23  ;;  %v487_v13 = vld [vmem:[#allocation5 + $0x2e0] sm:$0xff]  ;;  %v488_v15 = vld [vmem:[#allocation5 + $0x2e8] sm:$0xff] }
  0x45   :  { %538 = vmatpush.msrb.mxu2 %v435_v0  ;;  %567 = vmatpush.msrb.mxu3 %v499_v1  ;;  %v419_v16 = vld [vmem:[#allocation5 + $0xc0] sm:$0xff]  ;;  %v420_v18 = vld [vmem:[#allocation5 + $0xc8] sm:$0xff]  ;;  %v446_v0 = vld [vmem:[#allocation5 + $0x198] sm:$0xff] }
  0x46   :  { %316 = vmatpush.msrb.mxu0 %v287_v24  ;;  %345 = vmatpush.msrb.mxu1 %v288_v25  ;;  %v483_v17 = vld [vmem:[#allocation5 + $0x2c0] sm:$0xff]  ;;  %v484_v19 = vld [vmem:[#allocation5 + $0x2c8] sm:$0xff]  ;;  %v510_v1 = vld [vmem:[#allocation5 + $0x398] sm:$0xff] }
  0x47   :  { %539 = vmatpush.msrb.mxu2 %v431_v4  ;;  %568 = vmatpush.msrb.mxu3 %v495_v5  ;;  %v415_v20 = vld [vmem:[#allocation5 + $0xa0] sm:$0xff]  ;;  %v416_v22 = vld [vmem:[#allocation5 + $0xa8] sm:$0xff]  ;;  %v442_v4 = vld [vmem:[#allocation5 + $0x178] sm:$0xff] }
  0x48   :  { %317 = vmatpush.msrb.mxu0 %v285_v26  ;;  %346 = vmatpush.msrb.mxu1 %v286_v27  ;;  %v479_v21 = vld [vmem:[#allocation5 + $0x2a0] sm:$0xff]  ;;  %v480_v23 = vld [vmem:[#allocation5 + $0x2a8] sm:$0xff]  ;;  %v506_v5 = vld [vmem:[#allocation5 + $0x378] sm:$0xff] }
  0x49   :  { %540 = vmatpush.msrb.mxu2 %v427_v8  ;;  %569 = vmatpush.msrb.mxu3 %v491_v9  ;;  %v411_v24 = vld [vmem:[#allocation5 + $0x80] sm:$0xff]  ;;  %v438_v8 = vld [vmem:[#allocation5 + $0x158] sm:$0xff] }
  0x4a   :  { %318 = vmatpush.msrb.mxu0 %v283_v28  ;;  %347 = vmatpush.msrb.mxu1 %v284_v29  ;;  %v475_v25 = vld [vmem:[#allocation5 + $0x280] sm:$0xff]  ;;  %v412_v28 = vld [vmem:[#allocation5 + $0x88] sm:$0xff]  ;;  %v502_v9 = vld [vmem:[#allocation5 + $0x358] sm:$0xff] }
  0x4b   :  { %180 = vmatmul.f32.gmra.mxu0 %v122_v30  ;;  %209 = vmatmul.f32.gmra.mxu1 %v122_v30  ;;  %v476_v29 = vld [vmem:[#allocation5 + $0x288] sm:$0xff]  ;;  %v407_v30 = vld [vmem:[#allocation5 + $0x60] sm:$0xff] }
  0x4c   :  { %238 = vmatmul.f32.gmra.mxu2 %v86_v31  ;;  %267 = vmatmul.f32.gmra.mxu3 %v86_v31  ;;  %v471_v31 = vld [vmem:[#allocation5 + $0x260] sm:$0xff] }
  0x4d   :  { %319 = vmatpush.msrb.mxu0 %v281_v32  ;;  %348 = vmatpush.msrb.mxu1 %v282_v33  ;;  %v408_v32 = vld [vmem:[#allocation5 + $0x68] sm:$0xff]  ;;  %v395_v44 = vld [vmem:[#allocation5] sm:$0xff] }
  0x4e   :  { %541 = vmatpush.msrb.mxu2 %v423_v12  ;;  %570 = vmatpush.msrb.mxu3 %v487_v13  ;;  %v472_v33 = vld [vmem:[#allocation5 + $0x268] sm:$0xff]  ;;  %v459_v45 = vld [vmem:[#allocation5 + $0x200] sm:$0xff]  ;;  %v434_v12 = vld [vmem:[#allocation5 + $0x138] sm:$0xff] }
  0x4f   :  { %320 = vmatpush.msrb.mxu0 %v279_v34  ;;  %349 = vmatpush.msrb.mxu1 %v280_v35  ;;  %v403_v34 = vld [vmem:[#allocation5 + $0x40] sm:$0xff] }
  0x50   :  { %542 = vmatpush.msrb.mxu2 %v419_v16  ;;  %571 = vmatpush.msrb.mxu3 %v483_v17  ;;  %v467_v35 = vld [vmem:[#allocation5 + $0x240] sm:$0xff]  ;;  %v429_v16 = vld [vmem:[#allocation5 + $0x110] sm:$0xff] }
  0x51   :  { %321 = vmatpush.msrb.mxu0 %v277_v36  ;;  %350 = vmatpush.msrb.mxu1 %v278_v37  ;;  %v404_v36 = vld [vmem:[#allocation5 + $0x48] sm:$0xff]  ;;  %v493_v17 = vld [vmem:[#allocation5 + $0x310] sm:$0xff] }
  0x52   :  { %543 = vmatpush.msrb.mxu2 %v415_v20  ;;  %572 = vmatpush.msrb.mxu3 %v479_v21  ;;  %v468_v37 = vld [vmem:[#allocation5 + $0x248] sm:$0xff] }
  0x53   :  { %322 = vmatpush.msrb.mxu0 %v275_v38  ;;  %351 = vmatpush.msrb.mxu1 %v276_v39  ;;  %v399_v38 = vld [vmem:[#allocation5 + $0x20] sm:$0xff] }
  0x54   :  { %323 = vmatmul.f32.vlgmr.msrb.gmra.mxu0 %v271_v40  ;;  %352 = vmatmul.f32.vlgmr.msrb.gmra.mxu1 %v271_v40  ;;  %v463_v39 = vld [vmem:[#allocation5 + $0x220] sm:$0xff]  ;;  %v400_v40 = vld [vmem:[#allocation5 + $0x28] sm:$0xff] }
  0x55   :  { %591 = vmatpush.msra.mxu0 %v456_v46  ;;  %620 = vmatpush.msra.mxu1 %v520_v47  ;;  %v396_v46 = vld [vmem:[#allocation5 + $0x8] sm:$0xff] }
  0x56   :  { %544 = vmatpush.msrb.mxu2 %v411_v24  ;;  %573 = vmatpush.msrb.mxu3 %v475_v25  ;;  %v460_v47 = vld [vmem:[#allocation5 + $0x208] sm:$0xff]  ;;  %v426_v24 = vld [vmem:[#allocation5 + $0xf8] sm:$0xff] }
  0x57   :  { %592 = vmatpush.msra.mxu0 %v452_v50  ;;  %621 = vmatpush.msra.mxu1 %v516_v51  ;;  %v458_v50 = vld [vmem:[#allocation5 + $0x1f8] sm:$0xff] }
  0x58   :  { %545 = vmatpush.msrb.mxu2 %v407_v30  ;;  %574 = vmatpush.msrb.mxu3 %v471_v31  ;;  %v522_v51 = vld [vmem:[#allocation5 + $0x3f8] sm:$0xff]  ;;  %v373_v31 = vld [vmem:[%s5607_s2] sm:$0x3] }
  0x59   :  { %593 = vmatpush.msra.mxu0 %v448_v54  ;;  %622 = vmatpush.msra.mxu1 %v512_v55  ;;  %v454_v54 = vld [vmem:[#allocation5 + $0x1d8] sm:$0xff] }
  0x5a   :  { %546 = vmatpush.msrb.mxu2 %v403_v34  ;;  %575 = vmatpush.msrb.mxu3 %v467_v35  ;;  %v518_v55 = vld [vmem:[#allocation5 + $0x3d8] sm:$0xff]  ;;  %v481_v34 = vld [vmem:[#allocation5 + $0x2b0] sm:$0xff] }
  0x5b   :  { %594 = vmatpush.msra.mxu0 %v444_v58  ;;  %623 = vmatpush.msra.mxu1 %v508_v59  ;;  %v450_v58 = vld [vmem:[#allocation5 + $0x1b8] sm:$0xff] }
  0x5c   :  { %326 = vmatmul.f32.gmra.mxu0 %v272_v41  ;;  %355 = vmatmul.f32.gmra.mxu1 %v272_v41  ;;  %v464_v41 = vld [vmem:[#allocation5 + $0x228] sm:$0xff]  ;;  %v514_v59 = vld [vmem:[#allocation5 + $0x3b8] sm:$0xff] }
  0x5d   :  { %595 = vmatpush.msra.mxu0 %v440_v62  ;;  %624 = vmatpush.msra.mxu1 %v504_v63  ;;  %v490_v25 = vld [vmem:[#allocation5 + $0x2f8] sm:$0xff] }
  0x5e   :  { %547 = vmatpush.msrb.mxu2 %v399_v38  ;;  %576 = vmatpush.msrb.mxu3 %v463_v39  ;;  %v422_v30 = vld [vmem:[#allocation5 + $0xd8] sm:$0xff]  ;;  %v477_v38 = vld [vmem:[#allocation5 + $0x290] sm:$0xff] }
  0x5f   :  { %596 = vmatpush.msra.mxu0 %v436_v2  ;;  %625 = vmatpush.msra.mxu1 %v500_v3  ;;  %v441_v2 = vld [vmem:[#allocation5 + $0x170] sm:$0xff]  ;;  %v418_v35 = vld [vmem:[#allocation5 + $0xb8] sm:$0xff] }
  0x60   :  { %548 = vmatpush.msrb.mxu2 %v395_v44  ;;  %577 = vmatpush.msrb.mxu3 %v459_v45  ;;  %v505_v3 = vld [vmem:[#allocation5 + $0x370] sm:$0xff]  ;;  %v414_v39 = vld [vmem:[#allocation5 + $0x98] sm:$0xff] }
  0x61   :  { %597 = vmatpush.msra.mxu0 %v432_v6  ;;  %626 = vmatpush.msra.mxu1 %v496_v7  ;;  %v437_v6 = vld [vmem:[#allocation5 + $0x150] sm:$0xff] }
  0x62   :  { %649 = vmatpush.msra.mxu2 %v457_v48  ;;  %678 = vmatpush.msra.mxu3 %v521_v49  ;;  %v501_v7 = vld [vmem:[#allocation5 + $0x350] sm:$0xff]  ;;  %v3891_v48 = vperm.slane %v373_v31, 1 }
  0x63   :  { %598 = vmatpush.msra.mxu0 %v428_v10  ;;  %627 = vmatpush.msra.mxu1 %v492_v11  ;;  %v433_v10 = vld [vmem:[#allocation5 + $0x130] sm:$0xff] }
  0x64   :  { %329 = vmatmul.f32.gmra.mxu0 %v273_v42  ;;  %358 = vmatmul.f32.gmra.mxu1 %v273_v42  ;;  %v497_v11 = vld [vmem:[#allocation5 + $0x330] sm:$0xff] }
  0x65   :  { %599 = vmatpush.msra.mxu0 %v424_v14  ;;  %628 = vmatpush.msra.mxu1 %v488_v15  ;;  %v498_v15 = vld [vmem:[#allocation5 + $0x338] sm:$0xff] }
  0x66   :  { %650 = vmatpush.msra.mxu2 %v453_v52  ;;  %679 = vmatpush.msra.mxu3 %v517_v53  ;;  %v473_v52 = vld [vmem:[#allocation5 + $0x270] sm:$0xff]  ;;  %v410_v53 = vld [vmem:[#allocation5 + $0x78] sm:$0xff] }
  0x67   :  { %600 = vmatpush.msra.mxu0 %v420_v18  ;;  %629 = vmatpush.msra.mxu1 %v484_v19  ;;  %v430_v18 = vld [vmem:[#allocation5 + $0x118] sm:$0xff] }
  0x68   :  { %651 = vmatpush.msra.mxu2 %v449_v56  ;;  %680 = vmatpush.msra.mxu3 %v513_v57  ;;  %v494_v19 = vld [vmem:[#allocation5 + $0x318] sm:$0xff]  ;;  %v469_v56 = vld [vmem:[#allocation5 + $0x250] sm:$0xff] }
  0x69   :  { %601 = vmatpush.msra.mxu0 %v416_v22  ;;  %630 = vmatpush.msra.mxu1 %v480_v23  ;;  %v425_v22 = vld [vmem:[#allocation5 + $0xf0] sm:$0xff]  ;;  %v406_v57 = vld [vmem:[#allocation5 + $0x58] sm:$0xff] }
  0x6a   :  { %652 = vmatpush.msra.mxu2 %v445_v60  ;;  %681 = vmatpush.msra.mxu3 %v509_v61  ;;  %v489_v23 = vld [vmem:[#allocation5 + $0x2f0] sm:$0xff] }
  0x6b   :  { %602 = vmatpush.msra.mxu0 %v412_v28  ;;  %631 = vmatpush.msra.mxu1 %v476_v29  ;;  %v421_v28 = vld [vmem:[#allocation5 + $0xd0] sm:$0xff] }
  0x6c   :  { %332 = vmatmul.f32.gmra.mxu0 %v274_v43  ;;  %361 = vmatmul.f32.gmra.mxu1 %v274_v43  ;;  %v485_v29 = vld [vmem:[#allocation5 + $0x2d0] sm:$0xff] }
  0x6d   :  { %603 = vmatpush.msra.mxu0 %v408_v32  ;;  %632 = vmatpush.msra.mxu1 %v472_v33  ;;  %v486_v32 = vld [vmem:[#allocation5 + $0x2d8] sm:$0xff]  ;;  %v417_v33 = vld [vmem:[#allocation5 + $0xb0] sm:$0xff] }
  0x6e   :  { %653 = vmatpush.msra.mxu2 %v441_v2  ;;  %682 = vmatpush.msra.mxu3 %v505_v3  ;;  %v466_v2 = vld [vmem:[#allocation5 + $0x238] sm:$0xff] }
  0x6f   :  { %604 = vmatpush.msra.mxu0 %v404_v36  ;;  %633 = vmatpush.msra.mxu1 %v468_v37  ;;  %v482_v36 = vld [vmem:[#allocation5 + $0x2b8] sm:$0xff]  ;;  %v413_v37 = vld [vmem:[#allocation5 + $0x90] sm:$0xff] }
  0x70   :  { %654 = vmatpush.msra.mxu2 %v437_v6  ;;  %683 = vmatpush.msra.mxu3 %v501_v7  ;;  %v461_v6 = vld [vmem:[#allocation5 + $0x210] sm:$0xff] }
  0x71   :  { %605 = vmatpush.msra.mxu0 %v400_v40  ;;  %634 = vmatpush.msra.mxu1 %v464_v41  ;;  %v478_v40 = vld [vmem:[#allocation5 + $0x298] sm:$0xff] }
  0x72   :  { %655 = vmatpush.msra.mxu2 %v433_v10  ;;  %684 = vmatpush.msra.mxu3 %v497_v11  ;;  %v462_v10 = vld [vmem:[#allocation5 + $0x218] sm:$0xff] }
  0x73   :  { %606 = vmatpush.msra.mxu0 %v396_v46  ;;  %635 = vmatpush.msra.mxu1 %v460_v47  ;;  %v3889_v47 = vperm.slane %v373_v31, 0  ;;  %v3935_v31 = vld [vmem:[#allocation7 + $0x1a0] sm:$0xff] }
  0x74   :  { %656 = vmatpush.msra.mxu2 %v429_v16  ;;  %685 = vmatpush.msra.mxu3 %v493_v17  ;;  %v3911_v16 = vld [vmem:[#allocation7 + $0x1f8] sm:$0xff] }
  0x75   :  { %707 = vmatpush.msrb.mxu0 %v458_v50  ;;  %736 = vmatpush.msrb.mxu1 %v522_v51  ;;  %v409_v51 = vld [vmem:[#allocation5 + $0x70] sm:$0xff] }
  0x76   :  { %657 = vmatpush.msra.mxu2 %v425_v22  ;;  %686 = vmatpush.msra.mxu3 %v489_v23  ;;  %v3915_v22 = vld [vmem:[#allocation7 + $0x1c8] sm:$0xff] }
  0x77   :  { %708 = vmatpush.msrb.mxu0 %v454_v54  ;;  %737 = vmatpush.msrb.mxu1 %v518_v55 }
  0x78   :  { %658 = vmatpush.msra.mxu2 %v421_v28  ;;  %687 = vmatpush.msra.mxu3 %v485_v29  ;;  %v3923_v28 = vld [vmem:[#allocation7 + $0x1d8] sm:$0xff] }
  0x79   :  { %709 = vmatpush.msrb.mxu0 %v450_v58  ;;  %738 = vmatpush.msrb.mxu1 %v514_v59  ;;  %v470_v58 = vld [vmem:[#allocation5 + $0x258] sm:$0xff]  ;;  %v401_v59 = vld [vmem:[#allocation5 + $0x30] sm:$0xff] }
  0x7a   :  { %659 = vmatpush.msra.mxu2 %v417_v33  ;;  %688 = vmatpush.msra.mxu3 %v481_v34 }
  0x7b   :  { %710 = vmatpush.msrb.mxu0 %v446_v0  ;;  %739 = vmatpush.msrb.mxu1 %v510_v1  ;;  %v465_v0 = vld [vmem:[#allocation5 + $0x230] sm:$0xff]  ;;  %v402_v1 = vld [vmem:[#allocation5 + $0x38] sm:$0xff] }
  0x7c   :  { %660 = vmatpush.msra.mxu2 %v413_v37  ;;  %689 = vmatpush.msra.mxu3 %v477_v38 }
  0x7d   :  { %711 = vmatpush.msrb.mxu0 %v442_v4  ;;  %740 = vmatpush.msrb.mxu1 %v506_v5  ;;  %v397_v5 = vld [vmem:[#allocation5 + $0x10] sm:$0xff] }
  0x7e   :  { %661 = vmatpush.msra.mxu2 %v409_v51  ;;  %690 = vmatpush.msra.mxu3 %v473_v52  ;;  %v3969_v51 = vld [vmem:[#allocation7 + $0x170] sm:$0xff]  ;;  %v3971_v52 = vld [vmem:[#allocation7 + $0x178] sm:$0xff] }
  0x7f   :  { %712 = vmatpush.msrb.mxu0 %v438_v8  ;;  %741 = vmatpush.msrb.mxu1 %v502_v9  ;;  %v398_v9 = vld [vmem:[#allocation5 + $0x18] sm:$0xff] }
  0x80   :  { %691 = vmatpush.msra.mxu3 %v469_v56  ;;  %v3985_v56 = vld [vmem:[#allocation7 + $0x148] sm:$0xff] }
  0x81   :  { %713 = vmatpush.msrb.mxu0 %v434_v12  ;;  %742 = vmatpush.msrb.mxu1 %v498_v15 }
  0x82   :  { %692 = vmatpush.msra.mxu3 %v465_v0 }
  0x83   :  { %714 = vmatpush.msrb.mxu0 %v430_v18  ;;  %743 = vmatpush.msrb.mxu1 %v494_v19  ;;  %v3913_v19 = vld [vmem:[#allocation7 + $0x1c0] sm:$0xff] }
  0x84   :  { %693 = vmatpush.msra.mxu3 %v461_v6  ;;  %v4005_v6 = vld [vmem:[#allocation7 + $0x138] sm:$0xff] }
  0x85   :  { %715 = vmatpush.msrb.mxu0 %v426_v24  ;;  %744 = vmatpush.msrb.mxu1 %v490_v25  ;;  %v3921_v25 = vld [vmem:[#allocation7 + $0x1d0] sm:$0xff] }
  0x87   :  { %716 = vmatpush.msrb.mxu0 %v422_v30  ;;  %745 = vmatpush.msrb.mxu1 %v486_v32  ;;  %v3937_v32 = vld [vmem:[#allocation7 + $0x1a8] sm:$0xff] }
  0x89   :  { %717 = vmatpush.msrb.mxu0 %v418_v35  ;;  %746 = vmatpush.msrb.mxu1 %v482_v36  ;;  %v3943_v35 = vld [vmem:[#allocation7 + $0x1b0] sm:$0xff]  ;;  %v3945_v36 = vld [vmem:[#allocation7 + $0x1b8] sm:$0xff] }
  0x8b   :  { %718 = vmatpush.msrb.mxu0 %v414_v39  ;;  %747 = vmatpush.msrb.mxu1 %v478_v40  ;;  %v3949_v39 = vld [vmem:[#allocation7 + $0x180] sm:$0xff]  ;;  %v3951_v40 = vld [vmem:[#allocation7 + $0x188] sm:$0xff] }
  0x8d   :  { %719 = vmatpush.msrb.mxu0 %v410_v53 }
  0x8f   :  { %720 = vmatpush.msrb.mxu0 %v406_v57 }
  0x91   :  { %721 = vmatpush.msrb.mxu0 %v402_v1  ;;  %v3997_v1 = vld [vmem:[#allocation7 + $0x120] sm:$0xff] }
  0x93   :  { %722 = vmatpush.msrb.mxu0 %v398_v9 }
  0xad   :  { %v3868_v26 = vpop.f32.mrf.mxu0  ;;  %v3870_v27 = vpop.f32.mrf.mxu1 }
  0xb4   :  { %v230_v13 = vpop.f32.mrf.mxu2  ;;  %v259_v14 = vpop.f32.mrf.mxu3 }
  0xb5   :  { %v231_v41 = vadd.f32 %v230_v13, %v3868_v26  ;;  %v260_v44 = vadd.f32 %v259_v14, %v3870_v27  ;;  %v474_v26 = vld [vmem:[#allocation5 + $0x278] sm:$0xff]  ;;  %v405_v27 = vld [vmem:[#allocation5 + $0x50] sm:$0xff]  ;;  %v3905_v13 = vld [vmem:[#allocation7 + $0x1e0] sm:$0xff] }
  0xb6   :  { %v3872_v42 = vpop.f32.mrf.mxu0  ;;  %v3874_v43 = vpop.f32.mrf.mxu1  ;;  %748 = vmatpush.msrb.mxu1 %v474_v26  ;;  %662 = vmatpush.msra.mxu2 %v405_v27  ;;  %v3907_v14 = vld [vmem:[#allocation7 + $0x1e8] sm:$0xff]  ;;  %v3983_v27 = vld [vmem:[#allocation7 + $0x140] sm:$0xff] }
  0xb8   :  { %749 = vmatpush.msrb.mxu1 %v470_v58  ;;  %663 = vmatpush.msra.mxu2 %v401_v59  ;;  %v3991_v59 = vld [vmem:[#allocation7 + $0x150] sm:$0xff] }
  0xba   :  { %750 = vmatpush.msrb.mxu1 %v466_v2  ;;  %664 = vmatpush.msra.mxu2 %v397_v5  ;;  %v3999_v2 = vld [vmem:[#allocation7 + $0x128] sm:$0xff]  ;;  %v4003_v5 = vld [vmem:[#allocation7 + $0x130] sm:$0xff] }
  0xbc   :  { %751 = vmatpush.msrb.mxu1 %v462_v10 }
  0xbd   :  { %v233_v45 = vpop.f32.mrf.mxu2  ;;  %v262_v46 = vpop.f32.mrf.mxu3 }
  0xbe   :  { %v234_v7 = vadd.f32 %v233_v45, %v3872_v42  ;;  %v263_v8 = vadd.f32 %v262_v46, %v3874_v43  ;;  %v3909_v43 = vld [vmem:[#allocation7 + $0x1f0] sm:$0xff]  ;;  %v3961_v45 = vld [vmem:[#allocation7 + $0x160] sm:$0xff]  ;;  %v3963_v46 = vld [vmem:[#allocation7 + $0x168] sm:$0xff] }
  0xbf   :  { %v3876_v62 = vpop.f32.mrf.mxu0  ;;  %v3878_v63 = vpop.f32.mrf.mxu1 }
  0xc6   :  { %v236_v17 = vpop.f32.mrf.mxu2  ;;  %v265_v18 = vpop.f32.mrf.mxu3 }
  0xc7   :  { %v237_v33 = vadd.f32 %v236_v17, %v3876_v62  ;;  %v266_v34 = vadd.f32 %v265_v18, %v3878_v63  ;;  %v4037_v17 = vld [vmem:[#allocation7 + $0xf0] sm:$0xff]  ;;  %v4039_v18 = vld [vmem:[#allocation7 + $0xf8] sm:$0xff] }
  0xc8   :  { %v3880_v20 = vpop.f32.mrf.mxu0  ;;  %v3882_v21 = vpop.f32.mrf.mxu1  ;;  %5826 = vst [vmem:[#allocation12_spill] sm:$0xff] %v4037_v17 }
  0xc9   :  { %5827 = vst [vmem:[#allocation13_spill] sm:$0xff] %v4039_v18 }
  0xcf   :  { %v239_v53 = vpop.f32.mrf.mxu2 }
  0xd0   :  { %v240_v57 = vadd.f32 %v239_v53, %v3880_v20  ;;  %v4077_v53 = vld [vmem:[#allocation7 + $0x90] sm:$0xff] }
  0xd1   :  { %v324_v49 = vpop.f32.mrf.mxu0  ;;  %v353_v50 = vpop.f32.mrf.mxu1  ;;  %5838 = vst [vmem:[#allocation24_spill] sm:$0xff] %v4077_v53 }
  0xd2   :  { %v365_v54 = vadd.f32 %v324_v49, %v231_v41  ;;  %v366_v55 = vadd.f32 %v353_v50, %v260_v44  ;;  %v3955_v41 = vld [vmem:[#allocation7 + $0x190] sm:$0xff]  ;;  %v3957_v44 = vld [vmem:[#allocation7 + $0x198] sm:$0xff] }
  0xd4   :  { %v379_v60 = vadd.f32 %v3889_v47, %v365_v54  ;;  %v380_v61 = vadd.f32 %v3891_v48, %v366_v55  ;;  %v268_v54 = vpop.f32.mrf.mxu3 }
  0xd5   :  { %v269_v58 = vadd.f32 %v268_v54, %v3882_v21  ;;  %v4079_v54 = vld [vmem:[#allocation7 + $0x98] sm:$0xff] }
  0xd6   :  { %v3895_v3 = vmax.f32 %v379_v60, 0.0  ;;  %v3897_v4 = vmax.f32 %v380_v61, 0.0  ;;  %v3993_v60 = vld [vmem:[#allocation7 + $0x158] sm:$0xff]  ;;  %5839 = vst [vmem:[#allocation25_spill] sm:$0xff] %v4079_v54 }
  0xd8   :  { %549 = vmatmul.f32.vlgmr.msrb.gmra.mxu2 %v3895_v3  ;;  %578 = vmatmul.f32.vlgmr.msrb.gmra.mxu3 %v3897_v4 }
  0xd9   :  { %607 = vmatmul.f32.vlgmr.msra.gmra.mxu0 %v3895_v3  ;;  %636 = vmatmul.f32.vlgmr.msra.gmra.mxu1 %v3897_v4  ;;  %v327_v11 = vpop.f32.mrf.mxu0  ;;  %v356_v12 = vpop.f32.mrf.mxu1 }
  0xda   :  { %v367_v15 = vadd.f32 %v327_v11, %v234_v7  ;;  %v368_v42 = vadd.f32 %v356_v12, %v263_v8  ;;  %829 = vmatpush.msrb.mxu2 %v3905_v13  ;;  %849 = vmatpush.msrb.mxu3 %v3907_v14  ;;  %v4009_v7 = vld [vmem:[#allocation7 + $0x100] sm:$0xff]  ;;  %v4011_v8 = vld [vmem:[#allocation7 + $0x108] sm:$0xff]  ;;  %v4017_v11 = vld [vmem:[#allocation7 + $0x110] sm:$0xff] }
  0xdb   :  { %869 = vmatpush.msra.mxu0 %v3909_v43  ;;  %889 = vmatpush.msra.mxu1 %v3911_v16  ;;  %v4019_v12 = vld [vmem:[#allocation7 + $0x118] sm:$0xff] }
  0xdc   :  { %v381_v23 = vadd.f32 %v3889_v47, %v367_v15  ;;  %v382_v24 = vadd.f32 %v3891_v48, %v368_v42  ;;  %830 = vmatpush.msrb.mxu2 %v3913_v19  ;;  %850 = vmatpush.msrb.mxu3 %v3915_v22 }
  0xdd   :  { %870 = vmatpush.msra.mxu0 %v3921_v25  ;;  %890 = vmatpush.msra.mxu1 %v3923_v28 }
  0xde   :  { %v3927_v29 = vmax.f32 %v381_v23, 0.0  ;;  %v3929_v30 = vmax.f32 %v382_v24, 0.0  ;;  %831 = vmatpush.msrb.mxu2 %v3935_v31  ;;  %851 = vmatpush.msrb.mxu3 %v3937_v32  ;;  %v4043_v23 = vld [vmem:[#allocation7 + $0xc0] sm:$0xff]  ;;  %v4045_v24 = vld [vmem:[#allocation7 + $0xc8] sm:$0xff] }
  0xdf   :  { %871 = vmatpush.msra.mxu0 %v3943_v35  ;;  %891 = vmatpush.msra.mxu1 %v3945_v36  ;;  %5828 = vst [vmem:[#allocation14_spill] sm:$0xff] %v4043_v23 }
  0xe0   :  { %552 = vmatmul.f32.gmra.mxu2 %v3927_v29  ;;  %581 = vmatmul.f32.gmra.mxu3 %v3929_v30  ;;  %5829 = vst [vmem:[#allocation15_spill] sm:$0xff] %v4045_v24 }
  0xe1   :  { %610 = vmatmul.f32.gmra.mxu0 %v3927_v29  ;;  %639 = vmatmul.f32.gmra.mxu1 %v3929_v30  ;;  %v330_v37 = vpop.f32.mrf.mxu0  ;;  %v359_v38 = vpop.f32.mrf.mxu1 }
  0xe2   :  { %v369_v62 = vadd.f32 %v330_v37, %v237_v33  ;;  %v370_v63 = vadd.f32 %v359_v38, %v266_v34  ;;  %832 = vmatpush.msrb.mxu2 %v3949_v39  ;;  %852 = vmatpush.msrb.mxu3 %v3951_v40  ;;  %v4049_v33 = vld [vmem:[#allocation7 + $0xd0] sm:$0xff]  ;;  %v4051_v34 = vld [vmem:[#allocation7 + $0xd8] sm:$0xff]  ;;  %v4055_v37 = vld [vmem:[#allocation7 + $0xa0] sm:$0xff] }
  0xe3   :  { %872 = vmatpush.msra.mxu0 %v3955_v41  ;;  %892 = vmatpush.msra.mxu1 %v3957_v44  ;;  %5830 = vst [vmem:[#allocation16_spill] sm:$0xff] %v4049_v33  ;;  %v4057_v38 = vld [vmem:[#allocation7 + $0xa8] sm:$0xff] }
  0xe4   :  { %v383_v49 = vadd.f32 %v3889_v47, %v369_v62  ;;  %v384_v50 = vadd.f32 %v3891_v48, %v370_v63  ;;  %833 = vmatpush.msrb.mxu2 %v3961_v45  ;;  %853 = vmatpush.msrb.mxu3 %v3963_v46  ;;  %5831 = vst [vmem:[#allocation17_spill] sm:$0xff] %v4051_v34  ;;  %v4061_v62 = vld [vmem:[#allocation7 + $0xb0] sm:$0xff]  ;;  %v4063_v63 = vld [vmem:[#allocation7 + $0xb8] sm:$0xff] }
  0xe5   :  { %873 = vmatpush.msra.mxu0 %v3969_v51  ;;  %893 = vmatpush.msra.mxu1 %v3971_v52  ;;  %5832 = vst [vmem:[#allocation18_spill] sm:$0xff] %v4055_v37 }
  0xe6   :  { %v3975_v55 = vmax.f32 %v383_v49, 0.0  ;;  %v3977_v26 = vmax.f32 %v384_v50, 0.0  ;;  %834 = vmatpush.msrb.mxu2 %v3983_v27  ;;  %854 = vmatpush.msrb.mxu3 %v3985_v56  ;;  %5833 = vst [vmem:[#allocation19_spill] sm:$0xff] %v4057_v38  ;;  %v4071_v49 = vld [vmem:[#allocation7 + $0x80] sm:$0xff]  ;;  %v4073_v50 = vld [vmem:[#allocation7 + $0x88] sm:$0xff] }
  0xe7   :  { %874 = vmatpush.msra.mxu0 %v3991_v59  ;;  %894 = vmatpush.msra.mxu1 %v3993_v60  ;;  %5834 = vst [vmem:[#allocation20_spill] sm:$0xff] %v4061_v62 }
  0xe8   :  { %555 = vmatmul.f32.gmra.mxu2 %v3975_v55  ;;  %584 = vmatmul.f32.gmra.mxu3 %v3977_v26  ;;  %5835 = vst [vmem:[#allocation21_spill] sm:$0xff] %v4063_v63 }
  0xe9   :  { %613 = vmatmul.f32.gmra.mxu0 %v3975_v55  ;;  %642 = vmatmul.f32.gmra.mxu1 %v3977_v26  ;;  %v333_v61 = vpop.f32.mrf.mxu0  ;;  %v362_v0 = vpop.f32.mrf.mxu1  ;;  %5836 = vst [vmem:[#allocation22_spill] sm:$0xff] %v4071_v49 }
  0xea   :  { %v371_v20 = vadd.f32 %v333_v61, %v240_v57  ;;  %v372_v21 = vadd.f32 %v362_v0, %v269_v58  ;;  %835 = vmatpush.msrb.mxu2 %v3997_v1  ;;  %855 = vmatpush.msrb.mxu3 %v3999_v2  ;;  %5837 = vst [vmem:[#allocation23_spill] sm:$0xff] %v4073_v50  ;;  %v4083_v57 = vld [vmem:[#allocation7 + $0x60] sm:$0xff]  ;;  %v4085_v58 = vld [vmem:[#allocation7 + $0x68] sm:$0xff]  ;;  %v4089_v61 = vld [vmem:[#allocation7 + $0x70] sm:$0xff] }
  0xeb   :  { %875 = vmatpush.msra.mxu0 %v4003_v5  ;;  %895 = vmatpush.msra.mxu1 %v4005_v6  ;;  %5840 = vst [vmem:[#allocation26_spill] sm:$0xff] %v4083_v57  ;;  %v4091_v0 = vld [vmem:[#allocation7 + $0x78] sm:$0xff] }
  0xec   :  { %v385_v9 = vadd.f32 %v3889_v47, %v371_v20  ;;  %v386_v10 = vadd.f32 %v3891_v48, %v372_v21  ;;  %836 = vmatpush.msrb.mxu2 %v4009_v7  ;;  %856 = vmatpush.msrb.mxu3 %v4011_v8  ;;  %v4031_v47 = vld [vmem:[#allocation7 + $0xe0] sm:$0xff]  ;;  %v4033_v48 = vld [vmem:[#allocation7 + $0xe8] sm:$0xff]  ;;  %5841 = vst [vmem:[#allocation27_spill] sm:$0xff] %v4085_v58  ;;  %v4103_v21 = vld [vmem:[#allocation7 + $0x58] sm:$0xff] }
  0xed   :  { %876 = vmatpush.msra.mxu0 %v4017_v11  ;;  %896 = vmatpush.msra.mxu1 %v4019_v12  ;;  %5842 = vst [vmem:[#allocation28_spill] sm:$0xff] %v4089_v61  ;;  %v4095_v20 = vld [vmem:[#allocation7 + $0x40] sm:$0xff] }
  0xee   :  { %v4023_v15 = vmax.f32 %v385_v9, 0.0  ;;  %v4025_v42 = vmax.f32 %v386_v10, 0.0  ;;  %837 = vmatpush.msrb.mxu2 %v4031_v47  ;;  %857 = vmatpush.msrb.mxu3 %v4033_v48  ;;  %5843 = vst [vmem:[#allocation29_spill] sm:$0xff] %v4091_v0  ;;  %v4111_v9 = vld [vmem:[#allocation7 + $0x20] sm:$0xff]  ;;  %v4113_v10 = vld [vmem:[#allocation7 + $0x28] sm:$0xff] }
  0xef   :  { %877 = vmatpush.msra.mxu0 %v4037_v17  ;;  %897 = vmatpush.msra.mxu1 %v4039_v18  ;;  %5844 = vst [vmem:[#allocation30_spill] sm:$0xff] %v4095_v20 }
  0xf0   :  { %558 = vmatmul.f32.gmra.mxu2 %v4023_v15  ;;  %587 = vmatmul.f32.gmra.mxu3 %v4025_v42  ;;  %5847 = vst [vmem:[#allocation33_spill] sm:$0xff] %v4103_v21 }
  0xf1   :  { %616 = vmatmul.f32.gmra.mxu0 %v4023_v15  ;;  %645 = vmatmul.f32.gmra.mxu1 %v4025_v42  ;;  %5848 = vst [vmem:[#allocation34_spill] sm:$0xff] %v4111_v9 }
  0xf2   :  { %838 = vmatpush.msrb.mxu2 %v4043_v23  ;;  %858 = vmatpush.msrb.mxu3 %v4045_v24  ;;  %5849 = vst [vmem:[#allocation35_spill] sm:$0xff] %v4113_v10 }
  0xf3   :  { %878 = vmatpush.msra.mxu0 %v4049_v33  ;;  %898 = vmatpush.msra.mxu1 %v4051_v34 }
  0xf4   :  { %839 = vmatpush.msrb.mxu2 %v4055_v37  ;;  %859 = vmatpush.msrb.mxu3 %v4057_v38 }
  0xf5   :  { %879 = vmatpush.msra.mxu0 %v4061_v62  ;;  %899 = vmatpush.msra.mxu1 %v4063_v63 }
  0xf6   :  { %840 = vmatpush.msrb.mxu2 %v4071_v49  ;;  %860 = vmatpush.msrb.mxu3 %v4073_v50 }
  0xf7   :  { %880 = vmatpush.msra.mxu0 %v4077_v53  ;;  %900 = vmatpush.msra.mxu1 %v4079_v54 }
  0xf8   :  { %665 = vmatmul.f32.vlgmr.msra.gmra.mxu2 %v3895_v3  ;;  %694 = vmatmul.f32.vlgmr.msra.gmra.mxu3 %v3897_v4 }
  0xf9   :  { %723 = vmatmul.f32.vlgmr.msrb.gmra.mxu0 %v3895_v3  ;;  %752 = vmatmul.f32.vlgmr.msrb.gmra.mxu1 %v3897_v4  ;;  %v4097_v3 = vld [vmem:[#allocation7 + $0x48] sm:$0xff]  ;;  %v4101_v4 = vld [vmem:[#allocation7 + $0x50] sm:$0xff] }
  0xfa   :  { %5845 = vst [vmem:[#allocation31_spill] sm:$0xff] %v4097_v3  ;;  %841 = vmatpush.msrb.mxu2 %v4083_v57  ;;  %861 = vmatpush.msrb.mxu3 %v4085_v58  ;;  %v4117_v58 = vld [vmem:[#allocation7 + $0x30] sm:$0xff] }
  0xfb   :  { %5846 = vst [vmem:[#allocation32_spill] sm:$0xff] %v4101_v4  ;;  %881 = vmatpush.msra.mxu0 %v4089_v61  ;;  %901 = vmatpush.msra.mxu1 %v4091_v0  ;;  %v4119_v61 = vld [vmem:[#allocation7 + $0x38] sm:$0xff] }
  0xfc   :  { %842 = vmatpush.msrb.mxu2 %v4095_v20  ;;  %862 = vmatpush.msrb.mxu3 %v4097_v3  ;;  %5850 = vst [vmem:[#allocation36_spill] sm:$0xff] %v4117_v58  ;;  %v4123_v3 = vld [vmem:[#allocation7] sm:$0xff]  ;;  %v4131_v20 = vld [vmem:[#allocation7 + $0x18] sm:$0xff] }
  0xfd   :  { %882 = vmatpush.msra.mxu0 %v4101_v4  ;;  %902 = vmatpush.msra.mxu1 %v4103_v21  ;;  %5851 = vst [vmem:[#allocation37_spill] sm:$0xff] %v4119_v61  ;;  %v4125_v4 = vld [vmem:[#allocation7 + $0x8] sm:$0xff]  ;;  %v4129_v21 = vld [vmem:[#allocation7 + $0x10] sm:$0xff] }
  0xfe   :  { %5852 = vst [vmem:[#allocation38_spill] sm:$0xff] %v4123_v3  ;;  %843 = vmatpush.msrb.mxu2 %v4111_v9  ;;  %863 = vmatpush.msrb.mxu3 %v4113_v10 }
  0xff   :  { %5853 = vst [vmem:[#allocation39_spill] sm:$0xff] %v4125_v4  ;;  %883 = vmatpush.msra.mxu0 %v4117_v58  ;;  %903 = vmatpush.msra.mxu1 %v4119_v61 }
 0x100   :  { %668 = vmatmul.f32.gmra.mxu2 %v3927_v29  ;;  %697 = vmatmul.f32.gmra.mxu3 %v3929_v30  ;;  %5854 = vst [vmem:[#allocation40_spill] sm:$0xff] %v4129_v21 }
 0x101   :  { %726 = vmatmul.f32.gmra.mxu0 %v3927_v29  ;;  %755 = vmatmul.f32.gmra.mxu1 %v3929_v30  ;;  %5855 = vst [vmem:[#allocation41_spill] sm:$0xff] %v4131_v20  ;;  %v3766_v29 = vmov 0.0   ;;  %v5856_v30 = vld [vmem:[#allocation27_spill] sm:$0xff] }
 0x102   :  { %844 = vmatpush.msrb.mxu2 %v4123_v3  ;;  %864 = vmatpush.msrb.mxu3 %v4125_v4 }
 0x103   :  { %884 = vmatpush.msra.mxu0 %v4129_v21  ;;  %904 = vmatpush.msra.mxu1 %v4131_v20 }
 0x104   :  { %977 = vmatpush.msra.mxu2 %v3905_v13  ;;  %997 = vmatpush.msra.mxu3 %v3907_v14 }
 0x105   :  { %1017 = vmatpush.msrb.mxu0 %v3909_v43  ;;  %1037 = vmatpush.msrb.mxu1 %v3911_v16 }
 0x106   :  { %978 = vmatpush.msra.mxu2 %v3913_v19  ;;  %998 = vmatpush.msra.mxu3 %v3915_v22 }
 0x107   :  { %1018 = vmatpush.msrb.mxu0 %v3921_v25  ;;  %1038 = vmatpush.msrb.mxu1 %v3923_v28 }
 0x108   :  { %671 = vmatmul.f32.gmra.mxu2 %v3975_v55  ;;  %700 = vmatmul.f32.gmra.mxu3 %v3977_v26 }
 0x109   :  { %729 = vmatmul.f32.gmra.mxu0 %v3975_v55  ;;  %758 = vmatmul.f32.gmra.mxu1 %v3977_v26  ;;  %v5857_v55 = vld [vmem:[#allocation28_spill] sm:$0xff]  ;;  %v5858_v26 = vld [vmem:[#allocation30_spill] sm:$0xff] }
 0x10a   :  { %979 = vmatpush.msra.mxu2 %v3935_v31  ;;  %999 = vmatpush.msra.mxu3 %v3937_v32 }
 0x10b   :  { %1019 = vmatpush.msrb.mxu0 %v3943_v35  ;;  %1039 = vmatpush.msrb.mxu1 %v3945_v36 }
 0x10c   :  { %980 = vmatpush.msra.mxu2 %v3949_v39  ;;  %1000 = vmatpush.msra.mxu3 %v3951_v40 }
 0x10d   :  { %1020 = vmatpush.msrb.mxu0 %v3955_v41  ;;  %1040 = vmatpush.msrb.mxu1 %v3957_v44 }
 0x10e   :  { %981 = vmatpush.msra.mxu2 %v3961_v45  ;;  %1001 = vmatpush.msra.mxu3 %v3963_v46 }
 0x10f   :  { %1021 = vmatpush.msrb.mxu0 %v3969_v51  ;;  %1041 = vmatpush.msrb.mxu1 %v3971_v52 }
 0x110   :  { %674 = vmatmul.f32.gmra.mxu2 %v4023_v15  ;;  %703 = vmatmul.f32.gmra.mxu3 %v4025_v42 }
 0x111   :  { %732 = vmatmul.f32.gmra.mxu0 %v4023_v15  ;;  %761 = vmatmul.f32.gmra.mxu1 %v4025_v42  ;;  %v5859_v15 = vld [vmem:[#allocation31_spill] sm:$0xff]  ;;  %v5860_v42 = vld [vmem:[#allocation32_spill] sm:$0xff] }
 0x112   :  { %982 = vmatpush.msra.mxu2 %v3983_v27  ;;  %1002 = vmatpush.msra.mxu3 %v3985_v56 }
 0x113   :  { %1022 = vmatpush.msrb.mxu0 %v3991_v59  ;;  %1042 = vmatpush.msrb.mxu1 %v3993_v60 }
 0x114   :  { %983 = vmatpush.msra.mxu2 %v3997_v1  ;;  %1003 = vmatpush.msra.mxu3 %v3999_v2 }
 0x115   :  { %1023 = vmatpush.msrb.mxu0 %v4003_v5  ;;  %1043 = vmatpush.msrb.mxu1 %v4005_v6 }
 0x116   :  { %984 = vmatpush.msra.mxu2 %v4009_v7  ;;  %1004 = vmatpush.msra.mxu3 %v4011_v8 }
 0x117   :  { %1024 = vmatpush.msrb.mxu0 %v4017_v11  ;;  %1044 = vmatpush.msrb.mxu1 %v4019_v12 }
 0x118   :  { %845 = vmatmul.f32.vlgmr.msrb.gmra.mxu2 %v3766_v29  ;;  %865 = vmatmul.f32.vlgmr.msrb.gmra.mxu3 %v3766_v29 }
 0x119   :  { %885 = vmatmul.f32.vlgmr.msra.gmra.mxu0 %v3766_v29  ;;  %905 = vmatmul.f32.vlgmr.msra.gmra.mxu1 %v3766_v29  ;;  %v5861_v29 = vld [vmem:[#allocation33_spill] sm:$0xff] }
 0x11a   :  { %985 = vmatpush.msra.mxu2 %v4031_v47  ;;  %1005 = vmatpush.msra.mxu3 %v4033_v48 }
 0x11b   :  { %1025 = vmatpush.msrb.mxu0 %v4037_v17  ;;  %1045 = vmatpush.msrb.mxu1 %v4039_v18 }
 0x11c   :  { %986 = vmatpush.msra.mxu2 %v4043_v23  ;;  %1006 = vmatpush.msra.mxu3 %v4045_v24 }
 0x11d   :  { %1026 = vmatpush.msrb.mxu0 %v4049_v33  ;;  %1046 = vmatpush.msrb.mxu1 %v4051_v34 }
 0x11e   :  { %987 = vmatpush.msra.mxu2 %v4055_v37  ;;  %1007 = vmatpush.msra.mxu3 %v4057_v38 }
 0x11f   :  { %1027 = vmatpush.msrb.mxu0 %v4061_v62  ;;  %1047 = vmatpush.msrb.mxu1 %v4063_v63 }
 0x120   :  { %988 = vmatpush.msra.mxu2 %v4071_v49  ;;  %1008 = vmatpush.msra.mxu3 %v4073_v50 }
 0x121   :  { %1028 = vmatpush.msrb.mxu0 %v4077_v53  ;;  %1048 = vmatpush.msrb.mxu1 %v4079_v54 }
 0x122   :  { %989 = vmatpush.msra.mxu2 %v4083_v57  ;;  %1009 = vmatpush.msra.mxu3 %v5856_v30 }
 0x123   :  { %1029 = vmatpush.msrb.mxu0 %v5857_v55  ;;  %1049 = vmatpush.msrb.mxu1 %v4091_v0 }
 0x124   :  { %990 = vmatpush.msra.mxu2 %v5858_v26  ;;  %1010 = vmatpush.msra.mxu3 %v5859_v15 }
 0x125   :  { %1030 = vmatpush.msrb.mxu0 %v5860_v42  ;;  %1050 = vmatpush.msrb.mxu1 %v5861_v29 }
 0x126   :  { %991 = vmatpush.msra.mxu2 %v4111_v9  ;;  %1011 = vmatpush.msra.mxu3 %v4113_v10 }
 0x127   :  { %1031 = vmatpush.msrb.mxu0 %v4117_v58  ;;  %1051 = vmatpush.msrb.mxu1 %v4119_v61 }
 0x128   :  { %992 = vmatpush.msra.mxu2 %v4123_v3  ;;  %1012 = vmatpush.msra.mxu3 %v4125_v4 }
 0x129   :  { %1032 = vmatpush.msrb.mxu0 %v4129_v21  ;;  %1052 = vmatpush.msrb.mxu1 %v4131_v20 }
 0x12a   :  { %1143 = vmatpush.msrb.mxu2 %v3905_v13  ;;  %1163 = vmatpush.msrb.mxu3 %v3907_v14 }
 0x12b   :  { %1183 = vmatpush.msra.mxu0 %v3909_v43  ;;  %1203 = vmatpush.msra.mxu1 %v3911_v16 }
 0x12c   :  { %1144 = vmatpush.msrb.mxu2 %v3913_v19  ;;  %1164 = vmatpush.msrb.mxu3 %v3915_v22 }
 0x12d   :  { %1184 = vmatpush.msra.mxu0 %v3921_v25  ;;  %1204 = vmatpush.msra.mxu1 %v3923_v28 }
 0x12e   :  { %1145 = vmatpush.msrb.mxu2 %v3935_v31  ;;  %1165 = vmatpush.msrb.mxu3 %v3937_v32 }
 0x12f   :  { %1185 = vmatpush.msra.mxu0 %v3943_v35  ;;  %1205 = vmatpush.msra.mxu1 %v3945_v36 }
 0x130   :  { %1146 = vmatpush.msrb.mxu2 %v3949_v39  ;;  %1166 = vmatpush.msrb.mxu3 %v3951_v40 }
 0x131   :  { %1186 = vmatpush.msra.mxu0 %v3955_v41  ;;  %1206 = vmatpush.msra.mxu1 %v3957_v44 }
 0x132   :  { %1147 = vmatpush.msrb.mxu2 %v3961_v45  ;;  %1167 = vmatpush.msrb.mxu3 %v3963_v46 }
 0x133   :  { %1187 = vmatpush.msra.mxu0 %v3969_v51  ;;  %1207 = vmatpush.msra.mxu1 %v3971_v52 }
 0x134   :  { %1148 = vmatpush.msrb.mxu2 %v3983_v27  ;;  %1168 = vmatpush.msrb.mxu3 %v3985_v56 }
 0x135   :  { %1188 = vmatpush.msra.mxu0 %v3991_v59  ;;  %1208 = vmatpush.msra.mxu1 %v3993_v60 }
 0x136   :  { %1149 = vmatpush.msrb.mxu2 %v3997_v1  ;;  %1169 = vmatpush.msrb.mxu3 %v3999_v2 }
 0x137   :  { %1189 = vmatpush.msra.mxu0 %v4003_v5  ;;  %1209 = vmatpush.msra.mxu1 %v4005_v6 }
 0x138   :  { %1150 = vmatpush.msrb.mxu2 %v4009_v7  ;;  %1170 = vmatpush.msrb.mxu3 %v4011_v8 }
 0x139   :  { %1190 = vmatpush.msra.mxu0 %v4017_v11  ;;  %1210 = vmatpush.msra.mxu1 %v4019_v12 }
 0x13a   :  { %1151 = vmatpush.msrb.mxu2 %v4031_v47  ;;  %1171 = vmatpush.msrb.mxu3 %v4033_v48 }
 0x13b   :  { %1191 = vmatpush.msra.mxu0 %v4037_v17  ;;  %1211 = vmatpush.msra.mxu1 %v4039_v18 }
 0x13c   :  { %1152 = vmatpush.msrb.mxu2 %v4043_v23  ;;  %1172 = vmatpush.msrb.mxu3 %v4045_v24 }
 0x13d   :  { %1192 = vmatpush.msra.mxu0 %v4049_v33  ;;  %1212 = vmatpush.msra.mxu1 %v4051_v34 }
 0x13e   :  { %1153 = vmatpush.msrb.mxu2 %v4055_v37  ;;  %1173 = vmatpush.msrb.mxu3 %v4057_v38 }
 0x13f   :  { %1193 = vmatpush.msra.mxu0 %v4061_v62  ;;  %1213 = vmatpush.msra.mxu1 %v4063_v63 }
 0x140   :  { %1154 = vmatpush.msrb.mxu2 %v4071_v49  ;;  %1174 = vmatpush.msrb.mxu3 %v4073_v50 }
 0x141   :  { %1194 = vmatpush.msra.mxu0 %v4077_v53  ;;  %1214 = vmatpush.msra.mxu1 %v4079_v54 }
 0x142   :  { %1155 = vmatpush.msrb.mxu2 %v4083_v57  ;;  %1175 = vmatpush.msrb.mxu3 %v5856_v30 }
 0x143   :  { %1195 = vmatpush.msra.mxu0 %v5857_v55  ;;  %1215 = vmatpush.msra.mxu1 %v4091_v0 }
 0x144   :  { %1156 = vmatpush.msrb.mxu2 %v5858_v26  ;;  %1176 = vmatpush.msrb.mxu3 %v5859_v15 }
 0x145   :  { %1196 = vmatpush.msra.mxu0 %v5860_v42  ;;  %1216 = vmatpush.msra.mxu1 %v5861_v29 }
 0x146   :  { %1157 = vmatpush.msrb.mxu2 %v4111_v9  ;;  %1177 = vmatpush.msrb.mxu3 %v4113_v10  ;;  %v523_v9 = vld [vmem:[%s5610_s5] sm:$0xf] }
 0x147   :  { %1197 = vmatpush.msra.mxu0 %v4117_v58  ;;  %1217 = vmatpush.msra.mxu1 %v4119_v61  ;;  %v526_v58 = vperm.slane %v523_v9, 1 }
 0x148   :  { %1158 = vmatpush.msrb.mxu2 %v4123_v3  ;;  %1178 = vmatpush.msrb.mxu3 %v4125_v4  ;;  %v525_v4 = vperm.slane %v523_v9, 0 }
 0x149   :  { %1198 = vmatpush.msra.mxu0 %v4129_v21  ;;  %1218 = vmatpush.msra.mxu1 %v4131_v20 }
 0x156   :  { %v608_v15 = vpop.f32.mrf.mxu0  ;;  %v4275_v42 = vpop.f32.mrf.mxu1 }
 0x15b   :  { %v550_v10 = vpop.f32.mrf.mxu2  ;;  %v4280_v29 = vpop.f32.mrf.mxu3 }
 0x15e   :  { %v611_v61 = vpop.f32.mrf.mxu0  ;;  %v640_v26 = vpop.f32.mrf.mxu1 }
 0x15f   :  { %v612_v3 = vadd.f32 %v611_v61, %v526_v58 }
 0x161   :  { %v4282_v0 = vadd.f32 %v640_v26, %v612_v3 }
 0x163   :  { %5862 = vst [vmem:[#allocation42_spill] sm:$0xff] %v4282_v0  ;;  %v553_v21 = vpop.f32.mrf.mxu2  ;;  %v582_v55 = vpop.f32.mrf.mxu3 }
 0x164   :  { %v554_v20 = vadd.f32 %v553_v21, %v525_v4 }
 0x166   :  { %v4284_v30 = vadd.f32 %v582_v55, %v554_v20  ;;  %v614_v57 = vpop.f32.mrf.mxu0  ;;  %v643_v54 = vpop.f32.mrf.mxu1 }
 0x167   :  { %v615_v53 = vadd.f32 %v614_v57, %v526_v58 }
 0x168   :  { %5863 = vst [vmem:[#allocation43_spill] sm:$0xff] %v4284_v30 }
 0x169   :  { %v4286_v50 = vadd.f32 %v643_v54, %v615_v53  ;;  %v528_v54 = vperm.slane %v523_v9, 3 }
 0x16b   :  { %5864 = vst [vmem:[#allocation44_spill] sm:$0xff] %v4286_v50  ;;  %v556_v49 = vpop.f32.mrf.mxu2  ;;  %v585_v63 = vpop.f32.mrf.mxu3 }
 0x16c   :  { %v557_v62 = vadd.f32 %v556_v49, %v525_v4 }
 0x16e   :  { %v4288_v38 = vadd.f32 %v585_v63, %v557_v62  ;;  %v617_v37 = vpop.f32.mrf.mxu0  ;;  %v646_v61 = vpop.f32.mrf.mxu1  ;;  %v527_v63 = vperm.slane %v523_v9, 2 }
 0x16f   :  { %v618_v3 = vadd.f32 %v617_v37, %v526_v58 }
 0x170   :  { %5865 = vst [vmem:[#allocation45_spill] sm:$0xff] %v4288_v38 }
 0x171   :  { %v4290_v26 = vadd.f32 %v646_v61, %v618_v3 }
 0x173   :  { %5866 = vst [vmem:[#allocation46_spill] sm:$0xff] %v4290_v26  ;;  %v559_v0 = vpop.f32.mrf.mxu2  ;;  %v588_v34 = vpop.f32.mrf.mxu3 }
 0x174   :  { %v560_v21 = vadd.f32 %v559_v0, %v525_v4 }
 0x176   :  { %v4292_v20 = vadd.f32 %v588_v34, %v560_v21  ;;  %v724_v55 = vpop.f32.mrf.mxu0  ;;  %v753_v30 = vpop.f32.mrf.mxu1 }
 0x178   :  { %5867 = vst [vmem:[#allocation47_spill] sm:$0xff] %v4292_v20 }
 0x17b   :  { %v666_v57 = vpop.f32.mrf.mxu2  ;;  %v695_v53 = vpop.f32.mrf.mxu3 }
 0x17e   :  { %v727_v50 = vpop.f32.mrf.mxu0  ;;  %v756_v33 = vpop.f32.mrf.mxu1 }
 0x17f   :  { %v728_v49 = vadd.f32 %v727_v50, %v528_v54 }
 0x181   :  { %v4294_v62 = vadd.f32 %v756_v33, %v728_v49  ;;  %v725_v49 = vadd.f32 %v724_v55, %v528_v54 }
 0x183   :  { %5868 = vst [vmem:[#allocation48_spill] sm:$0xff] %v4294_v62  ;;  %v669_v38 = vpop.f32.mrf.mxu2  ;;  %v698_v37 = vpop.f32.mrf.mxu3 }
 0x184   :  { %v670_v61 = vadd.f32 %v669_v38, %v527_v63 }
 0x186   :  { %v4296_v3 = vadd.f32 %v698_v37, %v670_v61  ;;  %v730_v26 = vpop.f32.mrf.mxu0  ;;  %v759_v0 = vpop.f32.mrf.mxu1  ;;  %v4304_v61 = vadd.f32 %v753_v30, %v725_v49 }
 0x187   :  { %v731_v34 = vadd.f32 %v730_v26, %v528_v54  ;;  %v551_v26 = vadd.f32 %v550_v10, %v525_v4 }
 0x188   :  { %5869 = vst [vmem:[#allocation49_spill] sm:$0xff] %v4296_v3  ;;  %v609_v3 = vadd.f32 %v608_v15, %v526_v58 }
 0x189   :  { %v4298_v21 = vadd.f32 %v759_v0, %v731_v34  ;;  %5873 = vst [vmem:[#allocation53_spill] sm:$0xff] %v4304_v61 }
 0x18b   :  { %5870 = vst [vmem:[#allocation50_spill] sm:$0xff] %v4298_v21  ;;  %v672_v20 = vpop.f32.mrf.mxu2  ;;  %v701_v24 = vpop.f32.mrf.mxu3 }
 0x18c   :  { %v673_v23 = vadd.f32 %v672_v20, %v527_v63 }
 0x18e   :  { %v4300_v18 = vadd.f32 %v701_v24, %v673_v23  ;;  %v733_v17 = vpop.f32.mrf.mxu0  ;;  %v762_v50 = vpop.f32.mrf.mxu1  ;;  %v4310_v24 = vadd.f32 %v4275_v42, %v609_v3 }
 0x18f   :  { %v734_v33 = vadd.f32 %v733_v17, %v528_v54  ;;  %v4313_v17 = vadd.f32 %v4280_v29, %v551_v26  ;;  %v667_v29 = vadd.f32 %v666_v57, %v527_v63 }
 0x190   :  { %5871 = vst [vmem:[#allocation51_spill] sm:$0xff] %v4300_v18 }
 0x191   :  { %v4302_v9 = vadd.f32 %v762_v50, %v734_v33  ;;  %5875 = vst [vmem:[#allocation55_spill] sm:$0xff] %v4310_v24 }
 0x192   :  { %5876 = vst [vmem:[#allocation56_spill] sm:$0xff] %v4313_v17 }
 0x193   :  { %5872 = vst [vmem:[#allocation52_spill] sm:$0xff] %v4302_v9  ;;  %v675_v62 = vpop.f32.mrf.mxu2  ;;  %v704_v38 = vpop.f32.mrf.mxu3 }
 0x194   :  { %v676_v37 = vadd.f32 %v675_v62, %v527_v63 }
 0x196   :  { %v4306_v0 = vadd.f32 %v704_v38, %v676_v37  ;;  %v906_v34 = vpop.f32.mrf.mxu1  ;;  %v886_v49 = vpop.f32.mrf.mxu0  ;;  %v4317_v38 = vadd.f32 %v695_v53, %v667_v29 }
 0x197   :  { %v912_v20 = vadd.f32 %v906_v34, %v4304_v61 }
 0x198   :  { %5874 = vst [vmem:[#allocation54_spill] sm:$0xff] %v4306_v0  ;;  %v911_v34 = vadd.f32 %v886_v49, %v4317_v38 }
 0x199   :  { %v3185_v23 = vmul.f32 -1.442695, %v912_v20  ;;  %5877 = vst [vmem:[#allocation57_spill] sm:$0xff] %v4317_v38 }
 0x19b   :  { %3237 = vpow2.f32 %v3185_v23  ;;  %v846_v55 = vpop.f32.mrf.mxu2  ;;  %v866_v54 = vpop.f32.mrf.mxu3 }
 0x19c   :  { %v909_v30 = vadd.f32 %v846_v55, %v4313_v17  ;;  %v910_v58 = vadd.f32 %v866_v54, %v4310_v24 }
 0x19e   :  { %v3183_v4 = vmul.f32 -1.442695, %v909_v30  ;;  %v3184_v10 = vmul.f32 -1.442695, %v910_v58 }
 0x1a0   :  { %3239 = vpow2.f32 %v3183_v4 }
 0x1a1   :  { %v3238_v15 = vpop.eup %3237  ;;  %3241 = vpow2.f32 %v3184_v10 }
 0x1a2   :  { %v955_v62 = vadd.f32 1.0, %v3238_v15 }
 0x1a4   :  { %3243 = vrcp.f32 %v955_v62  ;;  %vm961_vm9 = vweird.f32 %v955_v62 }
 0x1a6   :  { %v3240_v50 = vpop.eup %3239 }
 0x1a7   :  { %v3242_v33 = vpop.eup %3241  ;;  %v916_v42 = vadd.f32 1.0, %v3240_v50 }
 0x1a8   :  { %v935_v3 = vadd.f32 1.0, %v3242_v33 }
 0x1a9   :  { %3245 = vrcp.f32 %v916_v42  ;;  %v928_v58 = vand.u32 2147483648, %v916_v42  ;;  %v926_v57 = vand.u32 2147483647, %v916_v42  ;;  %vm922_vm2 = vweird.f32 %v916_v42 }
 0x1aa   :  { %3247 = vrcp.f32 %v935_v3  ;;  %v3244_v37 = vpop.eup %3243  ;;  %v947_v63 = vand.u32 2147483648, %v935_v3  ;;  %v945_v53 = vand.u32 2147483647, %v935_v3  ;;  %vm941_vm4 = vweird.f32 %v935_v3 }
 0x1ab   :  { %v957_v54 = vmul.f32 %v3244_v37, %v955_v62  ;;  %3249 = vtanh.f32 %v911_v34  ;;  %v929_v29 = vor.u32 1.1754944e-38, %v928_v58  ;;  %vm927_vm5 = vcmp.eq.f32.partialorder %v926_v57, 8.507059e+37 }
 0x1ac   :  { %v948_v34 = vor.u32 1.1754944e-38, %v947_v63  ;;  %vm946_vm7 = vcmp.eq.f32.partialorder %v945_v53, 8.507059e+37  ;;  %vm962_vm8 = vweird.f32 %v3244_v37 }
 0x1ad   :  { %v958_v50 = vsub.f32 1.0, %v957_v54  ;;  %v967_v54 = vand.u32 2147483648, %v955_v62  ;;  %vm963_vm10 = vmor %vm961_vm9, %vm962_vm8 }
 0x1af   :  { %v3246_v26 = vpop.eup %3245  ;;  %v959_v9 = vmul.f32 %v3244_v37, %v958_v50  ;;  %v968_v58 = vor.u32 1.1754944e-38, %v967_v54 }
 0x1b0   :  { %v3248_v20 = vpop.eup %3247  ;;  %v918_v23 = vmul.f32 %v3246_v26, %v916_v42  ;;  %vm923_vm0 = vweird.f32 %v3246_v26 }
 0x1b1   :  { %v937_v55 = vmul.f32 %v3248_v20, %v935_v3  ;;  %vm942_vm1 = vweird.f32 %v3248_v20  ;;  %vm924_vm3 = vmor %vm922_vm2, %vm923_vm0  ;;  %v960_v42 = vadd.f32 %v3244_v37, %v959_v9  ;;  %v965_v3 = vand.u32 2147483647, %v955_v62 }
 0x1b2   :  { %v919_v30 = vsub.f32 1.0, %v918_v23  ;;  %vm943_vm6 = vmor %vm941_vm4, %vm942_vm1  ;;  %v3250_v23 = vpop.eup %3249 }
 0x1b3   :  { %v938_v4 = vsub.f32 1.0, %v937_v55  ;;  %vm966_vm11 = vcmp.eq.f32.partialorder %v965_v3, 8.507059e+37 }
 0x1b4   :  { %v920_v10 = vmul.f32 %v3246_v26, %v919_v30 }
 0x1b5   :  { %v939_v15 = vmul.f32 %v3248_v20, %v938_v4 }
 0x1b6   :  { %v921_v33 = vadd.f32 %v3246_v26, %v920_v10 }
 0x1b7   :  { %v940_v49 = vadd.f32 %v3248_v20, %v939_v15 }
 0x1b8   :  { %v925_v0 = vsel %vm924_vm3, %v3246_v26, %v921_v33  ;;  %v964_v26 = vsel %vm963_vm10, %v3244_v37, %v960_v42  ;;  %v5908_v42 = vld [vmem:[#allocation57_spill] sm:$0xff] }
 0x1b9   :  { %v930_v55 = vsel %vm927_vm5, %v929_v29, %v925_v0  ;;  %v944_v30 = vsel %vm943_vm6, %v3248_v20, %v940_v49  ;;  %v969_v20 = vsel %vm966_vm11, %v968_v58, %v964_v26 }
 0x1ba   :  { %v972_v18 = vmul.f32 %v3250_v23, %v930_v55  ;;  %v949_v4 = vsel %vm946_vm7, %v948_v34, %v944_v30 }
 0x1bb   :  { %v971_v21 = vmul.f32 0.0, %v949_v4 }
 0x1bd   :  { %v4320_v38 = vadd.f32 %v972_v18, %v971_v21 }
 0x1bf   :  { %3251 = vtanh.f32 %v4320_v38 }
 0x1c5   :  { %v3252_v0 = vpop.eup %3251 }
 0x1c6   :  { %v4323_v10 = vmul.f32 %v3252_v0, %v969_v20 }
 0x1c8   :  { %993 = vmatmul.f32.vlgmr.msra.gmra.mxu2 %v4323_v10  ;;  %1013 = vmatmul.f32.vlgmr.msra.gmra.mxu3 %v4323_v10 }
 0x1c9   :  { %1033 = vmatmul.f32.vlgmr.msrb.gmra.mxu0 %v4323_v10  ;;  %1053 = vmatmul.f32.vlgmr.msrb.gmra.mxu1 %v4323_v10 }
 0x1ca   :  { %1309 = vmatpush.msra.mxu2 %v3905_v13  ;;  %1329 = vmatpush.msra.mxu3 %v3907_v14  ;;  %v5878_v13 = vld [vmem:[#allocation12_spill] sm:$0xff]  ;;  %v5879_v14 = vld [vmem:[#allocation13_spill] sm:$0xff] }
 0x1cb   :  { %1349 = vmatpush.msrb.mxu0 %v3909_v43  ;;  %1369 = vmatpush.msrb.mxu1 %v3911_v16  ;;  %v5880_v43 = vld [vmem:[#allocation14_spill] sm:$0xff]  ;;  %v5881_v16 = vld [vmem:[#allocation15_spill] sm:$0xff] }
 0x1cc   :  { %1310 = vmatpush.msra.mxu2 %v3913_v19  ;;  %1330 = vmatpush.msra.mxu3 %v3915_v22  ;;  %v5882_v19 = vld [vmem:[#allocation16_spill] sm:$0xff]  ;;  %v5883_v22 = vld [vmem:[#allocation17_spill] sm:$0xff] }
 0x1cd   :  { %1350 = vmatpush.msrb.mxu0 %v3921_v25  ;;  %1370 = vmatpush.msrb.mxu1 %v3923_v28  ;;  %v5884_v25 = vld [vmem:[#allocation18_spill] sm:$0xff]  ;;  %v5885_v28 = vld [vmem:[#allocation19_spill] sm:$0xff] }
 0x1ce   :  { %1311 = vmatpush.msra.mxu2 %v3935_v31  ;;  %1331 = vmatpush.msra.mxu3 %v3937_v32  ;;  %v5886_v31 = vld [vmem:[#allocation20_spill] sm:$0xff]  ;;  %v5887_v32 = vld [vmem:[#allocation21_spill] sm:$0xff] }
 0x1cf   :  { %1351 = vmatpush.msrb.mxu0 %v3943_v35  ;;  %1371 = vmatpush.msrb.mxu1 %v3945_v36  ;;  %v5888_v35 = vld [vmem:[#allocation22_spill] sm:$0xff]  ;;  %v5889_v36 = vld [vmem:[#allocation23_spill] sm:$0xff] }
 0x1d0   :  { %1312 = vmatpush.msra.mxu2 %v3949_v39  ;;  %1332 = vmatpush.msra.mxu3 %v3951_v40  ;;  %v5890_v39 = vld [vmem:[#allocation24_spill] sm:$0xff]  ;;  %v5891_v40 = vld [vmem:[#allocation25_spill] sm:$0xff] }
 0x1d1   :  { %1352 = vmatpush.msrb.mxu0 %v3955_v41  ;;  %1372 = vmatpush.msrb.mxu1 %v3957_v44  ;;  %v5892_v41 = vld [vmem:[#allocation26_spill] sm:$0xff]  ;;  %v5893_v44 = vld [vmem:[#allocation27_spill] sm:$0xff] }
 0x1d2   :  { %1313 = vmatpush.msra.mxu2 %v3961_v45  ;;  %1333 = vmatpush.msra.mxu3 %v3963_v46  ;;  %v5894_v45 = vld [vmem:[#allocation28_spill] sm:$0xff]  ;;  %v5895_v46 = vld [vmem:[#allocation29_spill] sm:$0xff] }
 0x1d3   :  { %1353 = vmatpush.msrb.mxu0 %v3969_v51  ;;  %1373 = vmatpush.msrb.mxu1 %v3971_v52  ;;  %v5896_v51 = vld [vmem:[#allocation30_spill] sm:$0xff]  ;;  %v5897_v52 = vld [vmem:[#allocation31_spill] sm:$0xff] }
 0x1d4   :  { %1314 = vmatpush.msra.mxu2 %v3983_v27  ;;  %1334 = vmatpush.msra.mxu3 %v3985_v56  ;;  %v5898_v27 = vld [vmem:[#allocation32_spill] sm:$0xff]  ;;  %v5899_v56 = vld [vmem:[#allocation33_spill] sm:$0xff] }
 0x1d5   :  { %1354 = vmatpush.msrb.mxu0 %v3991_v59  ;;  %1374 = vmatpush.msrb.mxu1 %v3993_v60  ;;  %v5900_v59 = vld [vmem:[#allocation34_spill] sm:$0xff]  ;;  %v5901_v60 = vld [vmem:[#allocation35_spill] sm:$0xff] }
 0x1d6   :  { %1315 = vmatpush.msra.mxu2 %v3997_v1  ;;  %1335 = vmatpush.msra.mxu3 %v3999_v2  ;;  %v5902_v1 = vld [vmem:[#allocation36_spill] sm:$0xff]  ;;  %v5903_v2 = vld [vmem:[#allocation37_spill] sm:$0xff] }
 0x1d7   :  { %1355 = vmatpush.msrb.mxu0 %v4003_v5  ;;  %1375 = vmatpush.msrb.mxu1 %v4005_v6  ;;  %v5904_v5 = vld [vmem:[#allocation38_spill] sm:$0xff]  ;;  %v5905_v6 = vld [vmem:[#allocation39_spill] sm:$0xff] }
 0x1d8   :  { %1316 = vmatpush.msra.mxu2 %v4009_v7  ;;  %1336 = vmatpush.msra.mxu3 %v4011_v8  ;;  %v5906_v7 = vld [vmem:[#allocation40_spill] sm:$0xff]  ;;  %v5907_v8 = vld [vmem:[#allocation41_spill] sm:$0xff] }
 0x1d9   :  { %1356 = vmatpush.msrb.mxu0 %v4017_v11  ;;  %1376 = vmatpush.msrb.mxu1 %v4019_v12 }
 0x1da   :  { %1317 = vmatpush.msra.mxu2 %v4031_v47  ;;  %1337 = vmatpush.msra.mxu3 %v4033_v48 }
 0x1db   :  { %1357 = vmatpush.msrb.mxu0 %v5878_v13  ;;  %1377 = vmatpush.msrb.mxu1 %v5879_v14 }
 0x1dc   :  { %1318 = vmatpush.msra.mxu2 %v5880_v43  ;;  %1338 = vmatpush.msra.mxu3 %v5881_v16 }
 0x1dd   :  { %1358 = vmatpush.msrb.mxu0 %v5882_v19  ;;  %1378 = vmatpush.msrb.mxu1 %v5883_v22 }
 0x1de   :  { %1319 = vmatpush.msra.mxu2 %v5884_v25  ;;  %1339 = vmatpush.msra.mxu3 %v5885_v28 }
 0x1df   :  { %1359 = vmatpush.msrb.mxu0 %v5886_v31  ;;  %1379 = vmatpush.msrb.mxu1 %v5887_v32 }
 0x1e0   :  { %1320 = vmatpush.msra.mxu2 %v5888_v35  ;;  %1340 = vmatpush.msra.mxu3 %v5889_v36 }
 0x1e1   :  { %1360 = vmatpush.msrb.mxu0 %v5890_v39  ;;  %1380 = vmatpush.msrb.mxu1 %v5891_v40 }
 0x1e2   :  { %1321 = vmatpush.msra.mxu2 %v5892_v41  ;;  %1341 = vmatpush.msra.mxu3 %v5893_v44  ;;  %v1132_v41 = vrot.slane %v4320_v38, 6 }
 0x1e3   :  { %1361 = vmatpush.msrb.mxu0 %v5894_v45  ;;  %1381 = vmatpush.msrb.mxu1 %v5895_v46 }
 0x1e4   :  { %1322 = vmatpush.msra.mxu2 %v5896_v51  ;;  %1342 = vmatpush.msra.mxu3 %v5897_v52 }
 0x1e5   :  { %1362 = vmatpush.msrb.mxu0 %v5898_v27  ;;  %1382 = vmatpush.msrb.mxu1 %v5899_v56 }
 0x1e6   :  { %1323 = vmatpush.msra.mxu2 %v5900_v59  ;;  %1343 = vmatpush.msra.mxu3 %v5901_v60 }
 0x1e7   :  { %1363 = vmatpush.msrb.mxu0 %v5902_v1  ;;  %1383 = vmatpush.msrb.mxu1 %v5903_v2 }
 0x1e8   :  { %1324 = vmatpush.msra.mxu2 %v5904_v5  ;;  %1344 = vmatpush.msra.mxu3 %v5905_v6 }
 0x1e9   :  { %1364 = vmatpush.msrb.mxu0 %v5906_v7  ;;  %1384 = vmatpush.msrb.mxu1 %v5907_v8 }
 0x246   :  { %v1054_v11 = vpop.f32.mrf.mxu1  ;;  %v1034_v34 = vpop.f32.mrf.mxu0 }
 0x247   :  { %v1064_v12 = vrot.slane %v1054_v11, 6  ;;  %v1063_v55 = vrot.slane %v1034_v34, 6  ;;  %v4434_v34 = vld [vmem:[#allocation7 + $0x1a8] sm:$0xff] }
 0x249   :  { %v1072_v47 = vadd.f32 %v1064_v12, %v4304_v61  ;;  %v1071_v54 = vadd.f32 %v1063_v55, %v5908_v42  ;;  %v4440_v55 = vld [vmem:[#allocation7 + $0x1b8] sm:$0xff] }
 0x24b   :  { %v3188_v48 = vmul.f32 -1.442695, %v1072_v47  ;;  %v994_v18 = vpop.f32.mrf.mxu2  ;;  %v1014_v21 = vpop.f32.mrf.mxu3 }
 0x24c   :  { %v1061_v9 = vrot.slane %v994_v18, 6  ;;  %v1062_v62 = vrot.slane %v1014_v21, 6 }
 0x24d   :  { %3253 = vpow2.f32 %v3188_v48 }
 0x24e   :  { %v1069_v37 = vadd.f32 %v1061_v9, %v4313_v17  ;;  %v1070_v57 = vadd.f32 %v1062_v62, %v4310_v24 }
 0x250   :  { %v3186_v63 = vmul.f32 -1.442695, %v1069_v37  ;;  %v3187_v15 = vmul.f32 -1.442695, %v1070_v57  ;;  %v4407_v37 = vld [vmem:[#allocation7 + $0x1e0] sm:$0xff]  ;;  %v4410_v57 = vld [vmem:[#allocation7 + $0x1e8] sm:$0xff] }
 0x252   :  { %3255 = vpow2.f32 %v3186_v63  ;;  %v4413_v63 = vld [vmem:[#allocation7 + $0x1f0] sm:$0xff] }
 0x253   :  { %v3254_v53 = vpop.eup %3253  ;;  %3257 = vpow2.f32 %v3187_v15  ;;  %v4416_v15 = vld [vmem:[#allocation7 + $0x1f8] sm:$0xff] }
 0x254   :  { %v1115_v50 = vadd.f32 1.0, %v3254_v53  ;;  %v4419_v53 = vld [vmem:[#allocation7 + $0x1c0] sm:$0xff] }
 0x256   :  { %3259 = vrcp.f32 %v1115_v50  ;;  %v1127_v12 = vand.u32 2147483648, %v1115_v50  ;;  %vm1121_vm5 = vweird.f32 %v1115_v50  ;;  %v1125_v47 = vand.u32 2147483647, %v1115_v50 }
 0x258   :  { %v3256_v33 = vpop.eup %3255  ;;  %v1128_v18 = vor.u32 1.1754944e-38, %v1127_v12  ;;  %vm1126_vm7 = vcmp.eq.f32.partialorder %v1125_v47, 8.507059e+37  ;;  %v4533_v12 = vld [vmem:[#allocation7 + $0xb0] sm:$0xff]  ;;  %v4536_v47 = vld [vmem:[#allocation7 + $0xb8] sm:$0xff] }
 0x259   :  { %v3258_v29 = vpop.eup %3257  ;;  %v1076_v49 = vadd.f32 1.0, %v3256_v33  ;;  %v4425_v33 = vld [vmem:[#allocation7 + $0x1d0] sm:$0xff]  ;;  %5916 = vst [vmem:[#allocation19_spill] sm:$0xff] %v4533_v12 }
 0x25a   :  { %v1095_v23 = vadd.f32 1.0, %v3258_v29  ;;  %v4428_v29 = vld [vmem:[#allocation7 + $0x1d8] sm:$0xff]  ;;  %5917 = vst [vmem:[#allocation20_spill] sm:$0xff] %v4536_v47 }
 0x25b   :  { %3261 = vrcp.f32 %v1076_v49  ;;  %v1088_v13 = vand.u32 2147483648, %v1076_v49  ;;  %v1086_v16 = vand.u32 2147483647, %v1076_v49  ;;  %vm1082_vm14 = vweird.f32 %v1076_v49 }
 0x25c   :  { %3263 = vrcp.f32 %v1095_v23  ;;  %v3260_v30 = vpop.eup %3259  ;;  %v1107_v19 = vand.u32 2147483648, %v1095_v23  ;;  %v1105_v25 = vand.u32 2147483647, %v1095_v23  ;;  %vm1101_vm0 = vweird.f32 %v1095_v23 }
 0x25d   :  { %v1117_v0 = vmul.f32 %v3260_v30, %v1115_v50  ;;  %3265 = vtanh.f32 %v1071_v54  ;;  %v1089_v32 = vor.u32 1.1754944e-38, %v1088_v13  ;;  %vm1087_vm1 = vcmp.eq.f32.partialorder %v1086_v16, 8.507059e+37  ;;  %v4422_v50 = vld [vmem:[#allocation7 + $0x1c8] sm:$0xff]  ;;  %v4449_v54 = vld [vmem:[#allocation7 + $0x190] sm:$0xff]  ;;  %v4467_v13 = vld [vmem:[#allocation7 + $0x140] sm:$0xff] }
 0x25e   :  { %v1108_v39 = vor.u32 1.1754944e-38, %v1107_v19  ;;  %vm1106_vm3 = vcmp.eq.f32.partialorder %v1105_v25, 8.507059e+37  ;;  %vm1122_vm4 = vweird.f32 %v3260_v30  ;;  %v4476_v16 = vld [vmem:[#allocation7 + $0x158] sm:$0xff]  ;;  %v4479_v19 = vld [vmem:[#allocation7 + $0x120] sm:$0xff]  ;;  %v4485_v25 = vld [vmem:[#allocation7 + $0x130] sm:$0xff] }
 0x25f   :  { %v1118_v28 = vsub.f32 1.0, %v1117_v0  ;;  %vm1123_vm6 = vmor %vm1121_vm5, %vm1122_vm4  ;;  %v4461_v0 = vld [vmem:[#allocation7 + $0x170] sm:$0xff] }
 0x261   :  { %v3262_v4 = vpop.eup %3261  ;;  %v1119_v46 = vmul.f32 %v3260_v30, %v1118_v28  ;;  %v4488_v28 = vld [vmem:[#allocation7 + $0x138] sm:$0xff] }
 0x262   :  { %v3264_v3 = vpop.eup %3263  ;;  %v1078_v26 = vmul.f32 %v3262_v4, %v1076_v49  ;;  %vm1083_vm12 = vweird.f32 %v3262_v4  ;;  %v4431_v49 = vld [vmem:[#allocation7 + $0x1a0] sm:$0xff] }
 0x263   :  { %v1097_v58 = vmul.f32 %v3264_v3, %v1095_v23  ;;  %vm1102_vm13 = vweird.f32 %v3264_v3  ;;  %vm1084_vm15 = vmor %vm1082_vm14, %vm1083_vm12  ;;  %v3266_v40 = vpop.eup %3265  ;;  %v1120_v11 = vadd.f32 %v3260_v30, %v1119_v46  ;;  %v4437_v23 = vld [vmem:[#allocation7 + $0x1b0] sm:$0xff]  ;;  %v4518_v46 = vld [vmem:[#allocation7 + $0xc8] sm:$0xff] }
 0x264   :  { %v1079_v20 = vsub.f32 1.0, %v1078_v26  ;;  %vm1103_vm2 = vmor %vm1101_vm0, %vm1102_vm13  ;;  %v4455_v26 = vld [vmem:[#allocation7 + $0x160] sm:$0xff]  ;;  %5911 = vst [vmem:[#allocation14_spill] sm:$0xff] %v4518_v46 }
 0x265   :  { %v1098_v14 = vsub.f32 1.0, %v1097_v58  ;;  %v1124_v48 = vsel %vm1123_vm6, %v3260_v30, %v1120_v11  ;;  %v4443_v30 = vld [vmem:[#allocation7 + $0x180] sm:$0xff]  ;;  %v4458_v58 = vld [vmem:[#allocation7 + $0x168] sm:$0xff] }
 0x266   :  { %v1080_v43 = vmul.f32 %v3262_v4, %v1079_v20  ;;  %v1129_v21 = vsel %vm1126_vm7, %v1128_v18, %v1124_v48  ;;  %v4464_v20 = vld [vmem:[#allocation7 + $0x178] sm:$0xff]  ;;  %v4530_v11 = vld [vmem:[#allocation7 + $0xa8] sm:$0xff]  ;;  %v4539_v48 = vld [vmem:[#allocation7 + $0x80] sm:$0xff] }
 0x267   :  { %v1099_v22 = vmul.f32 %v3264_v3, %v1098_v14  ;;  %v4470_v14 = vld [vmem:[#allocation7 + $0x148] sm:$0xff]  ;;  %5915 = vst [vmem:[#allocation18_spill] sm:$0xff] %v4530_v11 }
 0x268   :  { %v1081_v31 = vadd.f32 %v3262_v4, %v1080_v43  ;;  %v4473_v43 = vld [vmem:[#allocation7 + $0x150] sm:$0xff]  ;;  %5918 = vst [vmem:[#allocation21_spill] sm:$0xff] %v4539_v48  ;;  %v4542_v18 = vld [vmem:[#allocation7 + $0x88] sm:$0xff] }
 0x269   :  { %v1100_v35 = vadd.f32 %v3264_v3, %v1099_v22  ;;  %v4482_v22 = vld [vmem:[#allocation7 + $0x128] sm:$0xff]  ;;  %5919 = vst [vmem:[#allocation22_spill] sm:$0xff] %v4542_v18 }
 0x26a   :  { %v1085_v36 = vsel %vm1084_vm15, %v3262_v4, %v1081_v31  ;;  %v4446_v4 = vld [vmem:[#allocation7 + $0x188] sm:$0xff]  ;;  %v4491_v31 = vld [vmem:[#allocation7 + $0x100] sm:$0xff] }
 0x26b   :  { %v1090_v44 = vsel %vm1087_vm1, %v1089_v32, %v1085_v36  ;;  %v1104_v45 = vsel %vm1103_vm2, %v3264_v3, %v1100_v35  ;;  %v4452_v3 = vld [vmem:[#allocation7 + $0x198] sm:$0xff]  ;;  %v4494_v32 = vld [vmem:[#allocation7 + $0x108] sm:$0xff]  ;;  %v4497_v35 = vld [vmem:[#allocation7 + $0x110] sm:$0xff] }
 0x26c   :  { %v1135_v51 = vmul.f32 %v3266_v40, %v1090_v44  ;;  %v1109_v52 = vsel %vm1106_vm3, %v1108_v39, %v1104_v45  ;;  %v4500_v36 = vld [vmem:[#allocation7 + $0x118] sm:$0xff]  ;;  %v4503_v39 = vld [vmem:[#allocation7 + $0xe0] sm:$0xff]  ;;  %v4506_v40 = vld [vmem:[#allocation7 + $0xe8] sm:$0xff] }
 0x26d   :  { %v1134_v27 = vmul.f32 %v1132_v41, %v1109_v52  ;;  %v4509_v41 = vld [vmem:[#allocation7 + $0xf0] sm:$0xff]  ;;  %v4512_v44 = vld [vmem:[#allocation7 + $0xf8] sm:$0xff]  ;;  %v4515_v45 = vld [vmem:[#allocation7 + $0xc0] sm:$0xff] }
 0x26e   :  { %5909 = vst [vmem:[#allocation12_spill] sm:$0xff] %v4512_v44  ;;  %v4524_v52 = vld [vmem:[#allocation7 + $0xd8] sm:$0xff] }
 0x26f   :  { %v4398_v56 = vadd.f32 %v1135_v51, %v1134_v27  ;;  %5910 = vst [vmem:[#allocation13_spill] sm:$0xff] %v4515_v45  ;;  %v4521_v51 = vld [vmem:[#allocation7 + $0xd0] sm:$0xff]  ;;  %v4527_v27 = vld [vmem:[#allocation7 + $0xa0] sm:$0xff] }
 0x270   :  { %5912 = vst [vmem:[#allocation15_spill] sm:$0xff] %v4521_v51 }
 0x271   :  { %3267 = vtanh.f32 %v4398_v56  ;;  %5913 = vst [vmem:[#allocation16_spill] sm:$0xff] %v4524_v52 }
 0x272   :  { %5914 = vst [vmem:[#allocation17_spill] sm:$0xff] %v4527_v27 }
 0x277   :  { %v3268_v38 = vpop.eup %3267 }
 0x278   :  { %v1138_v9 = vmul.f32 %v3268_v38, %v1129_v21  ;;  %v4545_v38 = vld [vmem:[#allocation7 + $0x90] sm:$0xff]  ;;  %v4548_v21 = vld [vmem:[#allocation7 + $0x98] sm:$0xff] }
 0x279   :  { %5920 = vst [vmem:[#allocation23_spill] sm:$0xff] %v4545_v38 }
 0x27a   :  { %v4401_v62 = vrot.slane %v1138_v9, 2  ;;  %5921 = vst [vmem:[#allocation24_spill] sm:$0xff] %v4548_v21  ;;  %v4551_v9 = vld [vmem:[#allocation7 + $0x60] sm:$0xff] }
 0x27b   :  { %5922 = vst [vmem:[#allocation25_spill] sm:$0xff] %v4551_v9 }
 0x27c   :  { %1159 = vmatmul.f32.vlgmr.msrb.gmra.mxu2 %v4401_v62  ;;  %1179 = vmatmul.f32.vlgmr.msrb.gmra.mxu3 %v4401_v62 }
 0x27d   :  { %1199 = vmatmul.f32.vlgmr.msra.gmra.mxu0 %v4401_v62  ;;  %1219 = vmatmul.f32.vlgmr.msra.gmra.mxu1 %v4401_v62 }
 0x27e   :  { %1475 = vmatpush.msrb.mxu2 %v4407_v37  ;;  %1495 = vmatpush.msrb.mxu3 %v4410_v57 }
 0x27f   :  { %1515 = vmatpush.msra.mxu0 %v4413_v63  ;;  %1535 = vmatpush.msra.mxu1 %v4416_v15 }
 0x280   :  { %1476 = vmatpush.msrb.mxu2 %v4419_v53  ;;  %1496 = vmatpush.msrb.mxu3 %v4422_v50 }
 0x281   :  { %1516 = vmatpush.msra.mxu0 %v4425_v33  ;;  %1536 = vmatpush.msra.mxu1 %v4428_v29 }
 0x282   :  { %1477 = vmatpush.msrb.mxu2 %v4431_v49  ;;  %1497 = vmatpush.msrb.mxu3 %v4434_v34 }
 0x283   :  { %1517 = vmatpush.msra.mxu0 %v4437_v23  ;;  %1537 = vmatpush.msra.mxu1 %v4440_v55 }
 0x284   :  { %1478 = vmatpush.msrb.mxu2 %v4443_v30  ;;  %1498 = vmatpush.msrb.mxu3 %v4446_v4 }
 0x285   :  { %1518 = vmatpush.msra.mxu0 %v4449_v54  ;;  %1538 = vmatpush.msra.mxu1 %v4452_v3 }
 0x286   :  { %1479 = vmatpush.msrb.mxu2 %v4455_v26  ;;  %1499 = vmatpush.msrb.mxu3 %v4458_v58 }
 0x287   :  { %1519 = vmatpush.msra.mxu0 %v4461_v0  ;;  %1539 = vmatpush.msra.mxu1 %v4464_v20 }
 0x288   :  { %1480 = vmatpush.msrb.mxu2 %v4467_v13  ;;  %1500 = vmatpush.msrb.mxu3 %v4470_v14 }
 0x289   :  { %1520 = vmatpush.msra.mxu0 %v4473_v43  ;;  %1540 = vmatpush.msra.mxu1 %v4476_v16 }
 0x28a   :  { %1481 = vmatpush.msrb.mxu2 %v4479_v19  ;;  %1501 = vmatpush.msrb.mxu3 %v4482_v22 }
 0x28b   :  { %1521 = vmatpush.msra.mxu0 %v4485_v25  ;;  %1541 = vmatpush.msra.mxu1 %v4488_v28 }
 0x28c   :  { %1482 = vmatpush.msrb.mxu2 %v4491_v31  ;;  %1502 = vmatpush.msrb.mxu3 %v4494_v32 }
 0x28d   :  { %1522 = vmatpush.msra.mxu0 %v4497_v35  ;;  %1542 = vmatpush.msra.mxu1 %v4500_v36 }
 0x28e   :  { %1483 = vmatpush.msrb.mxu2 %v4503_v39  ;;  %1503 = vmatpush.msrb.mxu3 %v4506_v40 }
 0x28f   :  { %1523 = vmatpush.msra.mxu0 %v4509_v41  ;;  %1543 = vmatpush.msra.mxu1 %v4512_v44 }
 0x290   :  { %1484 = vmatpush.msrb.mxu2 %v4515_v45  ;;  %1504 = vmatpush.msrb.mxu3 %v4518_v46  ;;  %v1298_v46 = vrot.slane %v4398_v56, 6 }
 0x291   :  { %1524 = vmatpush.msra.mxu0 %v4521_v51  ;;  %1544 = vmatpush.msra.mxu1 %v4524_v52 }
 0x292   :  { %1485 = vmatpush.msrb.mxu2 %v4527_v27  ;;  %1505 = vmatpush.msrb.mxu3 %v4530_v11 }
 0x293   :  { %1525 = vmatpush.msra.mxu0 %v4533_v12  ;;  %1545 = vmatpush.msra.mxu1 %v4536_v47  ;;  %v4554_v47 = vld [vmem:[#allocation7 + $0x68] sm:$0xff] }
 0x294   :  { %1486 = vmatpush.msrb.mxu2 %v4539_v48  ;;  %1506 = vmatpush.msrb.mxu3 %v4542_v18  ;;  %5923 = vst [vmem:[#allocation26_spill] sm:$0xff] %v4554_v47  ;;  %v4557_v48 = vld [vmem:[#allocation7 + $0x70] sm:$0xff]  ;;  %v4560_v18 = vld [vmem:[#allocation7 + $0x78] sm:$0xff] }
 0x295   :  { %1526 = vmatpush.msra.mxu0 %v4545_v38  ;;  %1546 = vmatpush.msra.mxu1 %v4548_v21  ;;  %5924 = vst [vmem:[#allocation27_spill] sm:$0xff] %v4557_v48  ;;  %v4563_v38 = vld [vmem:[#allocation7 + $0x40] sm:$0xff]  ;;  %v4566_v21 = vld [vmem:[#allocation7 + $0x48] sm:$0xff] }
 0x296   :  { %1487 = vmatpush.msrb.mxu2 %v4551_v9  ;;  %1507 = vmatpush.msrb.mxu3 %v4554_v47  ;;  %5925 = vst [vmem:[#allocation28_spill] sm:$0xff] %v4560_v18  ;;  %v4569_v9 = vld [vmem:[#allocation7 + $0x50] sm:$0xff]  ;;  %v4572_v47 = vld [vmem:[#allocation7 + $0x58] sm:$0xff] }
 0x297   :  { %1527 = vmatpush.msra.mxu0 %v4557_v48  ;;  %1547 = vmatpush.msra.mxu1 %v4560_v18  ;;  %5926 = vst [vmem:[#allocation29_spill] sm:$0xff] %v4563_v38 }
 0x298   :  { %1488 = vmatpush.msrb.mxu2 %v4563_v38  ;;  %5927 = vst [vmem:[#allocation30_spill] sm:$0xff] %v4566_v21  ;;  %1508 = vmatpush.msrb.mxu3 %v4566_v21 }
 0x299   :  { %5928 = vst [vmem:[#allocation31_spill] sm:$0xff] %v4569_v9  ;;  %1528 = vmatpush.msra.mxu0 %v4569_v9  ;;  %1548 = vmatpush.msra.mxu1 %v4572_v47 }
 0x29a   :  { %5929 = vst [vmem:[#allocation32_spill] sm:$0xff] %v4572_v47  ;;  %1489 = vmatpush.msrb.mxu2 %v5900_v59  ;;  %1509 = vmatpush.msrb.mxu3 %v5901_v60 }
 0x29b   :  { %1529 = vmatpush.msra.mxu0 %v5902_v1  ;;  %1549 = vmatpush.msra.mxu1 %v5903_v2 }
 0x29c   :  { %1490 = vmatpush.msrb.mxu2 %v5904_v5  ;;  %1510 = vmatpush.msrb.mxu3 %v5905_v6 }
 0x29d   :  { %1530 = vmatpush.msra.mxu0 %v5906_v7  ;;  %1550 = vmatpush.msra.mxu1 %v5907_v8 }
 0x2fa   :  { %v1220_v9 = vpop.f32.mrf.mxu1 }
 0x2fb   :  { %v1230_v21 = vrot.slane %v1220_v9, 4 }
 0x2fd   :  { %v1238_v47 = vadd.f32 %v1230_v21, %v4304_v61  ;;  %v1200_v21 = vpop.f32.mrf.mxu0 }
 0x2ff   :  { %v3191_v38 = vmul.f32 -1.442695, %v1238_v47  ;;  %v1160_v59 = vpop.f32.mrf.mxu2  ;;  %v1180_v18 = vpop.f32.mrf.mxu3 }
 0x300   :  { %v1227_v60 = vrot.slane %v1160_v59, 4  ;;  %v1228_v48 = vrot.slane %v1180_v18, 4  ;;  %v1229_v18 = vrot.slane %v1200_v21, 4 }
 0x301   :  { %3269 = vpow2.f32 %v3191_v38 }
 0x302   :  { %v1235_v1 = vadd.f32 %v1227_v60, %v4313_v17  ;;  %v1236_v2 = vadd.f32 %v1228_v48, %v4310_v24  ;;  %v1237_v60 = vadd.f32 %v1229_v18, %v5908_v42 }
 0x304   :  { %v3189_v5 = vmul.f32 -1.442695, %v1235_v1  ;;  %v3190_v6 = vmul.f32 -1.442695, %v1236_v2 }
 0x306   :  { %3271 = vpow2.f32 %v3189_v5 }
 0x307   :  { %v3270_v7 = vpop.eup %3269  ;;  %3273 = vpow2.f32 %v3190_v6 }
 0x308   :  { %v1281_v8 = vadd.f32 1.0, %v3270_v7 }
 0x30a   :  { %3275 = vrcp.f32 %v1281_v8  ;;  %vm1287_vm1 = vweird.f32 %v1281_v8 }
 0x30c   :  { %v3272_v12 = vpop.eup %3271 }
 0x30d   :  { %v3274_v9 = vpop.eup %3273  ;;  %v1242_v11 = vadd.f32 1.0, %v3272_v12 }
 0x30e   :  { %v1261_v47 = vadd.f32 1.0, %v3274_v9 }
 0x30f   :  { %3277 = vrcp.f32 %v1242_v11  ;;  %v1254_v6 = vand.u32 2147483648, %v1242_v11  ;;  %v1252_v12 = vand.u32 2147483647, %v1242_v11  ;;  %vm1248_vm10 = vweird.f32 %v1242_v11 }
 0x310   :  { %3279 = vrcp.f32 %v1261_v47  ;;  %v3276_v38 = vpop.eup %3275  ;;  %v1273_v61 = vand.u32 2147483648, %v1261_v47  ;;  %v1271_v27 = vand.u32 2147483647, %v1261_v47  ;;  %vm1267_vm12 = vweird.f32 %v1261_v47 }
 0x311   :  { %v1283_v5 = vmul.f32 %v3276_v38, %v1281_v8  ;;  %3281 = vtanh.f32 %v1237_v60  ;;  %v1255_v18 = vor.u32 1.1754944e-38, %v1254_v6  ;;  %vm1253_vm13 = vcmp.eq.f32.partialorder %v1252_v12, 8.507059e+37  ;;  %v5937_v12 = vld [vmem:[#allocation19_spill] sm:$0xff] }
 0x312   :  { %v1274_v60 = vor.u32 1.1754944e-38, %v1273_v61  ;;  %vm1272_vm15 = vcmp.eq.f32.partialorder %v1271_v27, 8.507059e+37  ;;  %vm1288_vm0 = vweird.f32 %v3276_v38  ;;  %v1293_v6 = vand.u32 2147483648, %v1281_v8 }
 0x313   :  { %v1284_v21 = vsub.f32 1.0, %v1283_v5  ;;  %vm1289_vm2 = vmor %vm1287_vm1, %vm1288_vm0 }
 0x315   :  { %v3278_v59 = vpop.eup %3277 }
 0x316   :  { %v3280_v48 = vpop.eup %3279  ;;  %v1244_v1 = vmul.f32 %v3278_v59, %v1242_v11  ;;  %vm1249_vm8 = vweird.f32 %v3278_v59 }
 0x317   :  { %v1263_v2 = vmul.f32 %v3280_v48, %v1261_v47  ;;  %vm1268_vm9 = vweird.f32 %v3280_v48  ;;  %vm1250_vm11 = vmor %vm1248_vm10, %vm1249_vm8  ;;  %v1142_v47 = vadd.f32 %v4401_v62, %v4323_v10  ;;  %v5930_v10 = vld [vmem:[#allocation12_spill] sm:$0xff]  ;;  %v5931_v62 = vld [vmem:[#allocation13_spill] sm:$0xff] }
 0x318   :  { %v1245_v24 = vsub.f32 1.0, %v1244_v1  ;;  %vm1269_vm14 = vmor %vm1267_vm12, %vm1268_vm9  ;;  %v3282_v1 = vpop.eup %3281 }
 0x319   :  { %v1264_v7 = vsub.f32 1.0, %v1263_v2 }
 0x31a   :  { %v1246_v17 = vmul.f32 %v3278_v59, %v1245_v24 }
 0x31b   :  { %v1265_v9 = vmul.f32 %v3280_v48, %v1264_v7  ;;  %v1285_v7 = vmul.f32 %v3276_v38, %v1284_v21  ;;  %v5939_v21 = vld [vmem:[#allocation21_spill] sm:$0xff] }
 0x31c   :  { %v1247_v52 = vadd.f32 %v3278_v59, %v1246_v17 }
 0x31d   :  { %v1266_v42 = vadd.f32 %v3280_v48, %v1265_v9  ;;  %v1286_v11 = vadd.f32 %v3276_v38, %v1285_v7  ;;  %v5938_v9 = vld [vmem:[#allocation20_spill] sm:$0xff]  ;;  %v5945_v7 = vld [vmem:[#allocation27_spill] sm:$0xff] }
 0x31e   :  { %v1251_v51 = vsel %vm1250_vm11, %v3278_v59, %v1247_v52  ;;  %v1291_v52 = vand.u32 2147483647, %v1281_v8  ;;  %v5933_v8 = vld [vmem:[#allocation15_spill] sm:$0xff]  ;;  %v5935_v59 = vld [vmem:[#allocation17_spill] sm:$0xff] }
 0x31f   :  { %v1256_v2 = vsel %vm1253_vm13, %v1255_v18, %v1251_v51  ;;  %v1270_v24 = vsel %vm1269_vm14, %v3280_v48, %v1266_v42  ;;  %v1290_v61 = vsel %vm1289_vm2, %v3276_v38, %v1286_v11  ;;  %v1294_v51 = vor.u32 1.1754944e-38, %v1293_v6  ;;  %v5934_v38 = vld [vmem:[#allocation16_spill] sm:$0xff]  ;;  %v5936_v48 = vld [vmem:[#allocation18_spill] sm:$0xff]  ;;  %v5947_v11 = vld [vmem:[#allocation29_spill] sm:$0xff] }
 0x320   :  { %v1301_v45 = vmul.f32 %v3282_v1, %v1256_v2  ;;  %v1275_v44 = vsel %vm1272_vm15, %v1274_v60, %v1270_v24  ;;  %vm1292_vm3 = vcmp.eq.f32.partialorder %v1291_v52, 8.507059e+37  ;;  %v5940_v18 = vld [vmem:[#allocation22_spill] sm:$0xff]  ;;  %v5941_v60 = vld [vmem:[#allocation23_spill] sm:$0xff]  ;;  %v5942_v1 = vld [vmem:[#allocation24_spill] sm:$0xff] }
 0x321   :  { %v1300_v5 = vmul.f32 %v1298_v46, %v1275_v44  ;;  %v1295_v27 = vsel %vm1292_vm3, %v1294_v51, %v1290_v61  ;;  %v5932_v46 = vld [vmem:[#allocation14_spill] sm:$0xff]  ;;  %v5943_v2 = vld [vmem:[#allocation25_spill] sm:$0xff]  ;;  %v5949_v52 = vld [vmem:[#allocation31_spill] sm:$0xff] }
 0x322   :  { %v5944_v24 = vld [vmem:[#allocation26_spill] sm:$0xff]  ;;  %v5950_v61 = vld [vmem:[#allocation32_spill] sm:$0xff] }
 0x323   :  { %v4588_v17 = vadd.f32 %v1301_v45, %v1300_v5  ;;  %v5946_v5 = vld [vmem:[#allocation28_spill] sm:$0xff]  ;;  %v5948_v6 = vld [vmem:[#allocation30_spill] sm:$0xff] }
 0x324   :  { %v4651_v51 = vld [vmem:[#allocation7 + $0x20] sm:$0xff] }
 0x325   :  { %3283 = vtanh.f32 %v4588_v17  ;;  %5951 = vst [vmem:[#allocation33_spill] sm:$0xff] %v4651_v51 }
 0x32b   :  { %v3284_v42 = vpop.eup %3283 }
 0x32c   :  { %v1304_v56 = vmul.f32 %v3284_v42, %v1295_v27  ;;  %v4654_v42 = vld [vmem:[#allocation7 + $0x28] sm:$0xff]  ;;  %v4657_v27 = vld [vmem:[#allocation7 + $0x30] sm:$0xff] }
 0x32d   :  { %5952 = vst [vmem:[#allocation34_spill] sm:$0xff] %v4654_v42 }
 0x32e   :  { %v1306_v44 = vrot.slane %v1304_v56, 4  ;;  %5953 = vst [vmem:[#allocation35_spill] sm:$0xff] %v4657_v27  ;;  %v4660_v56 = vld [vmem:[#allocation7 + $0x38] sm:$0xff] }
 0x32f   :  { %5954 = vst [vmem:[#allocation36_spill] sm:$0xff] %v4660_v56 }
 0x330   :  { %v4593_v45 = vadd.f32 %v1306_v44, %v1142_v47  ;;  %1325 = vmatmul.f32.vlgmr.msra.gmra.mxu2 %v1306_v44  ;;  %1345 = vmatmul.f32.vlgmr.msra.gmra.mxu3 %v1306_v44  ;;  %v4663_v47 = vld [vmem:[#allocation7] sm:$0xff] }
 0x331   :  { %1365 = vmatmul.f32.vlgmr.msrb.gmra.mxu0 %v1306_v44  ;;  %1385 = vmatmul.f32.vlgmr.msrb.gmra.mxu1 %v1306_v44  ;;  %5955 = vst [vmem:[#allocation37_spill] sm:$0xff] %v4663_v47  ;;  %v4666_v44 = vld [vmem:[#allocation7 + $0x8] sm:$0xff] }
 0x332   :  { %1626 = vmatpush.msra.mxu2 %v4407_v37  ;;  %1646 = vmatpush.msra.mxu3 %v4410_v57  ;;  %5956 = vst [vmem:[#allocation38_spill] sm:$0xff] %v4666_v44 }
 0x333   :  { %1666 = vmatpush.msrb.mxu0 %v4413_v63  ;;  %1686 = vmatpush.msrb.mxu1 %v4416_v15 }
 0x334   :  { %1627 = vmatpush.msra.mxu2 %v4419_v53  ;;  %1647 = vmatpush.msra.mxu3 %v4422_v50 }
 0x335   :  { %1667 = vmatpush.msrb.mxu0 %v4425_v33  ;;  %1687 = vmatpush.msrb.mxu1 %v4428_v29 }
 0x336   :  { %1628 = vmatpush.msra.mxu2 %v4431_v49  ;;  %1648 = vmatpush.msra.mxu3 %v4434_v34 }
 0x337   :  { %1668 = vmatpush.msrb.mxu0 %v4437_v23  ;;  %1688 = vmatpush.msrb.mxu1 %v4440_v55 }
 0x338   :  { %1629 = vmatpush.msra.mxu2 %v4443_v30  ;;  %1649 = vmatpush.msra.mxu3 %v4446_v4 }
 0x339   :  { %1669 = vmatpush.msrb.mxu0 %v4449_v54  ;;  %1689 = vmatpush.msrb.mxu1 %v4452_v3 }
 0x33a   :  { %1630 = vmatpush.msra.mxu2 %v4455_v26  ;;  %1650 = vmatpush.msra.mxu3 %v4458_v58 }
 0x33b   :  { %1670 = vmatpush.msrb.mxu0 %v4461_v0  ;;  %1690 = vmatpush.msrb.mxu1 %v4464_v20 }
 0x33c   :  { %1631 = vmatpush.msra.mxu2 %v4467_v13  ;;  %1651 = vmatpush.msra.mxu3 %v4470_v14 }
 0x33d   :  { %1671 = vmatpush.msrb.mxu0 %v4473_v43  ;;  %1691 = vmatpush.msrb.mxu1 %v4476_v16 }
 0x33e   :  { %1632 = vmatpush.msra.mxu2 %v4479_v19  ;;  %1652 = vmatpush.msra.mxu3 %v4482_v22 }
 0x33f   :  { %1672 = vmatpush.msrb.mxu0 %v4485_v25  ;;  %1692 = vmatpush.msrb.mxu1 %v4488_v28 }
 0x340   :  { %1633 = vmatpush.msra.mxu2 %v4491_v31  ;;  %1653 = vmatpush.msra.mxu3 %v4494_v32 }
 0x341   :  { %1673 = vmatpush.msrb.mxu0 %v4497_v35  ;;  %1693 = vmatpush.msrb.mxu1 %v4500_v36 }
 0x342   :  { %1634 = vmatpush.msra.mxu2 %v4503_v39  ;;  %1654 = vmatpush.msra.mxu3 %v4506_v40 }
 0x343   :  { %1674 = vmatpush.msrb.mxu0 %v4509_v41  ;;  %1694 = vmatpush.msrb.mxu1 %v5930_v10 }
 0x344   :  { %1635 = vmatpush.msra.mxu2 %v5931_v62  ;;  %1655 = vmatpush.msra.mxu3 %v5932_v46 }
 0x345   :  { %1675 = vmatpush.msrb.mxu0 %v5933_v8  ;;  %1695 = vmatpush.msrb.mxu1 %v5934_v38  ;;  %v1464_v8 = vrot.slane %v4588_v17, 6 }
 0x346   :  { %1636 = vmatpush.msra.mxu2 %v5935_v59  ;;  %1656 = vmatpush.msra.mxu3 %v5936_v48 }
 0x347   :  { %1676 = vmatpush.msrb.mxu0 %v5937_v12  ;;  %1696 = vmatpush.msrb.mxu1 %v5938_v9 }
 0x348   :  { %1637 = vmatpush.msra.mxu2 %v5939_v21  ;;  %1657 = vmatpush.msra.mxu3 %v5940_v18 }
 0x349   :  { %1677 = vmatpush.msrb.mxu0 %v5941_v60  ;;  %1697 = vmatpush.msrb.mxu1 %v5942_v1 }
 0x34a   :  { %1638 = vmatpush.msra.mxu2 %v5943_v2  ;;  %1658 = vmatpush.msra.mxu3 %v5944_v24  ;;  %v5960_v24 = vld [vmem:[#allocation56_spill] sm:$0xff]  ;;  %v5961_v2 = vld [vmem:[#allocation55_spill] sm:$0xff] }
 0x34b   :  { %1678 = vmatpush.msrb.mxu0 %v5945_v7  ;;  %1698 = vmatpush.msrb.mxu1 %v5946_v5 }
 0x34c   :  { %1639 = vmatpush.msra.mxu2 %v5947_v11  ;;  %1659 = vmatpush.msra.mxu3 %v5948_v6 }
 0x34d   :  { %1679 = vmatpush.msrb.mxu0 %v5949_v52  ;;  %1699 = vmatpush.msrb.mxu1 %v5950_v61  ;;  %v5959_v52 = vld [vmem:[#allocation53_spill] sm:$0xff] }
 0x34e   :  { %1640 = vmatpush.msra.mxu2 %v4651_v51  ;;  %1660 = vmatpush.msra.mxu3 %v4654_v42  ;;  %v4669_v51 = vld [vmem:[#allocation7 + $0x10] sm:$0xff]  ;;  %v4672_v42 = vld [vmem:[#allocation7 + $0x18] sm:$0xff] }
 0x34f   :  { %1680 = vmatpush.msrb.mxu0 %v4657_v27  ;;  %1700 = vmatpush.msrb.mxu1 %v4660_v56  ;;  %5957 = vst [vmem:[#allocation39_spill] sm:$0xff] %v4669_v51 }
 0x350   :  { %1641 = vmatpush.msra.mxu2 %v4663_v47  ;;  %1661 = vmatpush.msra.mxu3 %v4666_v44  ;;  %5958 = vst [vmem:[#allocation40_spill] sm:$0xff] %v4672_v42 }
 0x351   :  { %1681 = vmatpush.msrb.mxu0 %v4669_v51  ;;  %1701 = vmatpush.msrb.mxu1 %v4672_v42 }
 0x3ae   :  { %v1386_v27 = vpop.f32.mrf.mxu1 }
 0x3af   :  { %v1396_v61 = vrot.slane %v1386_v27, 2 }
 0x3b1   :  { %v1404_v56 = vadd.f32 %v1396_v61, %v5959_v52  ;;  %v1366_v52 = vpop.f32.mrf.mxu0 }
 0x3b3   :  { %v3194_v6 = vmul.f32 -1.442695, %v1404_v56  ;;  %v1326_v11 = vpop.f32.mrf.mxu2  ;;  %v1346_v5 = vpop.f32.mrf.mxu3 }
 0x3b4   :  { %v1393_v47 = vrot.slane %v1326_v11, 2  ;;  %v1394_v7 = vrot.slane %v1346_v5, 2  ;;  %v1395_v5 = vrot.slane %v1366_v52, 2 }
 0x3b5   :  { %3285 = vpow2.f32 %v3194_v6 }
 0x3b6   :  { %v1401_v44 = vadd.f32 %v1393_v47, %v5960_v24  ;;  %v1402_v1 = vadd.f32 %v1394_v7, %v5961_v2  ;;  %v5962_v24 = vld [vmem:[#allocation57_spill] sm:$0xff] }
 0x3b7   :  { %v1403_v56 = vadd.f32 %v1395_v5, %v5962_v24 }
 0x3b8   :  { %v3192_v60 = vmul.f32 -1.442695, %v1401_v44  ;;  %v3193_v51 = vmul.f32 -1.442695, %v1402_v1 }
 0x3ba   :  { %3287 = vpow2.f32 %v3192_v60 }
 0x3bb   :  { %v3286_v18 = vpop.eup %3285  ;;  %3289 = vpow2.f32 %v3193_v51 }
 0x3bc   :  { %v1447_v42 = vadd.f32 1.0, %v3286_v18 }
 0x3be   :  { %3291 = vrcp.f32 %v1447_v42  ;;  %vm1453_vm13 = vweird.f32 %v1447_v42 }
 0x3c0   :  { %v3288_v21 = vpop.eup %3287 }
 0x3c1   :  { %v3290_v27 = vpop.eup %3289  ;;  %v1408_v9 = vadd.f32 1.0, %v3288_v21 }
 0x3c2   :  { %v1427_v61 = vadd.f32 1.0, %v3290_v27 }
 0x3c3   :  { %3293 = vrcp.f32 %v1408_v9  ;;  %v1420_v18 = vand.u32 2147483648, %v1408_v9  ;;  %v1418_v21 = vand.u32 2147483647, %v1408_v9  ;;  %vm1414_vm6 = vweird.f32 %v1408_v9 }
 0x3c4   :  { %3295 = vrcp.f32 %v1427_v61  ;;  %v3292_v11 = vpop.eup %3291  ;;  %v1439_v12 = vand.u32 2147483648, %v1427_v61  ;;  %v1437_v48 = vand.u32 2147483647, %v1427_v61  ;;  %vm1433_vm8 = vweird.f32 %v1427_v61 }
 0x3c5   :  { %v1449_v60 = vmul.f32 %v3292_v11, %v1447_v42  ;;  %3297 = vtanh.f32 %v1403_v56  ;;  %v1421_v5 = vor.u32 1.1754944e-38, %v1420_v18  ;;  %vm1419_vm9 = vcmp.eq.f32.partialorder %v1418_v21, 8.507059e+37  ;;  %v5969_v21 = vld [vmem:[#allocation19_spill] sm:$0xff] }
 0x3c6   :  { %v1440_v56 = vor.u32 1.1754944e-38, %v1439_v12  ;;  %vm1438_vm11 = vcmp.eq.f32.partialorder %v1437_v48, 8.507059e+37  ;;  %vm1454_vm12 = vweird.f32 %v3292_v11  ;;  %v1459_v18 = vand.u32 2147483648, %v1447_v42 }
 0x3c7   :  { %v1450_v52 = vsub.f32 1.0, %v1449_v60  ;;  %vm1455_vm14 = vmor %vm1453_vm13, %vm1454_vm12 }
 0x3c9   :  { %v3294_v6 = vpop.eup %3293 }
 0x3ca   :  { %v3296_v2 = vpop.eup %3295  ;;  %v1410_v7 = vmul.f32 %v3294_v6, %v1408_v9  ;;  %vm1415_vm4 = vweird.f32 %v3294_v6 }
 0x3cb   :  { %v1429_v1 = vmul.f32 %v3296_v2, %v1427_v61  ;;  %vm1434_vm5 = vweird.f32 %v3296_v2  ;;  %vm1416_vm7 = vmor %vm1414_vm6, %vm1415_vm4 }
 0x3cc   :  { %v1411_v47 = vsub.f32 1.0, %v1410_v7  ;;  %vm1435_vm10 = vmor %vm1433_vm8, %vm1434_vm5  ;;  %v3298_v7 = vpop.eup %3297 }
 0x3cd   :  { %v1430_v51 = vsub.f32 1.0, %v1429_v1 }
 0x3ce   :  { %v1412_v44 = vmul.f32 %v3294_v6, %v1411_v47 }
 0x3cf   :  { %v1431_v27 = vmul.f32 %v3296_v2, %v1430_v51  ;;  %v1451_v51 = vmul.f32 %v3292_v11, %v1450_v52  ;;  %v5971_v52 = vld [vmem:[#allocation21_spill] sm:$0xff] }
 0x3d0   :  { %v1413_v59 = vadd.f32 %v3294_v6, %v1412_v44 }
 0x3d1   :  { %v1432_v24 = vadd.f32 %v3296_v2, %v1431_v27  ;;  %v1452_v9 = vadd.f32 %v3292_v11, %v1451_v51  ;;  %v5970_v27 = vld [vmem:[#allocation20_spill] sm:$0xff] }
 0x3d2   :  { %v1417_v38 = vsel %vm1416_vm7, %v3294_v6, %v1413_v59  ;;  %v1457_v59 = vand.u32 2147483647, %v1447_v42  ;;  %v5967_v42 = vld [vmem:[#allocation17_spill] sm:$0xff]  ;;  %v5978_v51 = vld [vmem:[#allocation28_spill] sm:$0xff] }
 0x3d3   :  { %v1422_v1 = vsel %vm1419_vm9, %v1421_v5, %v1417_v38  ;;  %v1436_v47 = vsel %vm1435_vm10, %v3296_v2, %v1432_v24  ;;  %v1456_v12 = vsel %vm1455_vm14, %v3292_v11, %v1452_v9  ;;  %v1460_v38 = vor.u32 1.1754944e-38, %v1459_v18  ;;  %v5968_v11 = vld [vmem:[#allocation18_spill] sm:$0xff]  ;;  %v5973_v24 = vld [vmem:[#allocation23_spill] sm:$0xff] }
 0x3d4   :  { %v1467_v46 = vmul.f32 %v3298_v7, %v1422_v1  ;;  %v1441_v62 = vsel %vm1438_vm11, %v1440_v56, %v1436_v47  ;;  %vm1458_vm15 = vcmp.eq.f32.partialorder %v1457_v59, 8.507059e+37  ;;  %v5972_v5 = vld [vmem:[#allocation22_spill] sm:$0xff]  ;;  %v5974_v56 = vld [vmem:[#allocation24_spill] sm:$0xff]  ;;  %v5975_v7 = vld [vmem:[#allocation25_spill] sm:$0xff] }
 0x3d5   :  { %v1466_v60 = vmul.f32 %v1464_v8, %v1441_v62  ;;  %v1461_v61 = vsel %vm1458_vm15, %v1460_v38, %v1456_v12  ;;  %v5964_v62 = vld [vmem:[#allocation14_spill] sm:$0xff]  ;;  %v5966_v8 = vld [vmem:[#allocation16_spill] sm:$0xff]  ;;  %v5977_v47 = vld [vmem:[#allocation27_spill] sm:$0xff] }
 0x3d6   :  { %v5976_v1 = vld [vmem:[#allocation26_spill] sm:$0xff]  ;;  %v5981_v18 = vld [vmem:[#allocation31_spill] sm:$0xff]  ;;  %v5982_v59 = vld [vmem:[#allocation32_spill] sm:$0xff] }
 0x3d7   :  { %v4680_v44 = vadd.f32 %v1467_v46, %v1466_v60  ;;  %v5965_v46 = vld [vmem:[#allocation15_spill] sm:$0xff]  ;;  %v5979_v60 = vld [vmem:[#allocation29_spill] sm:$0xff]  ;;  %v5980_v9 = vld [vmem:[#allocation30_spill] sm:$0xff] }
 0x3d8   :  { %v5983_v12 = vld [vmem:[#allocation33_spill] sm:$0xff]  ;;  %v5984_v38 = vld [vmem:[#allocation34_spill] sm:$0xff] }
 0x3d9   :  { %3299 = vtanh.f32 %v4680_v44 }
 0x3df   :  { %v3300_v48 = vpop.eup %3299 }
 0x3e0   :  { %v1470_v17 = vmul.f32 %v3300_v48, %v1461_v61  ;;  %v5985_v48 = vld [vmem:[#allocation35_spill] sm:$0xff]  ;;  %v5986_v61 = vld [vmem:[#allocation36_spill] sm:$0xff] }
 0x3e2   :  { %v1472_v6 = vrot.slane %v1470_v17, 6  ;;  %v5987_v17 = vld [vmem:[#allocation37_spill] sm:$0xff] }
 0x3e4   :  { %v4684_v2 = vadd.f32 %v1472_v6, %v4593_v45  ;;  %1491 = vmatmul.f32.vlgmr.msrb.gmra.mxu2 %v1472_v6  ;;  %1511 = vmatmul.f32.vlgmr.msrb.gmra.mxu3 %v1472_v6  ;;  %v5963_v45 = vld [vmem:[#allocation13_spill] sm:$0xff] }
 0x3e5   :  { %1531 = vmatmul.f32.vlgmr.msra.gmra.mxu0 %v1472_v6  ;;  %1551 = vmatmul.f32.vlgmr.msra.gmra.mxu1 %v1472_v6  ;;  %v5988_v6 = vld [vmem:[#allocation38_spill] sm:$0xff] }
 0x3e6   :  { %1792 = vmatpush.msrb.mxu2 %v4407_v37  ;;  %1812 = vmatpush.msrb.mxu3 %v4410_v57 }
 0x3e7   :  { %1832 = vmatpush.msra.mxu0 %v4413_v63  ;;  %1852 = vmatpush.msra.mxu1 %v4416_v15 }
 0x3e8   :  { %1793 = vmatpush.msrb.mxu2 %v4419_v53  ;;  %1813 = vmatpush.msrb.mxu3 %v4422_v50 }
 0x3e9   :  { %1833 = vmatpush.msra.mxu0 %v4425_v33  ;;  %1853 = vmatpush.msra.mxu1 %v4428_v29 }
 0x3ea   :  { %1794 = vmatpush.msrb.mxu2 %v4431_v49  ;;  %1814 = vmatpush.msrb.mxu3 %v4434_v34 }
 0x3eb   :  { %1834 = vmatpush.msra.mxu0 %v4437_v23  ;;  %1854 = vmatpush.msra.mxu1 %v4440_v55 }
 0x3ec   :  { %1795 = vmatpush.msrb.mxu2 %v4443_v30  ;;  %1815 = vmatpush.msrb.mxu3 %v4446_v4 }
 0x3ed   :  { %1835 = vmatpush.msra.mxu0 %v4449_v54  ;;  %1855 = vmatpush.msra.mxu1 %v4452_v3 }
 0x3ee   :  { %1796 = vmatpush.msrb.mxu2 %v4455_v26  ;;  %1816 = vmatpush.msrb.mxu3 %v4458_v58 }
 0x3ef   :  { %1836 = vmatpush.msra.mxu0 %v4461_v0  ;;  %1856 = vmatpush.msra.mxu1 %v4464_v20 }
 0x3f0   :  { %1797 = vmatpush.msrb.mxu2 %v4467_v13  ;;  %1817 = vmatpush.msrb.mxu3 %v4470_v14 }
 0x3f1   :  { %1837 = vmatpush.msra.mxu0 %v4473_v43  ;;  %1857 = vmatpush.msra.mxu1 %v4476_v16 }
 0x3f2   :  { %1798 = vmatpush.msrb.mxu2 %v4479_v19  ;;  %1818 = vmatpush.msrb.mxu3 %v4482_v22 }
 0x3f3   :  { %1838 = vmatpush.msra.mxu0 %v4485_v25  ;;  %1858 = vmatpush.msra.mxu1 %v4488_v28 }
 0x3f4   :  { %1799 = vmatpush.msrb.mxu2 %v4491_v31  ;;  %1819 = vmatpush.msrb.mxu3 %v4494_v32 }
 0x3f5   :  { %1839 = vmatpush.msra.mxu0 %v4497_v35  ;;  %1859 = vmatpush.msra.mxu1 %v4500_v36 }
 0x3f6   :  { %1800 = vmatpush.msrb.mxu2 %v4503_v39  ;;  %1820 = vmatpush.msrb.mxu3 %v4506_v40 }
 0x3f7   :  { %1840 = vmatpush.msra.mxu0 %v4509_v41  ;;  %1860 = vmatpush.msra.mxu1 %v5930_v10 }
 0x3f8   :  { %1801 = vmatpush.msrb.mxu2 %v5963_v45  ;;  %1821 = vmatpush.msrb.mxu3 %v5964_v62 }
 0x3f9   :  { %1841 = vmatpush.msra.mxu0 %v5965_v46  ;;  %1861 = vmatpush.msra.mxu1 %v5966_v8  ;;  %v1618_v46 = vrot.slane %v4680_v44, 6 }
 0x3fa   :  { %1802 = vmatpush.msrb.mxu2 %v5967_v42  ;;  %1822 = vmatpush.msrb.mxu3 %v5968_v11 }
 0x3fb   :  { %1842 = vmatpush.msra.mxu0 %v5969_v21  ;;  %1862 = vmatpush.msra.mxu1 %v5970_v27 }
 0x3fc   :  { %1803 = vmatpush.msrb.mxu2 %v5971_v52  ;;  %1823 = vmatpush.msrb.mxu3 %v5972_v5 }
 0x3fd   :  { %1843 = vmatpush.msra.mxu0 %v5973_v24  ;;  %1863 = vmatpush.msra.mxu1 %v5974_v56 }
 0x3fe   :  { %1804 = vmatpush.msrb.mxu2 %v5975_v7  ;;  %1824 = vmatpush.msrb.mxu3 %v5976_v1 }
 0x3ff   :  { %1844 = vmatpush.msra.mxu0 %v5977_v47  ;;  %1864 = vmatpush.msra.mxu1 %v5978_v51  ;;  %v5989_v51 = vld [vmem:[#allocation39_spill] sm:$0xff] }
 0x400   :  { %1805 = vmatpush.msrb.mxu2 %v5979_v60  ;;  %1825 = vmatpush.msrb.mxu3 %v5980_v9  ;;  %v5990_v60 = vld [vmem:[#allocation40_spill] sm:$0xff] }
 0x401   :  { %1845 = vmatpush.msra.mxu0 %v5981_v18  ;;  %1865 = vmatpush.msra.mxu1 %v5982_v59  ;;  %v5991_v18 = vld [vmem:[#allocation48_spill] sm:$0xff] }
 0x402   :  { %1806 = vmatpush.msrb.mxu2 %v5983_v12  ;;  %1826 = vmatpush.msrb.mxu3 %v5984_v38  ;;  %v5992_v38 = vld [vmem:[#allocation43_spill] sm:$0xff] }
 0x403   :  { %1846 = vmatpush.msra.mxu0 %v5985_v48  ;;  %1866 = vmatpush.msra.mxu1 %v5986_v61  ;;  %v5993_v48 = vld [vmem:[#allocation42_spill] sm:$0xff] }
 0x404   :  { %1807 = vmatpush.msrb.mxu2 %v5987_v17  ;;  %1827 = vmatpush.msrb.mxu3 %v5988_v6 }
 0x405   :  { %1847 = vmatpush.msra.mxu0 %v5989_v51  ;;  %1867 = vmatpush.msra.mxu1 %v5990_v60 }
 0x462   :  { %v1552_v9 = vpop.f32.mrf.mxu1 }
 0x463   :  { %v1558_v47 = vadd.f32 %v1552_v9, %v5991_v18  ;;  %v5994_v18 = vld [vmem:[#allocation49_spill] sm:$0xff] }
 0x465   :  { %v3197_v59 = vmul.f32 -1.442695, %v1558_v47  ;;  %v1532_v47 = vpop.f32.mrf.mxu0 }
 0x467   :  { %3301 = vpow2.f32 %v3197_v59  ;;  %v1492_v12 = vpop.f32.mrf.mxu2  ;;  %v1512_v1 = vpop.f32.mrf.mxu3 }
 0x468   :  { %v1555_v7 = vadd.f32 %v1492_v12, %v5992_v38  ;;  %v1556_v56 = vadd.f32 %v1512_v1, %v5993_v48  ;;  %v1557_v12 = vadd.f32 %v1532_v47, %v5994_v18 }
 0x46a   :  { %v3195_v61 = vmul.f32 -1.442695, %v1555_v7  ;;  %v3196_v24 = vmul.f32 -1.442695, %v1556_v56 }
 0x46c   :  { %3303 = vpow2.f32 %v3195_v61 }
 0x46d   :  { %v3302_v17 = vpop.eup %3301  ;;  %3305 = vpow2.f32 %v3196_v24 }
 0x46e   :  { %v1601_v6 = vadd.f32 1.0, %v3302_v17 }
 0x470   :  { %3307 = vrcp.f32 %v1601_v6  ;;  %vm1607_vm9 = vweird.f32 %v1601_v6 }
 0x472   :  { %v3304_v51 = vpop.eup %3303 }
 0x473   :  { %v3306_v5 = vpop.eup %3305  ;;  %v1562_v60 = vadd.f32 1.0, %v3304_v51 }
 0x474   :  { %v1581_v52 = vadd.f32 1.0, %v3306_v5 }
 0x475   :  { %3309 = vrcp.f32 %v1562_v60  ;;  %v1574_v24 = vand.u32 2147483648, %v1562_v60  ;;  %v1572_v51 = vand.u32 2147483647, %v1562_v60  ;;  %vm1568_vm2 = vweird.f32 %v1562_v60 }
 0x476   :  { %3311 = vrcp.f32 %v1581_v52  ;;  %v3308_v9 = vpop.eup %3307  ;;  %v1593_v27 = vand.u32 2147483648, %v1581_v52  ;;  %v1591_v21 = vand.u32 2147483647, %v1581_v52  ;;  %vm1587_vm4 = vweird.f32 %v1581_v52 }
 0x477   :  { %v1603_v56 = vmul.f32 %v3308_v9, %v1601_v6  ;;  %3313 = vtanh.f32 %v1557_v12  ;;  %v1575_v47 = vor.u32 1.1754944e-38, %v1574_v24  ;;  %vm1573_vm5 = vcmp.eq.f32.partialorder %v1572_v51, 8.507059e+37 }
 0x478   :  { %v1594_v12 = vor.u32 1.1754944e-38, %v1593_v27  ;;  %vm1592_vm7 = vcmp.eq.f32.partialorder %v1591_v21, 8.507059e+37  ;;  %vm1608_vm8 = vweird.f32 %v3308_v9  ;;  %v1613_v24 = vand.u32 2147483648, %v1601_v6 }
 0x479   :  { %v1604_v11 = vsub.f32 1.0, %v1603_v56  ;;  %vm1609_vm10 = vmor %vm1607_vm9, %vm1608_vm8 }
 0x47b   :  { %v3310_v59 = vpop.eup %3309 }
 0x47c   :  { %v3312_v38 = vpop.eup %3311  ;;  %v1564_v1 = vmul.f32 %v3310_v59, %v1562_v60  ;;  %vm1569_vm0 = vweird.f32 %v3310_v59 }
 0x47d   :  { %v1583_v7 = vmul.f32 %v3312_v38, %v1581_v52  ;;  %vm1588_vm1 = vweird.f32 %v3312_v38  ;;  %vm1570_vm3 = vmor %vm1568_vm2, %vm1569_vm0 }
 0x47e   :  { %v1565_v61 = vsub.f32 1.0, %v1564_v1  ;;  %vm1589_vm6 = vmor %vm1587_vm4, %vm1588_vm1  ;;  %v3314_v1 = vpop.eup %3313 }
 0x47f   :  { %v1584_v17 = vsub.f32 1.0, %v1583_v7 }
 0x480   :  { %v1566_v48 = vmul.f32 %v3310_v59, %v1565_v61 }
 0x481   :  { %v1585_v5 = vmul.f32 %v3312_v38, %v1584_v17  ;;  %v1605_v17 = vmul.f32 %v3308_v9, %v1604_v11 }
 0x482   :  { %v1567_v42 = vadd.f32 %v3310_v59, %v1566_v48 }
 0x483   :  { %v1586_v18 = vadd.f32 %v3312_v38, %v1585_v5  ;;  %v1606_v60 = vadd.f32 %v3308_v9, %v1605_v17 }
 0x484   :  { %v1571_v8 = vsel %vm1570_vm3, %v3310_v59, %v1567_v42  ;;  %v1611_v42 = vand.u32 2147483647, %v1601_v6 }
 0x485   :  { %v1576_v7 = vsel %vm1573_vm5, %v1575_v47, %v1571_v8  ;;  %v1590_v61 = vsel %vm1589_vm6, %v3312_v38, %v1586_v18  ;;  %v1610_v27 = vsel %vm1609_vm10, %v3308_v9, %v1606_v60  ;;  %v1614_v8 = vor.u32 1.1754944e-38, %v1613_v24 }
 0x486   :  { %v1621_v62 = vmul.f32 %v3314_v1, %v1576_v7  ;;  %v1595_v45 = vsel %vm1592_vm7, %v1594_v12, %v1590_v61  ;;  %vm1612_vm11 = vcmp.eq.f32.partialorder %v1611_v42, 8.507059e+37 }
 0x487   :  { %v1620_v56 = vmul.f32 %v1618_v46, %v1595_v45  ;;  %v1615_v52 = vsel %vm1612_vm11, %v1614_v8, %v1610_v27  ;;  %v6024_v45 = vld [vmem:[#allocation43_spill] sm:$0xff]  ;;  %v6025_v46 = vld [vmem:[#allocation42_spill] sm:$0xff] }
 0x489   :  { %v4755_v48 = vadd.f32 %v1621_v62, %v1620_v56  ;;  %v6026_v56 = vld [vmem:[#allocation49_spill] sm:$0xff] }
 0x48b   :  { %3315 = vtanh.f32 %v4755_v48 }
 0x491   :  { %v3316_v21 = vpop.eup %3315 }
 0x492   :  { %v1624_v44 = vmul.f32 %v3316_v21, %v1615_v52 }
 0x494   :  { %v4759_v11 = vadd.f32 %v1624_v44, %v4684_v2  ;;  %1642 = vmatmul.f32.vlgmr.msra.gmra.mxu2 %v1624_v44  ;;  %1662 = vmatmul.f32.vlgmr.msra.gmra.mxu3 %v1624_v44 }
 0x495   :  { %1682 = vmatmul.f32.vlgmr.msrb.gmra.mxu0 %v1624_v44  ;;  %1702 = vmatmul.f32.vlgmr.msrb.gmra.mxu1 %v1624_v44 }
 0x496   :  { %1958 = vmatpush.msra.mxu2 %v4407_v37  ;;  %1978 = vmatpush.msra.mxu3 %v4410_v57  ;;  %v5995_v37 = vld [vmem:[#allocation13_spill] sm:$0xff]  ;;  %v5996_v57 = vld [vmem:[#allocation14_spill] sm:$0xff] }
 0x497   :  { %1998 = vmatpush.msrb.mxu0 %v4413_v63  ;;  %2018 = vmatpush.msrb.mxu1 %v4416_v15  ;;  %v5997_v63 = vld [vmem:[#allocation15_spill] sm:$0xff]  ;;  %v5998_v15 = vld [vmem:[#allocation16_spill] sm:$0xff] }
 0x498   :  { %1959 = vmatpush.msra.mxu2 %v4419_v53  ;;  %1979 = vmatpush.msra.mxu3 %v4422_v50  ;;  %v5999_v53 = vld [vmem:[#allocation17_spill] sm:$0xff]  ;;  %v6000_v50 = vld [vmem:[#allocation18_spill] sm:$0xff] }
 0x499   :  { %1999 = vmatpush.msrb.mxu0 %v4425_v33  ;;  %2019 = vmatpush.msrb.mxu1 %v4428_v29  ;;  %v6001_v33 = vld [vmem:[#allocation19_spill] sm:$0xff]  ;;  %v6002_v29 = vld [vmem:[#allocation20_spill] sm:$0xff] }
 0x49a   :  { %1960 = vmatpush.msra.mxu2 %v4431_v49  ;;  %1980 = vmatpush.msra.mxu3 %v4434_v34  ;;  %v6003_v49 = vld [vmem:[#allocation21_spill] sm:$0xff]  ;;  %v6004_v34 = vld [vmem:[#allocation22_spill] sm:$0xff] }
 0x49b   :  { %2000 = vmatpush.msrb.mxu0 %v4437_v23  ;;  %2020 = vmatpush.msrb.mxu1 %v4440_v55  ;;  %v6005_v23 = vld [vmem:[#allocation23_spill] sm:$0xff]  ;;  %v6006_v55 = vld [vmem:[#allocation24_spill] sm:$0xff] }
 0x49c   :  { %1961 = vmatpush.msra.mxu2 %v4443_v30  ;;  %1981 = vmatpush.msra.mxu3 %v4446_v4  ;;  %v6007_v30 = vld [vmem:[#allocation25_spill] sm:$0xff]  ;;  %v6008_v4 = vld [vmem:[#allocation26_spill] sm:$0xff] }
 0x49d   :  { %2001 = vmatpush.msrb.mxu0 %v4449_v54  ;;  %2021 = vmatpush.msrb.mxu1 %v4452_v3  ;;  %v6009_v54 = vld [vmem:[#allocation27_spill] sm:$0xff]  ;;  %v6010_v3 = vld [vmem:[#allocation28_spill] sm:$0xff] }
 0x49e   :  { %1962 = vmatpush.msra.mxu2 %v4455_v26  ;;  %1982 = vmatpush.msra.mxu3 %v4458_v58  ;;  %v6011_v26 = vld [vmem:[#allocation29_spill] sm:$0xff]  ;;  %v6012_v58 = vld [vmem:[#allocation30_spill] sm:$0xff] }
 0x49f   :  { %2002 = vmatpush.msrb.mxu0 %v4461_v0  ;;  %2022 = vmatpush.msrb.mxu1 %v4464_v20  ;;  %v6013_v0 = vld [vmem:[#allocation31_spill] sm:$0xff]  ;;  %v6014_v20 = vld [vmem:[#allocation32_spill] sm:$0xff] }
 0x4a0   :  { %1963 = vmatpush.msra.mxu2 %v4467_v13  ;;  %1983 = vmatpush.msra.mxu3 %v4470_v14  ;;  %v6015_v13 = vld [vmem:[#allocation33_spill] sm:$0xff]  ;;  %v6016_v14 = vld [vmem:[#allocation34_spill] sm:$0xff] }
 0x4a1   :  { %2003 = vmatpush.msrb.mxu0 %v4473_v43  ;;  %2023 = vmatpush.msrb.mxu1 %v4476_v16  ;;  %v6017_v43 = vld [vmem:[#allocation35_spill] sm:$0xff]  ;;  %v6018_v16 = vld [vmem:[#allocation36_spill] sm:$0xff] }
 0x4a2   :  { %1964 = vmatpush.msra.mxu2 %v4479_v19  ;;  %1984 = vmatpush.msra.mxu3 %v4482_v22  ;;  %v6019_v19 = vld [vmem:[#allocation37_spill] sm:$0xff]  ;;  %v6020_v22 = vld [vmem:[#allocation38_spill] sm:$0xff] }
 0x4a3   :  { %2004 = vmatpush.msrb.mxu0 %v4485_v25  ;;  %2024 = vmatpush.msrb.mxu1 %v4488_v28  ;;  %v6021_v25 = vld [vmem:[#allocation39_spill] sm:$0xff]  ;;  %v6022_v28 = vld [vmem:[#allocation40_spill] sm:$0xff] }
 0x4a4   :  { %1965 = vmatpush.msra.mxu2 %v4491_v31  ;;  %1985 = vmatpush.msra.mxu3 %v4494_v32 }
 0x4a5   :  { %2005 = vmatpush.msrb.mxu0 %v4497_v35  ;;  %2025 = vmatpush.msrb.mxu1 %v4500_v36  ;;  %v6023_v35 = vld [vmem:[#allocation48_spill] sm:$0xff] }
 0x4a6   :  { %1966 = vmatpush.msra.mxu2 %v4503_v39  ;;  %1986 = vmatpush.msra.mxu3 %v4506_v40 }
 0x4a7   :  { %2006 = vmatpush.msrb.mxu0 %v4509_v41  ;;  %2026 = vmatpush.msrb.mxu1 %v5930_v10 }
 0x4a8   :  { %1967 = vmatpush.msra.mxu2 %v5995_v37  ;;  %1987 = vmatpush.msra.mxu3 %v5996_v57 }
 0x4a9   :  { %2007 = vmatpush.msrb.mxu0 %v5997_v63  ;;  %2027 = vmatpush.msrb.mxu1 %v5998_v15 }
 0x4aa   :  { %1968 = vmatpush.msra.mxu2 %v5999_v53  ;;  %1988 = vmatpush.msra.mxu3 %v6000_v50 }
 0x4ab   :  { %2008 = vmatpush.msrb.mxu0 %v6001_v33  ;;  %2028 = vmatpush.msrb.mxu1 %v6002_v29 }
 0x4ac   :  { %1969 = vmatpush.msra.mxu2 %v6003_v49  ;;  %1989 = vmatpush.msra.mxu3 %v6004_v34 }
 0x4ad   :  { %2009 = vmatpush.msrb.mxu0 %v6005_v23  ;;  %2029 = vmatpush.msrb.mxu1 %v6006_v55 }
 0x4ae   :  { %1970 = vmatpush.msra.mxu2 %v6007_v30  ;;  %1990 = vmatpush.msra.mxu3 %v6008_v4  ;;  %v1781_v30 = vrot.slane %v4755_v48, 6 }
 0x4af   :  { %2010 = vmatpush.msrb.mxu0 %v6009_v54  ;;  %2030 = vmatpush.msrb.mxu1 %v6010_v3 }
 0x4b0   :  { %1971 = vmatpush.msra.mxu2 %v6011_v26  ;;  %1991 = vmatpush.msra.mxu3 %v6012_v58 }
 0x4b1   :  { %2011 = vmatpush.msrb.mxu0 %v6013_v0  ;;  %2031 = vmatpush.msrb.mxu1 %v6014_v20 }
 0x4b2   :  { %1972 = vmatpush.msra.mxu2 %v6015_v13  ;;  %1992 = vmatpush.msra.mxu3 %v6016_v14 }
 0x4b3   :  { %2012 = vmatpush.msrb.mxu0 %v6017_v43  ;;  %2032 = vmatpush.msrb.mxu1 %v6018_v16 }
 0x4b4   :  { %1973 = vmatpush.msra.mxu2 %v6019_v19  ;;  %1993 = vmatpush.msra.mxu3 %v6020_v22 }
 0x4b5   :  { %2013 = vmatpush.msrb.mxu0 %v6021_v25  ;;  %2033 = vmatpush.msrb.mxu1 %v6022_v28 }
 0x512   :  { %v1703_v31 = vpop.f32.mrf.mxu1  ;;  %v1683_v12 = vpop.f32.mrf.mxu0 }
 0x513   :  { %v1713_v32 = vrot.slane %v1703_v31, 6  ;;  %v1712_v7 = vrot.slane %v1683_v12, 6  ;;  %v4863_v12 = vld [vmem:[#allocation7 + $0x1a8] sm:$0xff] }
 0x515   :  { %v1721_v36 = vadd.f32 %v1713_v32, %v6023_v35  ;;  %v1720_v60 = vadd.f32 %v1712_v7, %v6026_v56  ;;  %v4869_v7 = vld [vmem:[#allocation7 + $0x1b8] sm:$0xff] }
 0x517   :  { %v3200_v39 = vmul.f32 -1.442695, %v1721_v36  ;;  %v1643_v40 = vpop.f32.mrf.mxu2  ;;  %v1663_v41 = vpop.f32.mrf.mxu3 }
 0x518   :  { %v1710_v10 = vrot.slane %v1643_v40, 6  ;;  %v1711_v2 = vrot.slane %v1663_v41, 6 }
 0x519   :  { %3317 = vpow2.f32 %v3200_v39 }
 0x51a   :  { %v1718_v62 = vadd.f32 %v1710_v10, %v6024_v45  ;;  %v1719_v18 = vadd.f32 %v1711_v2, %v6025_v46 }
 0x51c   :  { %v3198_v38 = vmul.f32 -1.442695, %v1718_v62  ;;  %v3199_v6 = vmul.f32 -1.442695, %v1719_v18  ;;  %v4836_v18 = vld [vmem:[#allocation7 + $0x1e0] sm:$0xff] }
 0x51e   :  { %3319 = vpow2.f32 %v3198_v38  ;;  %v4839_v38 = vld [vmem:[#allocation7 + $0x1e8] sm:$0xff] }
 0x51f   :  { %v3318_v9 = vpop.eup %3317  ;;  %3321 = vpow2.f32 %v3199_v6  ;;  %v4842_v6 = vld [vmem:[#allocation7 + $0x1f0] sm:$0xff] }
 0x520   :  { %v1764_v59 = vadd.f32 1.0, %v3318_v9  ;;  %v4845_v9 = vld [vmem:[#allocation7 + $0x1f8] sm:$0xff] }
 0x522   :  { %3323 = vrcp.f32 %v1764_v59  ;;  %v1776_v32 = vand.u32 2147483648, %v1764_v59  ;;  %vm1770_vm5 = vweird.f32 %v1764_v59  ;;  %v1774_v36 = vand.u32 2147483647, %v1764_v59 }
 0x524   :  { %v3320_v51 = vpop.eup %3319  ;;  %v1777_v40 = vor.u32 1.1754944e-38, %v1776_v32  ;;  %vm1775_vm7 = vcmp.eq.f32.partialorder %v1774_v36, 8.507059e+37  ;;  %v4962_v32 = vld [vmem:[#allocation7 + $0xb0] sm:$0xff]  ;;  %v4965_v36 = vld [vmem:[#allocation7 + $0xb8] sm:$0xff] }
 0x525   :  { %v3322_v5 = vpop.eup %3321  ;;  %v1725_v47 = vadd.f32 1.0, %v3320_v51  ;;  %v4854_v51 = vld [vmem:[#allocation7 + $0x1d0] sm:$0xff]  ;;  %6033 = vst [vmem:[#allocation13_spill] sm:$0xff] %v4962_v32 }
 0x526   :  { %v1744_v1 = vadd.f32 1.0, %v3322_v5  ;;  %v4857_v5 = vld [vmem:[#allocation7 + $0x1d8] sm:$0xff]  ;;  %6034 = vst [vmem:[#allocation14_spill] sm:$0xff] %v4965_v36 }
 0x527   :  { %3325 = vrcp.f32 %v1725_v47  ;;  %v1737_v52 = vand.u32 2147483648, %v1725_v47  ;;  %v1735_v57 = vand.u32 2147483647, %v1725_v47  ;;  %vm1731_vm14 = vweird.f32 %v1725_v47 }
 0x528   :  { %3327 = vrcp.f32 %v1744_v1  ;;  %v3324_v61 = vpop.eup %3323  ;;  %v1756_v63 = vand.u32 2147483648, %v1744_v1  ;;  %v1754_v53 = vand.u32 2147483647, %v1744_v1  ;;  %vm1750_vm0 = vweird.f32 %v1744_v1 }
 0x529   :  { %v1766_v8 = vmul.f32 %v3324_v61, %v1764_v59  ;;  %3329 = vtanh.f32 %v1720_v60  ;;  %v1738_v29 = vor.u32 1.1754944e-38, %v1737_v52  ;;  %vm1736_vm1 = vcmp.eq.f32.partialorder %v1735_v57, 8.507059e+37  ;;  %v4851_v59 = vld [vmem:[#allocation7 + $0x1c8] sm:$0xff]  ;;  %v4878_v60 = vld [vmem:[#allocation7 + $0x190] sm:$0xff]  ;;  %v4896_v52 = vld [vmem:[#allocation7 + $0x140] sm:$0xff] }
 0x52a   :  { %v1757_v23 = vor.u32 1.1754944e-38, %v1756_v63  ;;  %vm1755_vm3 = vcmp.eq.f32.partialorder %v1754_v53, 8.507059e+37  ;;  %vm1771_vm4 = vweird.f32 %v3324_v61  ;;  %v4905_v57 = vld [vmem:[#allocation7 + $0x158] sm:$0xff]  ;;  %v4908_v63 = vld [vmem:[#allocation7 + $0x120] sm:$0xff]  ;;  %v4914_v53 = vld [vmem:[#allocation7 + $0x130] sm:$0xff] }
 0x52b   :  { %v1767_v50 = vsub.f32 1.0, %v1766_v8  ;;  %vm1772_vm6 = vmor %vm1770_vm5, %vm1771_vm4  ;;  %v4890_v8 = vld [vmem:[#allocation7 + $0x170] sm:$0xff] }
 0x52d   :  { %v3326_v17 = vpop.eup %3325  ;;  %v1768_v3 = vmul.f32 %v3324_v61, %v1767_v50  ;;  %v4917_v50 = vld [vmem:[#allocation7 + $0x138] sm:$0xff] }
 0x52e   :  { %v3328_v24 = vpop.eup %3327  ;;  %v1727_v42 = vmul.f32 %v3326_v17, %v1725_v47  ;;  %vm1732_vm12 = vweird.f32 %v3326_v17  ;;  %v4860_v47 = vld [vmem:[#allocation7 + $0x1a0] sm:$0xff] }
 0x52f   :  { %v1746_v27 = vmul.f32 %v3328_v24, %v1744_v1  ;;  %vm1751_vm13 = vweird.f32 %v3328_v24  ;;  %vm1733_vm15 = vmor %vm1731_vm14, %vm1732_vm12  ;;  %v3330_v55 = vpop.eup %3329  ;;  %v1769_v31 = vadd.f32 %v3324_v61, %v1768_v3  ;;  %v4866_v1 = vld [vmem:[#allocation7 + $0x1b0] sm:$0xff]  ;;  %v4947_v3 = vld [vmem:[#allocation7 + $0xc8] sm:$0xff] }
 0x530   :  { %v1728_v21 = vsub.f32 1.0, %v1727_v42  ;;  %vm1752_vm2 = vmor %vm1750_vm0, %vm1751_vm13  ;;  %v4884_v42 = vld [vmem:[#allocation7 + $0x160] sm:$0xff]  ;;  %6028 = vst [vmem:[#allocation12_spill] sm:$0xff] %v4947_v3 }
 0x531   :  { %v1747_v44 = vsub.f32 1.0, %v1746_v27  ;;  %v1773_v39 = vsel %vm1772_vm6, %v3324_v61, %v1769_v31  ;;  %v4872_v61 = vld [vmem:[#allocation7 + $0x180] sm:$0xff]  ;;  %v4887_v27 = vld [vmem:[#allocation7 + $0x168] sm:$0xff] }
 0x532   :  { %v1729_v37 = vmul.f32 %v3326_v17, %v1728_v21  ;;  %v1778_v41 = vsel %vm1775_vm7, %v1777_v40, %v1773_v39  ;;  %v4893_v21 = vld [vmem:[#allocation7 + $0x178] sm:$0xff]  ;;  %v4959_v31 = vld [vmem:[#allocation7 + $0xa8] sm:$0xff]  ;;  %v4968_v39 = vld [vmem:[#allocation7 + $0x80] sm:$0xff] }
 0x533   :  { %v1748_v15 = vmul.f32 %v3328_v24, %v1747_v44  ;;  %v4899_v44 = vld [vmem:[#allocation7 + $0x148] sm:$0xff]  ;;  %6032 = vst [vmem:[#allocation57_spill] sm:$0xff] %v4959_v31 }
 0x534   :  { %v1730_v33 = vadd.f32 %v3326_v17, %v1729_v37  ;;  %v4902_v37 = vld [vmem:[#allocation7 + $0x150] sm:$0xff]  ;;  %6035 = vst [vmem:[#allocation15_spill] sm:$0xff] %v4968_v39  ;;  %v4971_v40 = vld [vmem:[#allocation7 + $0x88] sm:$0xff] }
 0x535   :  { %v1749_v49 = vadd.f32 %v3328_v24, %v1748_v15  ;;  %v4911_v15 = vld [vmem:[#allocation7 + $0x128] sm:$0xff]  ;;  %6036 = vst [vmem:[#allocation16_spill] sm:$0xff] %v4971_v40 }
 0x536   :  { %v1734_v34 = vsel %vm1733_vm15, %v3326_v17, %v1730_v33  ;;  %v4875_v17 = vld [vmem:[#allocation7 + $0x188] sm:$0xff]  ;;  %v4920_v33 = vld [vmem:[#allocation7 + $0x100] sm:$0xff] }
 0x537   :  { %v1739_v4 = vsel %vm1736_vm1, %v1738_v29, %v1734_v34  ;;  %v1753_v54 = vsel %vm1752_vm2, %v3328_v24, %v1749_v49  ;;  %v4881_v24 = vld [vmem:[#allocation7 + $0x198] sm:$0xff]  ;;  %v4923_v29 = vld [vmem:[#allocation7 + $0x108] sm:$0xff]  ;;  %v4926_v49 = vld [vmem:[#allocation7 + $0x110] sm:$0xff] }
 0x538   :  { %v1784_v26 = vmul.f32 %v3330_v55, %v1739_v4  ;;  %v1758_v58 = vsel %vm1755_vm3, %v1757_v23, %v1753_v54  ;;  %v4929_v34 = vld [vmem:[#allocation7 + $0x118] sm:$0xff]  ;;  %v4932_v23 = vld [vmem:[#allocation7 + $0xe0] sm:$0xff]  ;;  %v4935_v55 = vld [vmem:[#allocation7 + $0xe8] sm:$0xff] }
 0x539   :  { %v1783_v0 = vmul.f32 %v1781_v30, %v1758_v58  ;;  %v4938_v30 = vld [vmem:[#allocation7 + $0xf0] sm:$0xff]  ;;  %v4941_v4 = vld [vmem:[#allocation7 + $0xf8] sm:$0xff]  ;;  %v4944_v54 = vld [vmem:[#allocation7 + $0xc0] sm:$0xff] }
 0x53a   :  { %6027 = vst [vmem:[#allocation41_spill] sm:$0xff] %v4944_v54  ;;  %v4953_v58 = vld [vmem:[#allocation7 + $0xd8] sm:$0xff] }
 0x53b   :  { %v4830_v20 = vadd.f32 %v1784_v26, %v1783_v0  ;;  %v4950_v26 = vld [vmem:[#allocation7 + $0xd0] sm:$0xff]  ;;  %6030 = vst [vmem:[#allocation56_spill] sm:$0xff] %v4953_v58  ;;  %v4956_v0 = vld [vmem:[#allocation7 + $0xa0] sm:$0xff] }
 0x53c   :  { %6029 = vst [vmem:[#allocation53_spill] sm:$0xff] %v4950_v26 }
 0x53d   :  { %3331 = vtanh.f32 %v4830_v20  ;;  %6031 = vst [vmem:[#allocation55_spill] sm:$0xff] %v4956_v0 }
 0x543   :  { %v3332_v48 = vpop.eup %3331 }
 0x544   :  { %v1787_v10 = vmul.f32 %v3332_v48, %v1778_v41  ;;  %v4974_v48 = vld [vmem:[#allocation7 + $0x90] sm:$0xff]  ;;  %v4977_v41 = vld [vmem:[#allocation7 + $0x98] sm:$0xff] }
 0x545   :  { %6037 = vst [vmem:[#allocation17_spill] sm:$0xff] %v4974_v48 }
 0x546   :  { %v1789_v2 = vrot.slane %v1787_v10, 2  ;;  %6038 = vst [vmem:[#allocation18_spill] sm:$0xff] %v4977_v41  ;;  %v4980_v10 = vld [vmem:[#allocation7 + $0x60] sm:$0xff] }
 0x547   :  { %6039 = vst [vmem:[#allocation19_spill] sm:$0xff] %v4980_v10 }
 0x548   :  { %v4834_v62 = vadd.f32 %v1789_v2, %v4759_v11  ;;  %1808 = vmatmul.f32.vlgmr.msrb.gmra.mxu2 %v1789_v2  ;;  %1828 = vmatmul.f32.vlgmr.msrb.gmra.mxu3 %v1789_v2  ;;  %v4848_v11 = vld [vmem:[#allocation7 + $0x1c0] sm:$0xff] }
 0x549   :  { %1848 = vmatmul.f32.vlgmr.msra.gmra.mxu0 %v1789_v2  ;;  %1868 = vmatmul.f32.vlgmr.msra.gmra.mxu1 %v1789_v2  ;;  %v4983_v2 = vld [vmem:[#allocation7 + $0x68] sm:$0xff] }
 0x54a   :  { %2124 = vmatpush.msrb.mxu2 %v4836_v18  ;;  %2144 = vmatpush.msrb.mxu3 %v4839_v38  ;;  %6040 = vst [vmem:[#allocation20_spill] sm:$0xff] %v4983_v2 }
 0x54b   :  { %2164 = vmatpush.msra.mxu0 %v4842_v6  ;;  %2184 = vmatpush.msra.mxu1 %v4845_v9 }
 0x54c   :  { %2125 = vmatpush.msrb.mxu2 %v4848_v11  ;;  %2145 = vmatpush.msrb.mxu3 %v4851_v59 }
 0x54d   :  { %2165 = vmatpush.msra.mxu0 %v4854_v51  ;;  %2185 = vmatpush.msra.mxu1 %v4857_v5 }
 0x54e   :  { %2126 = vmatpush.msrb.mxu2 %v4860_v47  ;;  %2146 = vmatpush.msrb.mxu3 %v4863_v12 }
 0x54f   :  { %2166 = vmatpush.msra.mxu0 %v4866_v1  ;;  %2186 = vmatpush.msra.mxu1 %v4869_v7 }
 0x550   :  { %2127 = vmatpush.msrb.mxu2 %v4872_v61  ;;  %2147 = vmatpush.msrb.mxu3 %v4875_v17 }
 0x551   :  { %2167 = vmatpush.msra.mxu0 %v4878_v60  ;;  %2187 = vmatpush.msra.mxu1 %v4881_v24 }
 0x552   :  { %2128 = vmatpush.msrb.mxu2 %v4884_v42  ;;  %2148 = vmatpush.msrb.mxu3 %v4887_v27 }
 0x553   :  { %2168 = vmatpush.msra.mxu0 %v4890_v8  ;;  %2188 = vmatpush.msra.mxu1 %v4893_v21 }
 0x554   :  { %2129 = vmatpush.msrb.mxu2 %v4896_v52  ;;  %2149 = vmatpush.msrb.mxu3 %v4899_v44 }
 0x555   :  { %2169 = vmatpush.msra.mxu0 %v4902_v37  ;;  %2189 = vmatpush.msra.mxu1 %v4905_v57 }
 0x556   :  { %2130 = vmatpush.msrb.mxu2 %v4908_v63  ;;  %2150 = vmatpush.msrb.mxu3 %v4911_v15 }
 0x557   :  { %2170 = vmatpush.msra.mxu0 %v4914_v53  ;;  %2190 = vmatpush.msra.mxu1 %v4917_v50 }
 0x558   :  { %2131 = vmatpush.msrb.mxu2 %v4920_v33  ;;  %2151 = vmatpush.msrb.mxu3 %v4923_v29 }
 0x559   :  { %2171 = vmatpush.msra.mxu0 %v4926_v49  ;;  %2191 = vmatpush.msra.mxu1 %v4929_v34 }
 0x55a   :  { %2132 = vmatpush.msrb.mxu2 %v4932_v23  ;;  %2152 = vmatpush.msrb.mxu3 %v4935_v55 }
 0x55b   :  { %2172 = vmatpush.msra.mxu0 %v4938_v30  ;;  %2192 = vmatpush.msra.mxu1 %v4941_v4 }
 0x55c   :  { %2133 = vmatpush.msrb.mxu2 %v4944_v54  ;;  %2153 = vmatpush.msrb.mxu3 %v4947_v3 }
 0x55d   :  { %2173 = vmatpush.msra.mxu0 %v4950_v26  ;;  %2193 = vmatpush.msra.mxu1 %v4953_v58  ;;  %v1947_v26 = vrot.slane %v4830_v20, 6 }
 0x55e   :  { %2134 = vmatpush.msrb.mxu2 %v4956_v0  ;;  %2154 = vmatpush.msrb.mxu3 %v4959_v31 }
 0x55f   :  { %2174 = vmatpush.msra.mxu0 %v4962_v32  ;;  %2194 = vmatpush.msra.mxu1 %v4965_v36 }
 0x560   :  { %2135 = vmatpush.msrb.mxu2 %v4968_v39  ;;  %2155 = vmatpush.msrb.mxu3 %v4971_v40  ;;  %v4986_v39 = vld [vmem:[#allocation7 + $0x70] sm:$0xff]  ;;  %v4989_v40 = vld [vmem:[#allocation7 + $0x78] sm:$0xff] }
 0x561   :  { %2175 = vmatpush.msra.mxu0 %v4974_v48  ;;  %2195 = vmatpush.msra.mxu1 %v4977_v41  ;;  %6041 = vst [vmem:[#allocation21_spill] sm:$0xff] %v4986_v39  ;;  %v4992_v48 = vld [vmem:[#allocation7 + $0x40] sm:$0xff]  ;;  %v4995_v41 = vld [vmem:[#allocation7 + $0x48] sm:$0xff] }
 0x562   :  { %2136 = vmatpush.msrb.mxu2 %v4980_v10  ;;  %2156 = vmatpush.msrb.mxu3 %v4983_v2  ;;  %6042 = vst [vmem:[#allocation22_spill] sm:$0xff] %v4989_v40  ;;  %v4998_v10 = vld [vmem:[#allocation7 + $0x50] sm:$0xff]  ;;  %v5001_v2 = vld [vmem:[#allocation7 + $0x58] sm:$0xff] }
 0x563   :  { %2176 = vmatpush.msra.mxu0 %v4986_v39  ;;  %2196 = vmatpush.msra.mxu1 %v4989_v40  ;;  %6043 = vst [vmem:[#allocation23_spill] sm:$0xff] %v4992_v48 }
 0x564   :  { %2137 = vmatpush.msrb.mxu2 %v4992_v48  ;;  %6044 = vst [vmem:[#allocation24_spill] sm:$0xff] %v4995_v41  ;;  %2157 = vmatpush.msrb.mxu3 %v4995_v41 }
 0x565   :  { %6045 = vst [vmem:[#allocation25_spill] sm:$0xff] %v4998_v10  ;;  %2177 = vmatpush.msra.mxu0 %v4998_v10  ;;  %2197 = vmatpush.msra.mxu1 %v5001_v2 }
 0x566   :  { %6046 = vst [vmem:[#allocation26_spill] sm:$0xff] %v5001_v2  ;;  %2138 = vmatpush.msrb.mxu2 %v6015_v13  ;;  %2158 = vmatpush.msrb.mxu3 %v6016_v14 }
 0x567   :  { %2178 = vmatpush.msra.mxu0 %v6017_v43  ;;  %2198 = vmatpush.msra.mxu1 %v6018_v16 }
 0x568   :  { %2139 = vmatpush.msrb.mxu2 %v6019_v19  ;;  %2159 = vmatpush.msrb.mxu3 %v6020_v22 }
 0x569   :  { %2179 = vmatpush.msra.mxu0 %v6021_v25  ;;  %2199 = vmatpush.msra.mxu1 %v6022_v28 }
 0x5c6   :  { %v1869_v10 = vpop.f32.mrf.mxu1 }
 0x5c7   :  { %v1879_v41 = vrot.slane %v1869_v10, 4 }
 0x5c9   :  { %v1887_v2 = vadd.f32 %v1879_v41, %v6023_v35  ;;  %v1849_v41 = vpop.f32.mrf.mxu0 }
 0x5cb   :  { %v3203_v48 = vmul.f32 -1.442695, %v1887_v2  ;;  %v1809_v13 = vpop.f32.mrf.mxu2  ;;  %v1829_v40 = vpop.f32.mrf.mxu3 }
 0x5cc   :  { %v1876_v14 = vrot.slane %v1809_v13, 4  ;;  %v1877_v39 = vrot.slane %v1829_v40, 4  ;;  %v1878_v40 = vrot.slane %v1849_v41, 4 }
 0x5cd   :  { %3333 = vpow2.f32 %v3203_v48 }
 0x5ce   :  { %v1884_v43 = vadd.f32 %v1876_v14, %v6024_v45  ;;  %v1885_v16 = vadd.f32 %v1877_v39, %v6025_v46  ;;  %v1886_v14 = vadd.f32 %v1878_v40, %v6026_v56 }
 0x5d0   :  { %v3201_v19 = vmul.f32 -1.442695, %v1884_v43  ;;  %v3202_v22 = vmul.f32 -1.442695, %v1885_v16 }
 0x5d2   :  { %3335 = vpow2.f32 %v3201_v19 }
 0x5d3   :  { %v3334_v25 = vpop.eup %3333  ;;  %3337 = vpow2.f32 %v3202_v22 }
 0x5d4   :  { %v1930_v28 = vadd.f32 1.0, %v3334_v25 }
 0x5d6   :  { %3339 = vrcp.f32 %v1930_v28  ;;  %vm1936_vm1 = vweird.f32 %v1930_v28 }
 0x5d8   :  { %v3336_v36 = vpop.eup %3335 }
 0x5d9   :  { %v3338_v10 = vpop.eup %3337  ;;  %v1891_v32 = vadd.f32 1.0, %v3336_v36 }
 0x5da   :  { %v1910_v2 = vadd.f32 1.0, %v3338_v10 }
 0x5db   :  { %3341 = vrcp.f32 %v1891_v32  ;;  %v1903_v22 = vand.u32 2147483648, %v1891_v32  ;;  %v1901_v36 = vand.u32 2147483647, %v1891_v32  ;;  %vm1897_vm10 = vweird.f32 %v1891_v32 }
 0x5dc   :  { %3343 = vrcp.f32 %v1910_v2  ;;  %v3340_v48 = vpop.eup %3339  ;;  %v1922_v35 = vand.u32 2147483648, %v1910_v2  ;;  %v1920_v31 = vand.u32 2147483647, %v1910_v2  ;;  %vm1916_vm12 = vweird.f32 %v1910_v2 }
 0x5dd   :  { %v1932_v19 = vmul.f32 %v3340_v48, %v1930_v28  ;;  %3345 = vtanh.f32 %v1886_v14  ;;  %v1904_v40 = vor.u32 1.1754944e-38, %v1903_v22  ;;  %vm1902_vm13 = vcmp.eq.f32.partialorder %v1901_v36, 8.507059e+37  ;;  %v6054_v36 = vld [vmem:[#allocation14_spill] sm:$0xff] }
 0x5de   :  { %v1923_v14 = vor.u32 1.1754944e-38, %v1922_v35  ;;  %vm1921_vm15 = vcmp.eq.f32.partialorder %v1920_v31, 8.507059e+37  ;;  %vm1937_vm0 = vweird.f32 %v3340_v48  ;;  %v1942_v22 = vand.u32 2147483648, %v1930_v28 }
 0x5df   :  { %v1933_v41 = vsub.f32 1.0, %v1932_v19  ;;  %vm1938_vm2 = vmor %vm1936_vm1, %vm1937_vm0 }
 0x5e1   :  { %v3342_v13 = vpop.eup %3341 }
 0x5e2   :  { %v3344_v39 = vpop.eup %3343  ;;  %v1893_v43 = vmul.f32 %v3342_v13, %v1891_v32  ;;  %vm1898_vm8 = vweird.f32 %v3342_v13 }
 0x5e3   :  { %v1912_v16 = vmul.f32 %v3344_v39, %v1910_v2  ;;  %vm1917_vm9 = vweird.f32 %v3344_v39  ;;  %vm1899_vm11 = vmor %vm1897_vm10, %vm1898_vm8 }
 0x5e4   :  { %v1894_v46 = vsub.f32 1.0, %v1893_v43  ;;  %vm1918_vm14 = vmor %vm1916_vm12, %vm1917_vm9  ;;  %v3346_v43 = vpop.eup %3345 }
 0x5e5   :  { %v1913_v25 = vsub.f32 1.0, %v1912_v16 }
 0x5e6   :  { %v1895_v45 = vmul.f32 %v3342_v13, %v1894_v46 }
 0x5e7   :  { %v1914_v10 = vmul.f32 %v3344_v39, %v1913_v25  ;;  %v1934_v25 = vmul.f32 %v3340_v48, %v1933_v41  ;;  %v6056_v41 = vld [vmem:[#allocation16_spill] sm:$0xff] }
 0x5e8   :  { %v1896_v0 = vadd.f32 %v3342_v13, %v1895_v45 }
 0x5e9   :  { %v1915_v56 = vadd.f32 %v3344_v39, %v1914_v10  ;;  %v1935_v32 = vadd.f32 %v3340_v48, %v1934_v25  ;;  %v6055_v10 = vld [vmem:[#allocation15_spill] sm:$0xff]  ;;  %v6062_v25 = vld [vmem:[#allocation22_spill] sm:$0xff] }
 0x5ea   :  { %v1900_v58 = vsel %vm1899_vm11, %v3342_v13, %v1896_v0  ;;  %v1940_v0 = vand.u32 2147483647, %v1930_v28  ;;  %v6051_v28 = vld [vmem:[#allocation55_spill] sm:$0xff] }
 0x5eb   :  { %v1905_v16 = vsel %vm1902_vm13, %v1904_v40, %v1900_v58  ;;  %v1919_v46 = vsel %vm1918_vm14, %v3344_v39, %v1915_v56  ;;  %v1939_v35 = vsel %vm1938_vm2, %v3340_v48, %v1935_v32  ;;  %v1943_v58 = vor.u32 1.1754944e-38, %v1942_v22  ;;  %v6052_v48 = vld [vmem:[#allocation57_spill] sm:$0xff]  ;;  %v6064_v32 = vld [vmem:[#allocation24_spill] sm:$0xff] }
 0x5ec   :  { %v1950_v3 = vmul.f32 %v3346_v43, %v1905_v16  ;;  %v1924_v54 = vsel %vm1921_vm15, %v1923_v14, %v1919_v46  ;;  %vm1941_vm3 = vcmp.eq.f32.partialorder %v1940_v0, 8.507059e+37  ;;  %v6053_v39 = vld [vmem:[#allocation13_spill] sm:$0xff]  ;;  %v6058_v14 = vld [vmem:[#allocation18_spill] sm:$0xff]  ;;  %v6059_v43 = vld [vmem:[#allocation19_spill] sm:$0xff] }
 0x5ed   :  { %v1949_v19 = vmul.f32 %v1947_v26, %v1924_v54  ;;  %v1944_v31 = vsel %vm1941_vm3, %v1943_v58, %v1939_v35  ;;  %v6048_v54 = vld [vmem:[#allocation12_spill] sm:$0xff]  ;;  %v6057_v40 = vld [vmem:[#allocation17_spill] sm:$0xff]  ;;  %v6066_v0 = vld [vmem:[#allocation26_spill] sm:$0xff] }
 0x5ee   :  { %v6050_v26 = vld [vmem:[#allocation56_spill] sm:$0xff]  ;;  %v6061_v46 = vld [vmem:[#allocation21_spill] sm:$0xff] }
 0x5ef   :  { %v5017_v45 = vadd.f32 %v1950_v3, %v1949_v19  ;;  %v6049_v3 = vld [vmem:[#allocation53_spill] sm:$0xff]  ;;  %v6060_v16 = vld [vmem:[#allocation20_spill] sm:$0xff]  ;;  %v6063_v19 = vld [vmem:[#allocation23_spill] sm:$0xff] }
 0x5f0   :  { %v6065_v22 = vld [vmem:[#allocation25_spill] sm:$0xff]  ;;  %v5079_v35 = vld [vmem:[#allocation7 + $0x20] sm:$0xff] }
 0x5f1   :  { %3347 = vtanh.f32 %v5017_v45  ;;  %6067 = vst [vmem:[#allocation27_spill] sm:$0xff] %v5079_v35  ;;  %v5082_v58 = vld [vmem:[#allocation7 + $0x28] sm:$0xff] }
 0x5f2   :  { %6068 = vst [vmem:[#allocation28_spill] sm:$0xff] %v5082_v58 }
 0x5f7   :  { %v3348_v56 = vpop.eup %3347 }
 0x5f8   :  { %v1953_v20 = vmul.f32 %v3348_v56, %v1944_v31  ;;  %v5085_v56 = vld [vmem:[#allocation7 + $0x30] sm:$0xff]  ;;  %v5088_v31 = vld [vmem:[#allocation7 + $0x38] sm:$0xff] }
 0x5f9   :  { %6069 = vst [vmem:[#allocation29_spill] sm:$0xff] %v5085_v56 }
 0x5fa   :  { %v1955_v2 = vrot.slane %v1953_v20, 4  ;;  %6070 = vst [vmem:[#allocation30_spill] sm:$0xff] %v5088_v31  ;;  %v5091_v20 = vld [vmem:[#allocation7] sm:$0xff] }
 0x5fb   :  { %6071 = vst [vmem:[#allocation31_spill] sm:$0xff] %v5091_v20 }
 0x5fc   :  { %v5021_v13 = vadd.f32 %v1955_v2, %v4834_v62  ;;  %1974 = vmatmul.f32.vlgmr.msra.gmra.mxu2 %v1955_v2  ;;  %1994 = vmatmul.f32.vlgmr.msra.gmra.mxu3 %v1955_v2  ;;  %v6047_v62 = vld [vmem:[#allocation41_spill] sm:$0xff] }
 0x5fd   :  { %2014 = vmatmul.f32.vlgmr.msrb.gmra.mxu0 %v1955_v2  ;;  %2034 = vmatmul.f32.vlgmr.msrb.gmra.mxu1 %v1955_v2  ;;  %v5094_v2 = vld [vmem:[#allocation7 + $0x8] sm:$0xff] }
 0x5fe   :  { %2275 = vmatpush.msra.mxu2 %v4836_v18  ;;  %2295 = vmatpush.msra.mxu3 %v4839_v38  ;;  %6072 = vst [vmem:[#allocation32_spill] sm:$0xff] %v5094_v2 }
 0x5ff   :  { %2315 = vmatpush.msrb.mxu0 %v4842_v6  ;;  %2335 = vmatpush.msrb.mxu1 %v4845_v9 }
 0x600   :  { %2276 = vmatpush.msra.mxu2 %v4848_v11  ;;  %2296 = vmatpush.msra.mxu3 %v4851_v59 }
 0x601   :  { %2316 = vmatpush.msrb.mxu0 %v4854_v51  ;;  %2336 = vmatpush.msrb.mxu1 %v4857_v5 }
 0x602   :  { %2277 = vmatpush.msra.mxu2 %v4860_v47  ;;  %2297 = vmatpush.msra.mxu3 %v4863_v12 }
 0x603   :  { %2317 = vmatpush.msrb.mxu0 %v4866_v1  ;;  %2337 = vmatpush.msrb.mxu1 %v4869_v7 }
 0x604   :  { %2278 = vmatpush.msra.mxu2 %v4872_v61  ;;  %2298 = vmatpush.msra.mxu3 %v4875_v17 }
 0x605   :  { %2318 = vmatpush.msrb.mxu0 %v4878_v60  ;;  %2338 = vmatpush.msrb.mxu1 %v4881_v24 }
 0x606   :  { %2279 = vmatpush.msra.mxu2 %v4884_v42  ;;  %2299 = vmatpush.msra.mxu3 %v4887_v27 }
 0x607   :  { %2319 = vmatpush.msrb.mxu0 %v4890_v8  ;;  %2339 = vmatpush.msrb.mxu1 %v4893_v21 }
 0x608   :  { %2280 = vmatpush.msra.mxu2 %v4896_v52  ;;  %2300 = vmatpush.msra.mxu3 %v4899_v44 }
 0x609   :  { %2320 = vmatpush.msrb.mxu0 %v4902_v37  ;;  %2340 = vmatpush.msrb.mxu1 %v4905_v57 }
 0x60a   :  { %2281 = vmatpush.msra.mxu2 %v4908_v63  ;;  %2301 = vmatpush.msra.mxu3 %v4911_v15 }
 0x60b   :  { %2321 = vmatpush.msrb.mxu0 %v4914_v53  ;;  %2341 = vmatpush.msrb.mxu1 %v4917_v50 }
 0x60c   :  { %2282 = vmatpush.msra.mxu2 %v4920_v33  ;;  %2302 = vmatpush.msra.mxu3 %v4923_v29 }
 0x60d   :  { %2322 = vmatpush.msrb.mxu0 %v4926_v49  ;;  %2342 = vmatpush.msrb.mxu1 %v4929_v34 }
 0x60e   :  { %2283 = vmatpush.msra.mxu2 %v4932_v23  ;;  %2303 = vmatpush.msra.mxu3 %v4935_v55 }
 0x60f   :  { %2323 = vmatpush.msrb.mxu0 %v4938_v30  ;;  %2343 = vmatpush.msrb.mxu1 %v4941_v4 }
 0x610   :  { %2284 = vmatpush.msra.mxu2 %v6047_v62  ;;  %2304 = vmatpush.msra.mxu3 %v6048_v54 }
 0x611   :  { %2324 = vmatpush.msrb.mxu0 %v6049_v3  ;;  %2344 = vmatpush.msrb.mxu1 %v6050_v26  ;;  %v2113_v3 = vrot.slane %v5017_v45, 6 }
 0x612   :  { %2285 = vmatpush.msra.mxu2 %v6051_v28  ;;  %2305 = vmatpush.msra.mxu3 %v6052_v48 }
 0x613   :  { %2325 = vmatpush.msrb.mxu0 %v6053_v39  ;;  %2345 = vmatpush.msrb.mxu1 %v6054_v36 }
 0x614   :  { %2286 = vmatpush.msra.mxu2 %v6055_v10  ;;  %2306 = vmatpush.msra.mxu3 %v6056_v41 }
 0x615   :  { %2326 = vmatpush.msrb.mxu0 %v6057_v40  ;;  %2346 = vmatpush.msrb.mxu1 %v6058_v14 }
 0x616   :  { %2287 = vmatpush.msra.mxu2 %v6059_v43  ;;  %2307 = vmatpush.msra.mxu3 %v6060_v16  ;;  %v6076_v16 = vld [vmem:[#allocation43_spill] sm:$0xff]  ;;  %v6077_v43 = vld [vmem:[#allocation42_spill] sm:$0xff] }
 0x617   :  { %2327 = vmatpush.msrb.mxu0 %v6061_v46  ;;  %2347 = vmatpush.msrb.mxu1 %v6062_v25 }
 0x618   :  { %2288 = vmatpush.msra.mxu2 %v6063_v19  ;;  %2308 = vmatpush.msra.mxu3 %v6064_v32 }
 0x619   :  { %2328 = vmatpush.msrb.mxu0 %v6065_v22  ;;  %2348 = vmatpush.msrb.mxu1 %v6066_v0  ;;  %v6075_v22 = vld [vmem:[#allocation48_spill] sm:$0xff] }
 0x61a   :  { %2289 = vmatpush.msra.mxu2 %v5079_v35  ;;  %2309 = vmatpush.msra.mxu3 %v5082_v58  ;;  %v5097_v35 = vld [vmem:[#allocation7 + $0x10] sm:$0xff]  ;;  %v5100_v58 = vld [vmem:[#allocation7 + $0x18] sm:$0xff] }
 0x61b   :  { %2329 = vmatpush.msrb.mxu0 %v5085_v56  ;;  %2349 = vmatpush.msrb.mxu1 %v5088_v31  ;;  %6073 = vst [vmem:[#allocation33_spill] sm:$0xff] %v5097_v35 }
 0x61c   :  { %2290 = vmatpush.msra.mxu2 %v5091_v20  ;;  %2310 = vmatpush.msra.mxu3 %v5094_v2  ;;  %6074 = vst [vmem:[#allocation34_spill] sm:$0xff] %v5100_v58 }
 0x61d   :  { %2330 = vmatpush.msrb.mxu0 %v5097_v35  ;;  %2350 = vmatpush.msrb.mxu1 %v5100_v58 }
 0x67a   :  { %v2035_v56 = vpop.f32.mrf.mxu1 }
 0x67b   :  { %v2045_v0 = vrot.slane %v2035_v56, 2 }
 0x67d   :  { %v2053_v31 = vadd.f32 %v2045_v0, %v6075_v22  ;;  %v2015_v22 = vpop.f32.mrf.mxu0 }
 0x67f   :  { %v3206_v32 = vmul.f32 -1.442695, %v2053_v31  ;;  %v1975_v19 = vpop.f32.mrf.mxu2  ;;  %v1995_v25 = vpop.f32.mrf.mxu3 }
 0x680   :  { %v2042_v20 = vrot.slane %v1975_v19, 2  ;;  %v2043_v46 = vrot.slane %v1995_v25, 2  ;;  %v2044_v25 = vrot.slane %v2015_v22, 2 }
 0x681   :  { %3349 = vpow2.f32 %v3206_v32 }
 0x682   :  { %v2050_v2 = vadd.f32 %v2042_v20, %v6076_v16  ;;  %v2051_v14 = vadd.f32 %v2043_v46, %v6077_v43  ;;  %v6078_v16 = vld [vmem:[#allocation49_spill] sm:$0xff] }
 0x683   :  { %v2052_v31 = vadd.f32 %v2044_v25, %v6078_v16 }
 0x684   :  { %v3204_v40 = vmul.f32 -1.442695, %v2050_v2  ;;  %v3205_v35 = vmul.f32 -1.442695, %v2051_v14 }
 0x686   :  { %3351 = vpow2.f32 %v3204_v40 }
 0x687   :  { %v3350_v41 = vpop.eup %3349  ;;  %3353 = vpow2.f32 %v3205_v35 }
 0x688   :  { %v2096_v58 = vadd.f32 1.0, %v3350_v41 }
 0x68a   :  { %3355 = vrcp.f32 %v2096_v58  ;;  %vm2102_vm13 = vweird.f32 %v2096_v58 }
 0x68c   :  { %v3352_v10 = vpop.eup %3351 }
 0x68d   :  { %v3354_v56 = vpop.eup %3353  ;;  %v2057_v36 = vadd.f32 1.0, %v3352_v10 }
 0x68e   :  { %v2076_v0 = vadd.f32 1.0, %v3354_v56 }
 0x68f   :  { %3357 = vrcp.f32 %v2057_v36  ;;  %v2069_v41 = vand.u32 2147483648, %v2057_v36  ;;  %v2067_v10 = vand.u32 2147483647, %v2057_v36  ;;  %vm2063_vm6 = vweird.f32 %v2057_v36 }
 0x690   :  { %3359 = vrcp.f32 %v2076_v0  ;;  %v3356_v19 = vpop.eup %3355  ;;  %v2088_v39 = vand.u32 2147483648, %v2076_v0  ;;  %v2086_v48 = vand.u32 2147483647, %v2076_v0  ;;  %vm2082_vm8 = vweird.f32 %v2076_v0 }
 0x691   :  { %v2098_v40 = vmul.f32 %v3356_v19, %v2096_v58  ;;  %3361 = vtanh.f32 %v2052_v31  ;;  %v2070_v25 = vor.u32 1.1754944e-38, %v2069_v41  ;;  %vm2068_vm9 = vcmp.eq.f32.partialorder %v2067_v10, 8.507059e+37  ;;  %v6085_v10 = vld [vmem:[#allocation13_spill] sm:$0xff] }
 0x692   :  { %v2089_v31 = vor.u32 1.1754944e-38, %v2088_v39  ;;  %vm2087_vm11 = vcmp.eq.f32.partialorder %v2086_v48, 8.507059e+37  ;;  %vm2103_vm12 = vweird.f32 %v3356_v19  ;;  %v2108_v41 = vand.u32 2147483648, %v2096_v58 }
 0x693   :  { %v2099_v22 = vsub.f32 1.0, %v2098_v40  ;;  %vm2104_vm14 = vmor %vm2102_vm13, %vm2103_vm12 }
 0x695   :  { %v3358_v32 = vpop.eup %3357 }
 0x696   :  { %v3360_v43 = vpop.eup %3359  ;;  %v2059_v46 = vmul.f32 %v3358_v32, %v2057_v36  ;;  %vm2064_vm4 = vweird.f32 %v3358_v32 }
 0x697   :  { %v2078_v14 = vmul.f32 %v3360_v43, %v2076_v0  ;;  %vm2083_vm5 = vweird.f32 %v3360_v43  ;;  %vm2065_vm7 = vmor %vm2063_vm6, %vm2064_vm4 }
 0x698   :  { %v2060_v20 = vsub.f32 1.0, %v2059_v46  ;;  %vm2084_vm10 = vmor %vm2082_vm8, %vm2083_vm5  ;;  %v3362_v46 = vpop.eup %3361 }
 0x699   :  { %v2079_v35 = vsub.f32 1.0, %v2078_v14 }
 0x69a   :  { %v2061_v2 = vmul.f32 %v3358_v32, %v2060_v20 }
 0x69b   :  { %v2080_v56 = vmul.f32 %v3360_v43, %v2079_v35  ;;  %v2100_v35 = vmul.f32 %v3356_v19, %v2099_v22  ;;  %v6087_v22 = vld [vmem:[#allocation15_spill] sm:$0xff] }
 0x69c   :  { %v2062_v28 = vadd.f32 %v3358_v32, %v2061_v2 }
 0x69d   :  { %v2081_v16 = vadd.f32 %v3360_v43, %v2080_v56  ;;  %v2101_v36 = vadd.f32 %v3356_v19, %v2100_v35  ;;  %v6086_v56 = vld [vmem:[#allocation14_spill] sm:$0xff] }
 0x69e   :  { %v2066_v26 = vsel %vm2065_vm7, %v3358_v32, %v2062_v28  ;;  %v2106_v28 = vand.u32 2147483647, %v2096_v58  ;;  %v6083_v58 = vld [vmem:[#allocation55_spill] sm:$0xff]  ;;  %v6094_v35 = vld [vmem:[#allocation22_spill] sm:$0xff] }
 0x69f   :  { %v2071_v14 = vsel %vm2068_vm9, %v2070_v25, %v2066_v26  ;;  %v2085_v20 = vsel %vm2084_vm10, %v3360_v43, %v2081_v16  ;;  %v2105_v39 = vsel %vm2104_vm14, %v3356_v19, %v2101_v36  ;;  %v2109_v26 = vor.u32 1.1754944e-38, %v2108_v41  ;;  %v6084_v19 = vld [vmem:[#allocation57_spill] sm:$0xff]  ;;  %v6088_v25 = vld [vmem:[#allocation16_spill] sm:$0xff] }
 0x6a0   :  { %v2116_v54 = vmul.f32 %v3362_v46, %v2071_v14  ;;  %v2090_v62 = vsel %vm2087_vm11, %v2089_v31, %v2085_v20  ;;  %vm2107_vm15 = vcmp.eq.f32.partialorder %v2106_v28, 8.507059e+37  ;;  %v6089_v16 = vld [vmem:[#allocation17_spill] sm:$0xff]  ;;  %v6090_v31 = vld [vmem:[#allocation18_spill] sm:$0xff]  ;;  %v6091_v46 = vld [vmem:[#allocation19_spill] sm:$0xff] }
 0x6a1   :  { %v2115_v40 = vmul.f32 %v2113_v3, %v2090_v62  ;;  %v2110_v0 = vsel %vm2107_vm15, %v2109_v26, %v2105_v39  ;;  %v6080_v62 = vld [vmem:[#allocation12_spill] sm:$0xff]  ;;  %v6093_v20 = vld [vmem:[#allocation21_spill] sm:$0xff]  ;;  %v6098_v28 = vld [vmem:[#allocation26_spill] sm:$0xff] }
 0x6a2   :  { %v6082_v3 = vld [vmem:[#allocation56_spill] sm:$0xff]  ;;  %v6097_v41 = vld [vmem:[#allocation25_spill] sm:$0xff]  ;;  %v6099_v39 = vld [vmem:[#allocation27_spill] sm:$0xff] }
 0x6a3   :  { %v5108_v2 = vadd.f32 %v2116_v54, %v2115_v40  ;;  %v6081_v54 = vld [vmem:[#allocation53_spill] sm:$0xff]  ;;  %v6092_v14 = vld [vmem:[#allocation20_spill] sm:$0xff]  ;;  %v6095_v40 = vld [vmem:[#allocation23_spill] sm:$0xff] }
 0x6a4   :  { %v6096_v36 = vld [vmem:[#allocation24_spill] sm:$0xff] }
 0x6a5   :  { %3363 = vtanh.f32 %v5108_v2  ;;  %v6100_v26 = vld [vmem:[#allocation28_spill] sm:$0xff] }
 0x6ab   :  { %v3364_v48 = vpop.eup %3363 }
 0x6ac   :  { %v2119_v45 = vmul.f32 %v3364_v48, %v2110_v0  ;;  %v6101_v48 = vld [vmem:[#allocation29_spill] sm:$0xff]  ;;  %v6102_v0 = vld [vmem:[#allocation30_spill] sm:$0xff] }
 0x6ae   :  { %v2121_v32 = vrot.slane %v2119_v45, 6  ;;  %v6103_v45 = vld [vmem:[#allocation31_spill] sm:$0xff] }
 0x6b0   :  { %v5112_v43 = vadd.f32 %v2121_v32, %v5021_v13  ;;  %2140 = vmatmul.f32.vlgmr.msrb.gmra.mxu2 %v2121_v32  ;;  %2160 = vmatmul.f32.vlgmr.msrb.gmra.mxu3 %v2121_v32  ;;  %v6079_v13 = vld [vmem:[#allocation41_spill] sm:$0xff] }
 0x6b1   :  { %2180 = vmatmul.f32.vlgmr.msra.gmra.mxu0 %v2121_v32  ;;  %2200 = vmatmul.f32.vlgmr.msra.gmra.mxu1 %v2121_v32  ;;  %v6104_v32 = vld [vmem:[#allocation32_spill] sm:$0xff] }
 0x6b2   :  { %2441 = vmatpush.msrb.mxu2 %v4836_v18  ;;  %2461 = vmatpush.msrb.mxu3 %v4839_v38 }
 0x6b3   :  { %2481 = vmatpush.msra.mxu0 %v4842_v6  ;;  %2501 = vmatpush.msra.mxu1 %v4845_v9 }
 0x6b4   :  { %2442 = vmatpush.msrb.mxu2 %v4848_v11  ;;  %2462 = vmatpush.msrb.mxu3 %v4851_v59 }
 0x6b5   :  { %2482 = vmatpush.msra.mxu0 %v4854_v51  ;;  %2502 = vmatpush.msra.mxu1 %v4857_v5 }
 0x6b6   :  { %2443 = vmatpush.msrb.mxu2 %v4860_v47  ;;  %2463 = vmatpush.msrb.mxu3 %v4863_v12 }
 0x6b7   :  { %2483 = vmatpush.msra.mxu0 %v4866_v1  ;;  %2503 = vmatpush.msra.mxu1 %v4869_v7 }
 0x6b8   :  { %2444 = vmatpush.msrb.mxu2 %v4872_v61  ;;  %2464 = vmatpush.msrb.mxu3 %v4875_v17 }
 0x6b9   :  { %2484 = vmatpush.msra.mxu0 %v4878_v60  ;;  %2504 = vmatpush.msra.mxu1 %v4881_v24 }
 0x6ba   :  { %2445 = vmatpush.msrb.mxu2 %v4884_v42  ;;  %2465 = vmatpush.msrb.mxu3 %v4887_v27 }
 0x6bb   :  { %2485 = vmatpush.msra.mxu0 %v4890_v8  ;;  %2505 = vmatpush.msra.mxu1 %v4893_v21 }
 0x6bc   :  { %2446 = vmatpush.msrb.mxu2 %v4896_v52  ;;  %2466 = vmatpush.msrb.mxu3 %v4899_v44 }
 0x6bd   :  { %2486 = vmatpush.msra.mxu0 %v4902_v37  ;;  %2506 = vmatpush.msra.mxu1 %v4905_v57 }
 0x6be   :  { %2447 = vmatpush.msrb.mxu2 %v4908_v63  ;;  %2467 = vmatpush.msrb.mxu3 %v4911_v15 }
 0x6bf   :  { %2487 = vmatpush.msra.mxu0 %v4914_v53  ;;  %2507 = vmatpush.msra.mxu1 %v4917_v50 }
 0x6c0   :  { %2448 = vmatpush.msrb.mxu2 %v4920_v33  ;;  %2468 = vmatpush.msrb.mxu3 %v4923_v29 }
 0x6c1   :  { %2488 = vmatpush.msra.mxu0 %v4926_v49  ;;  %2508 = vmatpush.msra.mxu1 %v4929_v34 }
 0x6c2   :  { %2449 = vmatpush.msrb.mxu2 %v4932_v23  ;;  %2469 = vmatpush.msrb.mxu3 %v4935_v55 }
 0x6c3   :  { %2489 = vmatpush.msra.mxu0 %v4938_v30  ;;  %2509 = vmatpush.msra.mxu1 %v4941_v4 }
 0x6c4   :  { %2450 = vmatpush.msrb.mxu2 %v6079_v13  ;;  %2470 = vmatpush.msrb.mxu3 %v6080_v62 }
 0x6c5   :  { %2490 = vmatpush.msra.mxu0 %v6081_v54  ;;  %2510 = vmatpush.msra.mxu1 %v6082_v3  ;;  %v2267_v54 = vrot.slane %v5108_v2, 6 }
 0x6c6   :  { %2451 = vmatpush.msrb.mxu2 %v6083_v58  ;;  %2471 = vmatpush.msrb.mxu3 %v6084_v19 }
 0x6c7   :  { %2491 = vmatpush.msra.mxu0 %v6085_v10  ;;  %2511 = vmatpush.msra.mxu1 %v6086_v56 }
 0x6c8   :  { %2452 = vmatpush.msrb.mxu2 %v6087_v22  ;;  %2472 = vmatpush.msrb.mxu3 %v6088_v25 }
 0x6c9   :  { %2492 = vmatpush.msra.mxu0 %v6089_v16  ;;  %2512 = vmatpush.msra.mxu1 %v6090_v31 }
 0x6ca   :  { %2453 = vmatpush.msrb.mxu2 %v6091_v46  ;;  %2473 = vmatpush.msrb.mxu3 %v6092_v14 }
 0x6cb   :  { %2493 = vmatpush.msra.mxu0 %v6093_v20  ;;  %2513 = vmatpush.msra.mxu1 %v6094_v35  ;;  %v6105_v35 = vld [vmem:[#allocation33_spill] sm:$0xff] }
 0x6cc   :  { %2454 = vmatpush.msrb.mxu2 %v6095_v40  ;;  %2474 = vmatpush.msrb.mxu3 %v6096_v36  ;;  %v6106_v40 = vld [vmem:[#allocation34_spill] sm:$0xff] }
 0x6cd   :  { %2494 = vmatpush.msra.mxu0 %v6097_v41  ;;  %2514 = vmatpush.msra.mxu1 %v6098_v28  ;;  %v6107_v41 = vld [vmem:[#allocation50_spill] sm:$0xff] }
 0x6ce   :  { %2455 = vmatpush.msrb.mxu2 %v6099_v39  ;;  %2475 = vmatpush.msrb.mxu3 %v6100_v26  ;;  %v6108_v26 = vld [vmem:[#allocation45_spill] sm:$0xff] }
 0x6cf   :  { %2495 = vmatpush.msra.mxu0 %v6101_v48  ;;  %2515 = vmatpush.msra.mxu1 %v6102_v0  ;;  %v6109_v48 = vld [vmem:[#allocation44_spill] sm:$0xff] }
 0x6d0   :  { %2456 = vmatpush.msrb.mxu2 %v6103_v45  ;;  %2476 = vmatpush.msrb.mxu3 %v6104_v32 }
 0x6d1   :  { %2496 = vmatpush.msra.mxu0 %v6105_v35  ;;  %2516 = vmatpush.msra.mxu1 %v6106_v40 }
 0x72e   :  { %v2201_v36 = vpop.f32.mrf.mxu1 }
 0x72f   :  { %v2207_v20 = vadd.f32 %v2201_v36, %v6107_v41  ;;  %v6110_v41 = vld [vmem:[#allocation51_spill] sm:$0xff] }
 0x731   :  { %v3209_v28 = vmul.f32 -1.442695, %v2207_v20  ;;  %v2181_v20 = vpop.f32.mrf.mxu0 }
 0x733   :  { %3365 = vpow2.f32 %v3209_v28  ;;  %v2141_v39 = vpop.f32.mrf.mxu2  ;;  %v2161_v14 = vpop.f32.mrf.mxu3 }
 0x734   :  { %v2204_v46 = vadd.f32 %v2141_v39, %v6108_v26  ;;  %v2205_v31 = vadd.f32 %v2161_v14, %v6109_v48  ;;  %v2206_v39 = vadd.f32 %v2181_v20, %v6110_v41 }
 0x736   :  { %v3207_v0 = vmul.f32 -1.442695, %v2204_v46  ;;  %v3208_v16 = vmul.f32 -1.442695, %v2205_v31 }
 0x738   :  { %3367 = vpow2.f32 %v3207_v0 }
 0x739   :  { %v3366_v45 = vpop.eup %3365  ;;  %3369 = vpow2.f32 %v3208_v16 }
 0x73a   :  { %v2250_v32 = vadd.f32 1.0, %v3366_v45 }
 0x73c   :  { %3371 = vrcp.f32 %v2250_v32  ;;  %vm2256_vm9 = vweird.f32 %v2250_v32 }
 0x73e   :  { %v3368_v35 = vpop.eup %3367 }
 0x73f   :  { %v3370_v25 = vpop.eup %3369  ;;  %v2211_v40 = vadd.f32 1.0, %v3368_v35 }
 0x740   :  { %v2230_v22 = vadd.f32 1.0, %v3370_v25 }
 0x741   :  { %3373 = vrcp.f32 %v2211_v40  ;;  %v2223_v16 = vand.u32 2147483648, %v2211_v40  ;;  %v2221_v35 = vand.u32 2147483647, %v2211_v40  ;;  %vm2217_vm2 = vweird.f32 %v2211_v40 }
 0x742   :  { %3375 = vrcp.f32 %v2230_v22  ;;  %v3372_v36 = vpop.eup %3371  ;;  %v2242_v56 = vand.u32 2147483648, %v2230_v22  ;;  %v2240_v10 = vand.u32 2147483647, %v2230_v22  ;;  %vm2236_vm4 = vweird.f32 %v2230_v22 }
 0x743   :  { %v2252_v31 = vmul.f32 %v3372_v36, %v2250_v32  ;;  %3377 = vtanh.f32 %v2206_v39  ;;  %v2224_v20 = vor.u32 1.1754944e-38, %v2223_v16  ;;  %vm2222_vm5 = vcmp.eq.f32.partialorder %v2221_v35, 8.507059e+37 }
 0x744   :  { %v2243_v39 = vor.u32 1.1754944e-38, %v2242_v56  ;;  %vm2241_vm7 = vcmp.eq.f32.partialorder %v2240_v10, 8.507059e+37  ;;  %vm2257_vm8 = vweird.f32 %v3372_v36  ;;  %v2262_v16 = vand.u32 2147483648, %v2250_v32 }
 0x745   :  { %v2253_v19 = vsub.f32 1.0, %v2252_v31  ;;  %vm2258_vm10 = vmor %vm2256_vm9, %vm2257_vm8 }
 0x747   :  { %v3374_v28 = vpop.eup %3373 }
 0x748   :  { %v3376_v26 = vpop.eup %3375  ;;  %v2213_v14 = vmul.f32 %v3374_v28, %v2211_v40  ;;  %vm2218_vm0 = vweird.f32 %v3374_v28 }
 0x749   :  { %v2232_v46 = vmul.f32 %v3376_v26, %v2230_v22  ;;  %vm2237_vm1 = vweird.f32 %v3376_v26  ;;  %vm2219_vm3 = vmor %vm2217_vm2, %vm2218_vm0 }
 0x74a   :  { %v2214_v0 = vsub.f32 1.0, %v2213_v14  ;;  %vm2238_vm6 = vmor %vm2236_vm4, %vm2237_vm1  ;;  %v3378_v14 = vpop.eup %3377 }
 0x74b   :  { %v2233_v45 = vsub.f32 1.0, %v2232_v46 }
 0x74c   :  { %v2215_v48 = vmul.f32 %v3374_v28, %v2214_v0 }
 0x74d   :  { %v2234_v25 = vmul.f32 %v3376_v26, %v2233_v45  ;;  %v2254_v45 = vmul.f32 %v3372_v36, %v2253_v19 }
 0x74e   :  { %v2216_v58 = vadd.f32 %v3374_v28, %v2215_v48 }
 0x74f   :  { %v2235_v41 = vadd.f32 %v3376_v26, %v2234_v25  ;;  %v2255_v40 = vadd.f32 %v3372_v36, %v2254_v45 }
 0x750   :  { %v2220_v3 = vsel %vm2219_vm3, %v3374_v28, %v2216_v58  ;;  %v2260_v58 = vand.u32 2147483647, %v2250_v32 }
 0x751   :  { %v2225_v46 = vsel %vm2222_vm5, %v2224_v20, %v2220_v3  ;;  %v2239_v0 = vsel %vm2238_vm6, %v3376_v26, %v2235_v41  ;;  %v2259_v56 = vsel %vm2258_vm10, %v3372_v36, %v2255_v40  ;;  %v2263_v3 = vor.u32 1.1754944e-38, %v2262_v16 }
 0x752   :  { %v2270_v62 = vmul.f32 %v3378_v14, %v2225_v46  ;;  %v2244_v13 = vsel %vm2241_vm7, %v2243_v39, %v2239_v0  ;;  %vm2261_vm11 = vcmp.eq.f32.partialorder %v2260_v58, 8.507059e+37 }
 0x753   :  { %v2269_v31 = vmul.f32 %v2267_v54, %v2244_v13  ;;  %v2264_v22 = vsel %vm2261_vm11, %v2263_v3, %v2259_v56  ;;  %v6140_v13 = vld [vmem:[#allocation45_spill] sm:$0xff]  ;;  %v6141_v54 = vld [vmem:[#allocation44_spill] sm:$0xff] }
 0x755   :  { %v5183_v48 = vadd.f32 %v2270_v62, %v2269_v31  ;;  %v6142_v31 = vld [vmem:[#allocation51_spill] sm:$0xff] }
 0x757   :  { %3379 = vtanh.f32 %v5183_v48 }
 0x75d   :  { %v3380_v10 = vpop.eup %3379 }
 0x75e   :  { %v2273_v2 = vmul.f32 %v3380_v10, %v2264_v22 }
 0x760   :  { %v5187_v19 = vadd.f32 %v2273_v2, %v5112_v43  ;;  %2291 = vmatmul.f32.vlgmr.msra.gmra.mxu2 %v2273_v2  ;;  %2311 = vmatmul.f32.vlgmr.msra.gmra.mxu3 %v2273_v2 }
 0x761   :  { %2331 = vmatmul.f32.vlgmr.msrb.gmra.mxu0 %v2273_v2  ;;  %2351 = vmatmul.f32.vlgmr.msrb.gmra.mxu1 %v2273_v2 }
 0x762   :  { %2607 = vmatpush.msra.mxu2 %v4836_v18  ;;  %2627 = vmatpush.msra.mxu3 %v4839_v38  ;;  %v6111_v18 = vld [vmem:[#allocation41_spill] sm:$0xff]  ;;  %v6112_v38 = vld [vmem:[#allocation12_spill] sm:$0xff] }
 0x763   :  { %2647 = vmatpush.msrb.mxu0 %v4842_v6  ;;  %2667 = vmatpush.msrb.mxu1 %v4845_v9  ;;  %v6113_v6 = vld [vmem:[#allocation53_spill] sm:$0xff]  ;;  %v6114_v9 = vld [vmem:[#allocation56_spill] sm:$0xff] }
 0x764   :  { %2608 = vmatpush.msra.mxu2 %v4848_v11  ;;  %2628 = vmatpush.msra.mxu3 %v4851_v59  ;;  %v6115_v11 = vld [vmem:[#allocation55_spill] sm:$0xff]  ;;  %v6116_v59 = vld [vmem:[#allocation57_spill] sm:$0xff] }
 0x765   :  { %2648 = vmatpush.msrb.mxu0 %v4854_v51  ;;  %2668 = vmatpush.msrb.mxu1 %v4857_v5  ;;  %v6117_v51 = vld [vmem:[#allocation13_spill] sm:$0xff]  ;;  %v6118_v5 = vld [vmem:[#allocation14_spill] sm:$0xff] }
 0x766   :  { %2609 = vmatpush.msra.mxu2 %v4860_v47  ;;  %2629 = vmatpush.msra.mxu3 %v4863_v12  ;;  %v6119_v47 = vld [vmem:[#allocation15_spill] sm:$0xff]  ;;  %v6120_v12 = vld [vmem:[#allocation16_spill] sm:$0xff] }
 0x767   :  { %2649 = vmatpush.msrb.mxu0 %v4866_v1  ;;  %2669 = vmatpush.msrb.mxu1 %v4869_v7  ;;  %v6121_v1 = vld [vmem:[#allocation17_spill] sm:$0xff]  ;;  %v6122_v7 = vld [vmem:[#allocation18_spill] sm:$0xff] }
 0x768   :  { %2610 = vmatpush.msra.mxu2 %v4872_v61  ;;  %2630 = vmatpush.msra.mxu3 %v4875_v17  ;;  %v6123_v61 = vld [vmem:[#allocation19_spill] sm:$0xff]  ;;  %v6124_v17 = vld [vmem:[#allocation20_spill] sm:$0xff] }
 0x769   :  { %2650 = vmatpush.msrb.mxu0 %v4878_v60  ;;  %2670 = vmatpush.msrb.mxu1 %v4881_v24  ;;  %v6125_v60 = vld [vmem:[#allocation21_spill] sm:$0xff]  ;;  %v6126_v24 = vld [vmem:[#allocation22_spill] sm:$0xff] }
 0x76a   :  { %2611 = vmatpush.msra.mxu2 %v4884_v42  ;;  %2631 = vmatpush.msra.mxu3 %v4887_v27  ;;  %v6127_v42 = vld [vmem:[#allocation23_spill] sm:$0xff]  ;;  %v6128_v27 = vld [vmem:[#allocation24_spill] sm:$0xff] }
 0x76b   :  { %2651 = vmatpush.msrb.mxu0 %v4890_v8  ;;  %2671 = vmatpush.msrb.mxu1 %v4893_v21  ;;  %v6129_v8 = vld [vmem:[#allocation25_spill] sm:$0xff]  ;;  %v6130_v21 = vld [vmem:[#allocation26_spill] sm:$0xff] }
 0x76c   :  { %2612 = vmatpush.msra.mxu2 %v4896_v52  ;;  %2632 = vmatpush.msra.mxu3 %v4899_v44  ;;  %v6131_v52 = vld [vmem:[#allocation27_spill] sm:$0xff]  ;;  %v6132_v44 = vld [vmem:[#allocation28_spill] sm:$0xff] }
 0x76d   :  { %2652 = vmatpush.msrb.mxu0 %v4902_v37  ;;  %2672 = vmatpush.msrb.mxu1 %v4905_v57  ;;  %v6133_v37 = vld [vmem:[#allocation29_spill] sm:$0xff]  ;;  %v6134_v57 = vld [vmem:[#allocation30_spill] sm:$0xff] }
 0x76e   :  { %2613 = vmatpush.msra.mxu2 %v4908_v63  ;;  %2633 = vmatpush.msra.mxu3 %v4911_v15  ;;  %v6135_v63 = vld [vmem:[#allocation31_spill] sm:$0xff]  ;;  %v6136_v15 = vld [vmem:[#allocation32_spill] sm:$0xff] }
 0x76f   :  { %2653 = vmatpush.msrb.mxu0 %v4914_v53  ;;  %2673 = vmatpush.msrb.mxu1 %v4917_v50  ;;  %v6137_v53 = vld [vmem:[#allocation33_spill] sm:$0xff]  ;;  %v6138_v50 = vld [vmem:[#allocation34_spill] sm:$0xff] }
 0x770   :  { %2614 = vmatpush.msra.mxu2 %v4920_v33  ;;  %2634 = vmatpush.msra.mxu3 %v4923_v29 }
 0x771   :  { %2654 = vmatpush.msrb.mxu0 %v4926_v49  ;;  %2674 = vmatpush.msrb.mxu1 %v4929_v34  ;;  %v6139_v49 = vld [vmem:[#allocation50_spill] sm:$0xff] }
 0x772   :  { %2615 = vmatpush.msra.mxu2 %v4932_v23  ;;  %2635 = vmatpush.msra.mxu3 %v4935_v55 }
 0x773   :  { %2655 = vmatpush.msrb.mxu0 %v4938_v30  ;;  %2675 = vmatpush.msrb.mxu1 %v4941_v4 }
 0x774   :  { %2616 = vmatpush.msra.mxu2 %v6111_v18  ;;  %2636 = vmatpush.msra.mxu3 %v6112_v38 }
 0x775   :  { %2656 = vmatpush.msrb.mxu0 %v6113_v6  ;;  %2676 = vmatpush.msrb.mxu1 %v6114_v9 }
 0x776   :  { %2617 = vmatpush.msra.mxu2 %v6115_v11  ;;  %2637 = vmatpush.msra.mxu3 %v6116_v59 }
 0x777   :  { %2657 = vmatpush.msrb.mxu0 %v6117_v51  ;;  %2677 = vmatpush.msrb.mxu1 %v6118_v5 }
 0x778   :  { %2618 = vmatpush.msra.mxu2 %v6119_v47  ;;  %2638 = vmatpush.msra.mxu3 %v6120_v12 }
 0x779   :  { %2658 = vmatpush.msrb.mxu0 %v6121_v1  ;;  %2678 = vmatpush.msrb.mxu1 %v6122_v7 }
 0x77a   :  { %2619 = vmatpush.msra.mxu2 %v6123_v61  ;;  %2639 = vmatpush.msra.mxu3 %v6124_v17  ;;  %v2430_v61 = vrot.slane %v5183_v48, 6 }
 0x77b   :  { %2659 = vmatpush.msrb.mxu0 %v6125_v60  ;;  %2679 = vmatpush.msrb.mxu1 %v6126_v24 }
 0x77c   :  { %2620 = vmatpush.msra.mxu2 %v6127_v42  ;;  %2640 = vmatpush.msra.mxu3 %v6128_v27 }
 0x77d   :  { %2660 = vmatpush.msrb.mxu0 %v6129_v8  ;;  %2680 = vmatpush.msrb.mxu1 %v6130_v21 }
 0x77e   :  { %2621 = vmatpush.msra.mxu2 %v6131_v52  ;;  %2641 = vmatpush.msra.mxu3 %v6132_v44 }
 0x77f   :  { %2661 = vmatpush.msrb.mxu0 %v6133_v37  ;;  %2681 = vmatpush.msrb.mxu1 %v6134_v57 }
 0x780   :  { %2622 = vmatpush.msra.mxu2 %v6135_v63  ;;  %2642 = vmatpush.msra.mxu3 %v6136_v15 }
 0x781   :  { %2662 = vmatpush.msrb.mxu0 %v6137_v53  ;;  %2682 = vmatpush.msrb.mxu1 %v6138_v50 }
 0x7de   :  { %v2352_v33 = vpop.f32.mrf.mxu1  ;;  %v2332_v39 = vpop.f32.mrf.mxu0 }
 0x7df   :  { %v2362_v29 = vrot.slane %v2352_v33, 6  ;;  %v2361_v46 = vrot.slane %v2332_v39, 6  ;;  %v5291_v39 = vld [vmem:[#allocation7 + $0x1a8] sm:$0xff] }
 0x7e1   :  { %v2370_v34 = vadd.f32 %v2362_v29, %v6139_v49  ;;  %v2369_v40 = vadd.f32 %v2361_v46, %v6142_v31  ;;  %v5297_v46 = vld [vmem:[#allocation7 + $0x1b8] sm:$0xff] }
 0x7e3   :  { %v3212_v23 = vmul.f32 -1.442695, %v2370_v34  ;;  %v2292_v55 = vpop.f32.mrf.mxu2  ;;  %v2312_v30 = vpop.f32.mrf.mxu3 }
 0x7e4   :  { %v2359_v4 = vrot.slane %v2292_v55, 6  ;;  %v2360_v43 = vrot.slane %v2312_v30, 6 }
 0x7e5   :  { %3381 = vpow2.f32 %v3212_v23 }
 0x7e6   :  { %v2367_v62 = vadd.f32 %v2359_v4, %v6140_v13  ;;  %v2368_v41 = vadd.f32 %v2360_v43, %v6141_v54 }
 0x7e8   :  { %v3210_v26 = vmul.f32 -1.442695, %v2367_v62  ;;  %v3211_v32 = vmul.f32 -1.442695, %v2368_v41  ;;  %v5264_v41 = vld [vmem:[#allocation7 + $0x1e0] sm:$0xff] }
 0x7ea   :  { %3383 = vpow2.f32 %v3210_v26  ;;  %v5267_v26 = vld [vmem:[#allocation7 + $0x1e8] sm:$0xff] }
 0x7eb   :  { %v3382_v36 = vpop.eup %3381  ;;  %3385 = vpow2.f32 %v3211_v32  ;;  %v5270_v32 = vld [vmem:[#allocation7 + $0x1f0] sm:$0xff] }
 0x7ec   :  { %v2413_v28 = vadd.f32 1.0, %v3382_v36  ;;  %v5273_v36 = vld [vmem:[#allocation7 + $0x1f8] sm:$0xff] }
 0x7ee   :  { %3387 = vrcp.f32 %v2413_v28  ;;  %v2425_v29 = vand.u32 2147483648, %v2413_v28  ;;  %vm2419_vm5 = vweird.f32 %v2413_v28  ;;  %v2423_v34 = vand.u32 2147483647, %v2413_v28 }
 0x7f0   :  { %v3384_v35 = vpop.eup %3383  ;;  %v2426_v55 = vor.u32 1.1754944e-38, %v2425_v29  ;;  %vm2424_vm7 = vcmp.eq.f32.partialorder %v2423_v34, 8.507059e+37  ;;  %v5390_v29 = vld [vmem:[#allocation7 + $0xb0] sm:$0xff]  ;;  %v5393_v34 = vld [vmem:[#allocation7 + $0xb8] sm:$0xff] }
 0x7f1   :  { %v3386_v25 = vpop.eup %3385  ;;  %v2374_v20 = vadd.f32 1.0, %v3384_v35  ;;  %v5282_v35 = vld [vmem:[#allocation7 + $0x1d0] sm:$0xff]  ;;  %6149 = vst [vmem:[#allocation48_spill] sm:$0xff] %v5390_v29 }
 0x7f2   :  { %v2393_v14 = vadd.f32 1.0, %v3386_v25  ;;  %v5285_v25 = vld [vmem:[#allocation7 + $0x1d8] sm:$0xff]  ;;  %6150 = vst [vmem:[#allocation43_spill] sm:$0xff] %v5393_v34 }
 0x7f3   :  { %3389 = vrcp.f32 %v2374_v20  ;;  %v2386_v22 = vand.u32 2147483648, %v2374_v20  ;;  %v2384_v38 = vand.u32 2147483647, %v2374_v20  ;;  %vm2380_vm14 = vweird.f32 %v2374_v20 }
 0x7f4   :  { %3391 = vrcp.f32 %v2393_v14  ;;  %v3388_v0 = vpop.eup %3387  ;;  %v2405_v6 = vand.u32 2147483648, %v2393_v14  ;;  %v2403_v11 = vand.u32 2147483647, %v2393_v14  ;;  %vm2399_vm0 = vweird.f32 %v2393_v14 }
 0x7f5   :  { %v2415_v3 = vmul.f32 %v3388_v0, %v2413_v28  ;;  %3393 = vtanh.f32 %v2369_v40  ;;  %v2387_v5 = vor.u32 1.1754944e-38, %v2386_v22  ;;  %vm2385_vm1 = vcmp.eq.f32.partialorder %v2384_v38, 8.507059e+37  ;;  %v5279_v28 = vld [vmem:[#allocation7 + $0x1c8] sm:$0xff]  ;;  %v5306_v40 = vld [vmem:[#allocation7 + $0x190] sm:$0xff]  ;;  %v5324_v22 = vld [vmem:[#allocation7 + $0x140] sm:$0xff] }
 0x7f6   :  { %v2406_v1 = vor.u32 1.1754944e-38, %v2405_v6  ;;  %vm2404_vm3 = vcmp.eq.f32.partialorder %v2403_v11, 8.507059e+37  ;;  %vm2420_vm4 = vweird.f32 %v3388_v0  ;;  %v5333_v38 = vld [vmem:[#allocation7 + $0x158] sm:$0xff]  ;;  %v5336_v6 = vld [vmem:[#allocation7 + $0x120] sm:$0xff]  ;;  %v5342_v11 = vld [vmem:[#allocation7 + $0x130] sm:$0xff] }
 0x7f7   :  { %v2416_v59 = vsub.f32 1.0, %v2415_v3  ;;  %vm2421_vm6 = vmor %vm2419_vm5, %vm2420_vm4  ;;  %v5318_v3 = vld [vmem:[#allocation7 + $0x170] sm:$0xff] }
 0x7f9   :  { %v3390_v45 = vpop.eup %3389  ;;  %v2417_v24 = vmul.f32 %v3388_v0, %v2416_v59  ;;  %v5345_v59 = vld [vmem:[#allocation7 + $0x138] sm:$0xff] }
 0x7fa   :  { %v3392_v16 = vpop.eup %3391  ;;  %v2376_v58 = vmul.f32 %v3390_v45, %v2374_v20  ;;  %vm2381_vm12 = vweird.f32 %v3390_v45  ;;  %v5288_v20 = vld [vmem:[#allocation7 + $0x1a0] sm:$0xff] }
 0x7fb   :  { %v2395_v56 = vmul.f32 %v3392_v16, %v2393_v14  ;;  %vm2400_vm13 = vweird.f32 %v3392_v16  ;;  %vm2382_vm15 = vmor %vm2380_vm14, %vm2381_vm12  ;;  %v3394_v7 = vpop.eup %3393  ;;  %v2418_v33 = vadd.f32 %v3388_v0, %v2417_v24  ;;  %v5294_v14 = vld [vmem:[#allocation7 + $0x1b0] sm:$0xff]  ;;  %v5375_v24 = vld [vmem:[#allocation7 + $0xc8] sm:$0xff] }
 0x7fc   :  { %v2377_v10 = vsub.f32 1.0, %v2376_v58  ;;  %vm2401_vm2 = vmor %vm2399_vm0, %vm2400_vm13  ;;  %v5312_v58 = vld [vmem:[#allocation7 + $0x160] sm:$0xff]  ;;  %6144 = vst [vmem:[#allocation36_spill] sm:$0xff] %v5375_v24 }
 0x7fd   :  { %v2396_v2 = vsub.f32 1.0, %v2395_v56  ;;  %v2422_v23 = vsel %vm2421_vm6, %v3388_v0, %v2418_v33  ;;  %v5300_v0 = vld [vmem:[#allocation7 + $0x180] sm:$0xff]  ;;  %v5315_v56 = vld [vmem:[#allocation7 + $0x168] sm:$0xff] }
 0x7fe   :  { %v2378_v18 = vmul.f32 %v3390_v45, %v2377_v10  ;;  %v2427_v30 = vsel %vm2424_vm7, %v2426_v55, %v2422_v23  ;;  %v5321_v10 = vld [vmem:[#allocation7 + $0x178] sm:$0xff]  ;;  %v5387_v33 = vld [vmem:[#allocation7 + $0xa8] sm:$0xff]  ;;  %v5396_v23 = vld [vmem:[#allocation7 + $0x80] sm:$0xff] }
 0x7ff   :  { %v2397_v9 = vmul.f32 %v3392_v16, %v2396_v2  ;;  %v5327_v2 = vld [vmem:[#allocation7 + $0x148] sm:$0xff]  ;;  %6148 = vst [vmem:[#allocation40_spill] sm:$0xff] %v5387_v33 }
 0x800   :  { %v2379_v51 = vadd.f32 %v3390_v45, %v2378_v18  ;;  %v5330_v18 = vld [vmem:[#allocation7 + $0x150] sm:$0xff]  ;;  %6151 = vst [vmem:[#allocation42_spill] sm:$0xff] %v5396_v23  ;;  %v5399_v55 = vld [vmem:[#allocation7 + $0x88] sm:$0xff] }
 0x801   :  { %v2398_v47 = vadd.f32 %v3392_v16, %v2397_v9  ;;  %v5339_v9 = vld [vmem:[#allocation7 + $0x128] sm:$0xff]  ;;  %6152 = vst [vmem:[#allocation49_spill] sm:$0xff] %v5399_v55 }
 0x802   :  { %v2383_v12 = vsel %vm2382_vm15, %v3390_v45, %v2379_v51  ;;  %v5303_v45 = vld [vmem:[#allocation7 + $0x188] sm:$0xff]  ;;  %v5348_v51 = vld [vmem:[#allocation7 + $0x100] sm:$0xff] }
 0x803   :  { %v2388_v17 = vsel %vm2385_vm1, %v2387_v5, %v2383_v12  ;;  %v2402_v60 = vsel %vm2401_vm2, %v3392_v16, %v2398_v47  ;;  %v5309_v16 = vld [vmem:[#allocation7 + $0x198] sm:$0xff]  ;;  %v5351_v5 = vld [vmem:[#allocation7 + $0x108] sm:$0xff]  ;;  %v5354_v47 = vld [vmem:[#allocation7 + $0x110] sm:$0xff] }
 0x804   :  { %v2433_v42 = vmul.f32 %v3394_v7, %v2388_v17  ;;  %v2407_v27 = vsel %vm2404_vm3, %v2406_v1, %v2402_v60  ;;  %v5357_v12 = vld [vmem:[#allocation7 + $0x118] sm:$0xff]  ;;  %v5360_v1 = vld [vmem:[#allocation7 + $0xe0] sm:$0xff]  ;;  %v5363_v7 = vld [vmem:[#allocation7 + $0xe8] sm:$0xff] }
 0x805   :  { %v2432_v8 = vmul.f32 %v2430_v61, %v2407_v27  ;;  %v5366_v61 = vld [vmem:[#allocation7 + $0xf0] sm:$0xff]  ;;  %v5369_v17 = vld [vmem:[#allocation7 + $0xf8] sm:$0xff]  ;;  %v5372_v60 = vld [vmem:[#allocation7 + $0xc0] sm:$0xff] }
 0x806   :  { %6143 = vst [vmem:[#allocation35_spill] sm:$0xff] %v5372_v60  ;;  %v5381_v27 = vld [vmem:[#allocation7 + $0xd8] sm:$0xff] }
 0x807   :  { %v5258_v21 = vadd.f32 %v2433_v42, %v2432_v8  ;;  %v5378_v42 = vld [vmem:[#allocation7 + $0xd0] sm:$0xff]  ;;  %6146 = vst [vmem:[#allocation38_spill] sm:$0xff] %v5381_v27  ;;  %v5384_v8 = vld [vmem:[#allocation7 + $0xa0] sm:$0xff] }
 0x808   :  { %6145 = vst [vmem:[#allocation37_spill] sm:$0xff] %v5378_v42 }
 0x809   :  { %3395 = vtanh.f32 %v5258_v21  ;;  %6147 = vst [vmem:[#allocation39_spill] sm:$0xff] %v5384_v8 }
 0x80f   :  { %v3396_v48 = vpop.eup %3395 }
 0x810   :  { %v2436_v4 = vmul.f32 %v3396_v48, %v2427_v30  ;;  %v5402_v48 = vld [vmem:[#allocation7 + $0x90] sm:$0xff]  ;;  %v5405_v30 = vld [vmem:[#allocation7 + $0x98] sm:$0xff] }
 0x811   :  { %6153 = vst [vmem:[#allocation41_spill] sm:$0xff] %v5402_v48 }
 0x812   :  { %v2438_v43 = vrot.slane %v2436_v4, 2  ;;  %6154 = vst [vmem:[#allocation12_spill] sm:$0xff] %v5405_v30  ;;  %v5408_v4 = vld [vmem:[#allocation7 + $0x60] sm:$0xff] }
 0x813   :  { %6155 = vst [vmem:[#allocation53_spill] sm:$0xff] %v5408_v4 }
 0x814   :  { %v5262_v62 = vadd.f32 %v2438_v43, %v5187_v19  ;;  %2457 = vmatmul.f32.vlgmr.msrb.gmra.mxu2 %v2438_v43  ;;  %2477 = vmatmul.f32.vlgmr.msrb.gmra.mxu3 %v2438_v43  ;;  %v5276_v19 = vld [vmem:[#allocation7 + $0x1c0] sm:$0xff] }
 0x815   :  { %2497 = vmatmul.f32.vlgmr.msra.gmra.mxu0 %v2438_v43  ;;  %2517 = vmatmul.f32.vlgmr.msra.gmra.mxu1 %v2438_v43  ;;  %v5411_v43 = vld [vmem:[#allocation7 + $0x68] sm:$0xff] }
 0x816   :  { %2773 = vmatpush.msrb.mxu2 %v5264_v41  ;;  %2793 = vmatpush.msrb.mxu3 %v5267_v26  ;;  %6156 = vst [vmem:[#allocation56_spill] sm:$0xff] %v5411_v43 }
 0x817   :  { %2813 = vmatpush.msra.mxu0 %v5270_v32  ;;  %2833 = vmatpush.msra.mxu1 %v5273_v36 }
 0x818   :  { %2774 = vmatpush.msrb.mxu2 %v5276_v19  ;;  %2794 = vmatpush.msrb.mxu3 %v5279_v28 }
 0x819   :  { %2814 = vmatpush.msra.mxu0 %v5282_v35  ;;  %2834 = vmatpush.msra.mxu1 %v5285_v25 }
 0x81a   :  { %2775 = vmatpush.msrb.mxu2 %v5288_v20  ;;  %2795 = vmatpush.msrb.mxu3 %v5291_v39 }
 0x81b   :  { %2815 = vmatpush.msra.mxu0 %v5294_v14  ;;  %2835 = vmatpush.msra.mxu1 %v5297_v46 }
 0x81c   :  { %2776 = vmatpush.msrb.mxu2 %v5300_v0  ;;  %2796 = vmatpush.msrb.mxu3 %v5303_v45 }
 0x81d   :  { %2816 = vmatpush.msra.mxu0 %v5306_v40  ;;  %2836 = vmatpush.msra.mxu1 %v5309_v16 }
 0x81e   :  { %2777 = vmatpush.msrb.mxu2 %v5312_v58  ;;  %2797 = vmatpush.msrb.mxu3 %v5315_v56 }
 0x81f   :  { %2817 = vmatpush.msra.mxu0 %v5318_v3  ;;  %2837 = vmatpush.msra.mxu1 %v5321_v10 }
 0x820   :  { %2778 = vmatpush.msrb.mxu2 %v5324_v22  ;;  %2798 = vmatpush.msrb.mxu3 %v5327_v2 }
 0x821   :  { %2818 = vmatpush.msra.mxu0 %v5330_v18  ;;  %2838 = vmatpush.msra.mxu1 %v5333_v38 }
 0x822   :  { %2779 = vmatpush.msrb.mxu2 %v5336_v6  ;;  %2799 = vmatpush.msrb.mxu3 %v5339_v9 }
 0x823   :  { %2819 = vmatpush.msra.mxu0 %v5342_v11  ;;  %2839 = vmatpush.msra.mxu1 %v5345_v59 }
 0x824   :  { %2780 = vmatpush.msrb.mxu2 %v5348_v51  ;;  %2800 = vmatpush.msrb.mxu3 %v5351_v5 }
 0x825   :  { %2820 = vmatpush.msra.mxu0 %v5354_v47  ;;  %2840 = vmatpush.msra.mxu1 %v5357_v12 }
 0x826   :  { %2781 = vmatpush.msrb.mxu2 %v5360_v1  ;;  %2801 = vmatpush.msrb.mxu3 %v5363_v7 }
 0x827   :  { %2821 = vmatpush.msra.mxu0 %v5366_v61  ;;  %2841 = vmatpush.msra.mxu1 %v5369_v17 }
 0x828   :  { %2782 = vmatpush.msrb.mxu2 %v5372_v60  ;;  %2802 = vmatpush.msrb.mxu3 %v5375_v24 }
 0x829   :  { %2822 = vmatpush.msra.mxu0 %v5378_v42  ;;  %2842 = vmatpush.msra.mxu1 %v5381_v27  ;;  %v2596_v42 = vrot.slane %v5258_v21, 6 }
 0x82a   :  { %2783 = vmatpush.msrb.mxu2 %v5384_v8  ;;  %2803 = vmatpush.msrb.mxu3 %v5387_v33 }
 0x82b   :  { %2823 = vmatpush.msra.mxu0 %v5390_v29  ;;  %2843 = vmatpush.msra.mxu1 %v5393_v34 }
 0x82c   :  { %2784 = vmatpush.msrb.mxu2 %v5396_v23  ;;  %2804 = vmatpush.msrb.mxu3 %v5399_v55  ;;  %v5414_v23 = vld [vmem:[#allocation7 + $0x70] sm:$0xff]  ;;  %v5417_v55 = vld [vmem:[#allocation7 + $0x78] sm:$0xff] }
 0x82d   :  { %2824 = vmatpush.msra.mxu0 %v5402_v48  ;;  %2844 = vmatpush.msra.mxu1 %v5405_v30  ;;  %6157 = vst [vmem:[#allocation55_spill] sm:$0xff] %v5414_v23  ;;  %v5420_v48 = vld [vmem:[#allocation7 + $0x40] sm:$0xff]  ;;  %v5423_v30 = vld [vmem:[#allocation7 + $0x48] sm:$0xff] }
 0x82e   :  { %2785 = vmatpush.msrb.mxu2 %v5408_v4  ;;  %2805 = vmatpush.msrb.mxu3 %v5411_v43  ;;  %6158 = vst [vmem:[#allocation57_spill] sm:$0xff] %v5417_v55  ;;  %v5426_v4 = vld [vmem:[#allocation7 + $0x50] sm:$0xff]  ;;  %v5429_v43 = vld [vmem:[#allocation7 + $0x58] sm:$0xff] }
 0x82f   :  { %2825 = vmatpush.msra.mxu0 %v5414_v23  ;;  %2845 = vmatpush.msra.mxu1 %v5417_v55  ;;  %6159 = vst [vmem:[#allocation13_spill] sm:$0xff] %v5420_v48 }
 0x830   :  { %2786 = vmatpush.msrb.mxu2 %v5420_v48  ;;  %6160 = vst [vmem:[#allocation14_spill] sm:$0xff] %v5423_v30  ;;  %2806 = vmatpush.msrb.mxu3 %v5423_v30 }
 0x831   :  { %6161 = vst [vmem:[#allocation15_spill] sm:$0xff] %v5426_v4  ;;  %2826 = vmatpush.msra.mxu0 %v5426_v4  ;;  %2846 = vmatpush.msra.mxu1 %v5429_v43 }
 0x832   :  { %6162 = vst [vmem:[#allocation16_spill] sm:$0xff] %v5429_v43  ;;  %2787 = vmatpush.msrb.mxu2 %v6131_v52  ;;  %2807 = vmatpush.msrb.mxu3 %v6132_v44 }
 0x833   :  { %2827 = vmatpush.msra.mxu0 %v6133_v37  ;;  %2847 = vmatpush.msra.mxu1 %v6134_v57 }
 0x834   :  { %2788 = vmatpush.msrb.mxu2 %v6135_v63  ;;  %2808 = vmatpush.msrb.mxu3 %v6136_v15 }
 0x835   :  { %2828 = vmatpush.msra.mxu0 %v6137_v53  ;;  %2848 = vmatpush.msra.mxu1 %v6138_v50 }
 0x892   :  { %v2518_v4 = vpop.f32.mrf.mxu1 }
 0x893   :  { %v2528_v30 = vrot.slane %v2518_v4, 4 }
 0x895   :  { %v2536_v43 = vadd.f32 %v2528_v30, %v6139_v49  ;;  %v2498_v30 = vpop.f32.mrf.mxu0 }
 0x897   :  { %v3215_v48 = vmul.f32 -1.442695, %v2536_v43  ;;  %v2458_v52 = vpop.f32.mrf.mxu2  ;;  %v2478_v55 = vpop.f32.mrf.mxu3 }
 0x898   :  { %v2525_v44 = vrot.slane %v2458_v52, 4  ;;  %v2526_v23 = vrot.slane %v2478_v55, 4  ;;  %v2527_v55 = vrot.slane %v2498_v30, 4 }
 0x899   :  { %3397 = vpow2.f32 %v3215_v48 }
 0x89a   :  { %v2533_v37 = vadd.f32 %v2525_v44, %v6140_v13  ;;  %v2534_v57 = vadd.f32 %v2526_v23, %v6141_v54  ;;  %v2535_v44 = vadd.f32 %v2527_v55, %v6142_v31 }
 0x89c   :  { %v3213_v63 = vmul.f32 -1.442695, %v2533_v37  ;;  %v3214_v15 = vmul.f32 -1.442695, %v2534_v57 }
 0x89e   :  { %3399 = vpow2.f32 %v3213_v63 }
 0x89f   :  { %v3398_v53 = vpop.eup %3397  ;;  %3401 = vpow2.f32 %v3214_v15 }
 0x8a0   :  { %v2579_v50 = vadd.f32 1.0, %v3398_v53 }
 0x8a2   :  { %3403 = vrcp.f32 %v2579_v50  ;;  %vm2585_vm1 = vweird.f32 %v2579_v50 }
 0x8a4   :  { %v3400_v34 = vpop.eup %3399 }
 0x8a5   :  { %v3402_v4 = vpop.eup %3401  ;;  %v2540_v29 = vadd.f32 1.0, %v3400_v34 }
 0x8a6   :  { %v2559_v43 = vadd.f32 1.0, %v3402_v4 }
 0x8a7   :  { %3405 = vrcp.f32 %v2540_v29  ;;  %v2552_v15 = vand.u32 2147483648, %v2540_v29  ;;  %v2550_v34 = vand.u32 2147483647, %v2540_v29  ;;  %vm2546_vm10 = vweird.f32 %v2540_v29 }
 0x8a8   :  { %3407 = vrcp.f32 %v2559_v43  ;;  %v3404_v48 = vpop.eup %3403  ;;  %v2571_v49 = vand.u32 2147483648, %v2559_v43  ;;  %v2569_v33 = vand.u32 2147483647, %v2559_v43  ;;  %vm2565_vm12 = vweird.f32 %v2559_v43 }
 0x8a9   :  { %v2581_v63 = vmul.f32 %v3404_v48, %v2579_v50  ;;  %3409 = vtanh.f32 %v2535_v44  ;;  %v2553_v55 = vor.u32 1.1754944e-38, %v2552_v15  ;;  %vm2551_vm13 = vcmp.eq.f32.partialorder %v2550_v34, 8.507059e+37 }
 0x8aa   :  { %v2572_v44 = vor.u32 1.1754944e-38, %v2571_v49  ;;  %vm2570_vm15 = vcmp.eq.f32.partialorder %v2569_v33, 8.507059e+37  ;;  %vm2586_vm0 = vweird.f32 %v3404_v48  ;;  %v2591_v15 = vand.u32 2147483648, %v2579_v50 }
 0x8ab   :  { %v2582_v30 = vsub.f32 1.0, %v2581_v63  ;;  %vm2587_vm2 = vmor %vm2585_vm1, %vm2586_vm0 }
 0x8ad   :  { %v3406_v52 = vpop.eup %3405 }
 0x8ae   :  { %v3408_v23 = vpop.eup %3407  ;;  %v2542_v37 = vmul.f32 %v3406_v52, %v2540_v29  ;;  %vm2547_vm8 = vweird.f32 %v3406_v52 }
 0x8af   :  { %v2561_v57 = vmul.f32 %v3408_v23, %v2559_v43  ;;  %vm2566_vm9 = vweird.f32 %v3408_v23  ;;  %vm2548_vm11 = vmor %vm2546_vm10, %vm2547_vm8 }
 0x8b0   :  { %v2543_v54 = vsub.f32 1.0, %v2542_v37  ;;  %vm2567_vm14 = vmor %vm2565_vm12, %vm2566_vm9  ;;  %v3410_v37 = vpop.eup %3409 }
 0x8b1   :  { %v2562_v53 = vsub.f32 1.0, %v2561_v57 }
 0x8b2   :  { %v2544_v13 = vmul.f32 %v3406_v52, %v2543_v54 }
 0x8b3   :  { %v2563_v4 = vmul.f32 %v3408_v23, %v2562_v53  ;;  %v2583_v53 = vmul.f32 %v3404_v48, %v2582_v30 }
 0x8b4   :  { %v2545_v8 = vadd.f32 %v3406_v52, %v2544_v13 }
 0x8b5   :  { %v2564_v31 = vadd.f32 %v3408_v23, %v2563_v4  ;;  %v2584_v29 = vadd.f32 %v3404_v48, %v2583_v53 }
 0x8b6   :  { %v2549_v27 = vsel %vm2548_vm11, %v3406_v52, %v2545_v8  ;;  %v2589_v8 = vand.u32 2147483647, %v2579_v50 }
 0x8b7   :  { %v2554_v57 = vsel %vm2551_vm13, %v2553_v55, %v2549_v27  ;;  %v2568_v54 = vsel %vm2567_vm14, %v3408_v23, %v2564_v31  ;;  %v2588_v49 = vsel %vm2587_vm2, %v3404_v48, %v2584_v29  ;;  %v2592_v27 = vor.u32 1.1754944e-38, %v2591_v15  ;;  %v6186_v29 = vld [vmem:[#allocation51_spill] sm:$0xff] }
 0x8b8   :  { %v2599_v24 = vmul.f32 %v3410_v37, %v2554_v57  ;;  %v2573_v60 = vsel %vm2570_vm15, %v2572_v44, %v2568_v54  ;;  %vm2590_vm3 = vcmp.eq.f32.partialorder %v2589_v8, 8.507059e+37 }
 0x8b9   :  { %v2598_v63 = vmul.f32 %v2596_v42, %v2573_v60  ;;  %v2593_v33 = vsel %vm2590_vm3, %v2592_v27, %v2588_v49  ;;  %v6184_v60 = vld [vmem:[#allocation45_spill] sm:$0xff]  ;;  %v6185_v42 = vld [vmem:[#allocation44_spill] sm:$0xff] }
 0x8bb   :  { %v5445_v13 = vadd.f32 %v2599_v24, %v2598_v63 }
 0x8bd   :  { %3411 = vtanh.f32 %v5445_v13 }
 0x8c3   :  { %v3412_v31 = vpop.eup %3411 }
 0x8c4   :  { %v2602_v21 = vmul.f32 %v3412_v31, %v2593_v33 }
 0x8c6   :  { %v2604_v43 = vrot.slane %v2602_v21, 4 }
 0x8c8   :  { %v5449_v52 = vadd.f32 %v2604_v43, %v5262_v62  ;;  %2623 = vmatmul.f32.vlgmr.msra.gmra.mxu2 %v2604_v43  ;;  %2643 = vmatmul.f32.vlgmr.msra.gmra.mxu3 %v2604_v43  ;;  %v6163_v62 = vld [vmem:[#allocation35_spill] sm:$0xff] }
 0x8c9   :  { %2663 = vmatmul.f32.vlgmr.msrb.gmra.mxu0 %v2604_v43  ;;  %2683 = vmatmul.f32.vlgmr.msrb.gmra.mxu1 %v2604_v43 }
 0x8ca   :  { %2924 = vmatpush.msra.mxu2 %v5264_v41  ;;  %2944 = vmatpush.msra.mxu3 %v5267_v26  ;;  %v6164_v41 = vld [vmem:[#allocation36_spill] sm:$0xff]  ;;  %v6165_v26 = vld [vmem:[#allocation37_spill] sm:$0xff] }
 0x8cb   :  { %2964 = vmatpush.msrb.mxu0 %v5270_v32  ;;  %2984 = vmatpush.msrb.mxu1 %v5273_v36  ;;  %v6166_v32 = vld [vmem:[#allocation38_spill] sm:$0xff]  ;;  %v6167_v36 = vld [vmem:[#allocation39_spill] sm:$0xff] }
 0x8cc   :  { %2925 = vmatpush.msra.mxu2 %v5276_v19  ;;  %2945 = vmatpush.msra.mxu3 %v5279_v28  ;;  %v6168_v19 = vld [vmem:[#allocation40_spill] sm:$0xff] }
 0x8cd   :  { %2965 = vmatpush.msrb.mxu0 %v5282_v35  ;;  %2985 = vmatpush.msrb.mxu1 %v5285_v25  ;;  %v6169_v28 = vld [vmem:[#allocation48_spill] sm:$0xff]  ;;  %v6170_v35 = vld [vmem:[#allocation43_spill] sm:$0xff]  ;;  %v6171_v25 = vld [vmem:[#allocation42_spill] sm:$0xff] }
 0x8ce   :  { %2926 = vmatpush.msra.mxu2 %v5288_v20  ;;  %2946 = vmatpush.msra.mxu3 %v5291_v39  ;;  %v6172_v20 = vld [vmem:[#allocation49_spill] sm:$0xff] }
 0x8cf   :  { %2966 = vmatpush.msrb.mxu0 %v5294_v14  ;;  %2986 = vmatpush.msrb.mxu1 %v5297_v46  ;;  %v6173_v39 = vld [vmem:[#allocation41_spill] sm:$0xff]  ;;  %v6174_v14 = vld [vmem:[#allocation12_spill] sm:$0xff] }
 0x8d0   :  { %2927 = vmatpush.msra.mxu2 %v5300_v0  ;;  %2947 = vmatpush.msra.mxu3 %v5303_v45  ;;  %v6175_v46 = vld [vmem:[#allocation53_spill] sm:$0xff]  ;;  %v6176_v0 = vld [vmem:[#allocation56_spill] sm:$0xff]  ;;  %v6177_v45 = vld [vmem:[#allocation55_spill] sm:$0xff] }
 0x8d1   :  { %2967 = vmatpush.msrb.mxu0 %v5306_v40  ;;  %2987 = vmatpush.msrb.mxu1 %v5309_v16  ;;  %v6178_v40 = vld [vmem:[#allocation57_spill] sm:$0xff] }
 0x8d2   :  { %2928 = vmatpush.msra.mxu2 %v5312_v58  ;;  %2948 = vmatpush.msra.mxu3 %v5315_v56  ;;  %v6179_v16 = vld [vmem:[#allocation13_spill] sm:$0xff]  ;;  %v6180_v58 = vld [vmem:[#allocation14_spill] sm:$0xff]  ;;  %v6181_v56 = vld [vmem:[#allocation15_spill] sm:$0xff] }
 0x8d3   :  { %2968 = vmatpush.msrb.mxu0 %v5318_v3  ;;  %2988 = vmatpush.msrb.mxu1 %v5321_v10  ;;  %v6182_v3 = vld [vmem:[#allocation16_spill] sm:$0xff] }
 0x8d4   :  { %2929 = vmatpush.msra.mxu2 %v5324_v22  ;;  %2949 = vmatpush.msra.mxu3 %v5327_v2  ;;  %v3649_v10 = vld [vmem:[#allocation7 + $0x20] sm:$0xff]  ;;  %v3650_v22 = vld [vmem:[#allocation7 + $0x28] sm:$0xff]  ;;  %v3651_v2 = vld [vmem:[#allocation7 + $0x30] sm:$0xff] }
 0x8d5   :  { %2969 = vmatpush.msrb.mxu0 %v5330_v18  ;;  %2989 = vmatpush.msrb.mxu1 %v5333_v38  ;;  %v3652_v18 = vld [vmem:[#allocation7 + $0x38] sm:$0xff]  ;;  %v3653_v38 = vld [vmem:[#allocation7] sm:$0xff] }
 0x8d6   :  { %2930 = vmatpush.msra.mxu2 %v5336_v6  ;;  %2950 = vmatpush.msra.mxu3 %v5339_v9  ;;  %v3654_v6 = vld [vmem:[#allocation7 + $0x8] sm:$0xff]  ;;  %v3655_v9 = vld [vmem:[#allocation7 + $0x10] sm:$0xff] }
 0x8d7   :  { %2970 = vmatpush.msrb.mxu0 %v5342_v11  ;;  %2990 = vmatpush.msrb.mxu1 %v5345_v59  ;;  %v3656_v11 = vld [vmem:[#allocation7 + $0x18] sm:$0xff] }
 0x8d8   :  { %2931 = vmatpush.msra.mxu2 %v5348_v51  ;;  %2951 = vmatpush.msra.mxu3 %v5351_v5  ;;  %v6183_v5 = vld [vmem:[#allocation50_spill] sm:$0xff] }
 0x8d9   :  { %2971 = vmatpush.msrb.mxu0 %v5354_v47  ;;  %2991 = vmatpush.msrb.mxu1 %v5357_v12 }
 0x8da   :  { %2932 = vmatpush.msra.mxu2 %v5360_v1  ;;  %2952 = vmatpush.msra.mxu3 %v5363_v7 }
 0x8db   :  { %2972 = vmatpush.msrb.mxu0 %v5366_v61  ;;  %2992 = vmatpush.msrb.mxu1 %v5369_v17 }
 0x8dc   :  { %2933 = vmatpush.msra.mxu2 %v6163_v62  ;;  %2953 = vmatpush.msra.mxu3 %v6164_v41 }
 0x8dd   :  { %2973 = vmatpush.msrb.mxu0 %v6165_v26  ;;  %2993 = vmatpush.msrb.mxu1 %v6166_v32 }
 0x8de   :  { %2934 = vmatpush.msra.mxu2 %v6167_v36  ;;  %2954 = vmatpush.msra.mxu3 %v6168_v19 }
 0x8df   :  { %2974 = vmatpush.msrb.mxu0 %v6169_v28  ;;  %2994 = vmatpush.msrb.mxu1 %v6170_v35 }
 0x8e0   :  { %2935 = vmatpush.msra.mxu2 %v6171_v25  ;;  %2955 = vmatpush.msra.mxu3 %v6172_v20 }
 0x8e1   :  { %2975 = vmatpush.msrb.mxu0 %v6173_v39  ;;  %2995 = vmatpush.msrb.mxu1 %v6174_v14 }
 0x8e2   :  { %2936 = vmatpush.msra.mxu2 %v6175_v46  ;;  %2956 = vmatpush.msra.mxu3 %v6176_v0 }
 0x8e3   :  { %2976 = vmatpush.msrb.mxu0 %v6177_v45  ;;  %2996 = vmatpush.msrb.mxu1 %v6178_v40  ;;  %v2762_v45 = vrot.slane %v5445_v13, 6 }
 0x8e4   :  { %2937 = vmatpush.msra.mxu2 %v6179_v16  ;;  %2957 = vmatpush.msra.mxu3 %v6180_v58 }
 0x8e5   :  { %2977 = vmatpush.msrb.mxu0 %v6181_v56  ;;  %2997 = vmatpush.msrb.mxu1 %v6182_v3 }
 0x8e6   :  { %2938 = vmatpush.msra.mxu2 %v3649_v10  ;;  %2958 = vmatpush.msra.mxu3 %v3650_v22 }
 0x8e7   :  { %2978 = vmatpush.msrb.mxu0 %v3651_v2  ;;  %2998 = vmatpush.msrb.mxu1 %v3652_v18 }
 0x8e8   :  { %2939 = vmatpush.msra.mxu2 %v3653_v38  ;;  %2959 = vmatpush.msra.mxu3 %v3654_v6 }
 0x8e9   :  { %2979 = vmatpush.msrb.mxu0 %v3655_v9  ;;  %2999 = vmatpush.msrb.mxu1 %v3656_v11 }
 0x946   :  { %v2684_v59 = vpop.f32.mrf.mxu1  ;;  %v2664_v37 = vpop.f32.mrf.mxu0 }
 0x947   :  { %v2694_v51 = vrot.slane %v2684_v59, 2  ;;  %v2693_v54 = vrot.slane %v2664_v37, 2 }
 0x949   :  { %v2702_v47 = vadd.f32 %v2694_v51, %v6183_v5  ;;  %v2701_v15 = vadd.f32 %v2693_v54, %v6186_v29  ;;  %v6187_v5 = vld [vmem:[#allocation52_spill] sm:$0xff] }
 0x94b   :  { %v3218_v12 = vmul.f32 -1.442695, %v2702_v47  ;;  %v2624_v1 = vpop.f32.mrf.mxu2  ;;  %v2644_v7 = vpop.f32.mrf.mxu3 }
 0x94c   :  { %v2691_v61 = vrot.slane %v2624_v1, 2  ;;  %v2692_v17 = vrot.slane %v2644_v7, 2 }
 0x94d   :  { %3413 = vpow2.f32 %v3218_v12 }
 0x94e   :  { %v2699_v24 = vadd.f32 %v2691_v61, %v6184_v60  ;;  %v2700_v50 = vadd.f32 %v2692_v17, %v6185_v42  ;;  %v6188_v61 = vld [vmem:[#allocation47_spill] sm:$0xff]  ;;  %v6189_v60 = vld [vmem:[#allocation46_spill] sm:$0xff] }
 0x950   :  { %v3216_v48 = vmul.f32 -1.442695, %v2699_v24  ;;  %v3217_v23 = vmul.f32 -1.442695, %v2700_v50 }
 0x952   :  { %3415 = vpow2.f32 %v3216_v48 }
 0x953   :  { %v3414_v34 = vpop.eup %3413  ;;  %3417 = vpow2.f32 %v3217_v23 }
 0x954   :  { %v2745_v4 = vadd.f32 1.0, %v3414_v34 }
 0x956   :  { %3419 = vrcp.f32 %v2745_v4  ;;  %v2757_v22 = vand.u32 2147483648, %v2745_v4  ;;  %vm2751_vm13 = vweird.f32 %v2745_v4  ;;  %v2755_v2 = vand.u32 2147483647, %v2745_v4 }
 0x958   :  { %v3416_v30 = vpop.eup %3415  ;;  %v2758_v38 = vor.u32 1.1754944e-38, %v2757_v22  ;;  %vm2756_vm15 = vcmp.eq.f32.partialorder %v2755_v2, 8.507059e+37 }
 0x959   :  { %v3418_v55 = vpop.eup %3417  ;;  %v2706_v44 = vadd.f32 1.0, %v3416_v30 }
 0x95a   :  { %v2725_v57 = vadd.f32 1.0, %v3418_v55 }
 0x95b   :  { %3421 = vrcp.f32 %v2706_v44  ;;  %v2718_v21 = vand.u32 2147483648, %v2706_v44  ;;  %v2716_v41 = vand.u32 2147483647, %v2706_v44  ;;  %vm2712_vm6 = vweird.f32 %v2706_v44 }
 0x95c   :  { %3423 = vrcp.f32 %v2725_v57  ;;  %v3420_v53 = vpop.eup %3419  ;;  %v2737_v26 = vand.u32 2147483648, %v2725_v57  ;;  %v2735_v36 = vand.u32 2147483647, %v2725_v57  ;;  %vm2731_vm8 = vweird.f32 %v2725_v57 }
 0x95d   :  { %v2747_v31 = vmul.f32 %v3420_v53, %v2745_v4  ;;  %3425 = vtanh.f32 %v2701_v15  ;;  %v2719_v35 = vor.u32 1.1754944e-38, %v2718_v21  ;;  %vm2717_vm9 = vcmp.eq.f32.partialorder %v2716_v41, 8.507059e+37 }
 0x95e   :  { %v2738_v39 = vor.u32 1.1754944e-38, %v2737_v26  ;;  %vm2736_vm11 = vcmp.eq.f32.partialorder %v2735_v36, 8.507059e+37  ;;  %vm2752_vm12 = vweird.f32 %v3420_v53 }
 0x95f   :  { %v2748_v19 = vsub.f32 1.0, %v2747_v31  ;;  %vm2753_vm14 = vmor %vm2751_vm13, %vm2752_vm12 }
 0x961   :  { %v3422_v63 = vpop.eup %3421  ;;  %v2749_v40 = vmul.f32 %v3420_v53, %v2748_v19 }
 0x962   :  { %v3424_v8 = vpop.eup %3423  ;;  %v2708_v49 = vmul.f32 %v3422_v63, %v2706_v44  ;;  %vm2713_vm4 = vweird.f32 %v3422_v63 }
 0x963   :  { %v2727_v27 = vmul.f32 %v3424_v8, %v2725_v57  ;;  %vm2732_vm5 = vweird.f32 %v3424_v8  ;;  %vm2714_vm7 = vmor %vm2712_vm6, %vm2713_vm4  ;;  %v3426_v14 = vpop.eup %3425  ;;  %v2750_v10 = vadd.f32 %v3420_v53, %v2749_v40  ;;  %v6190_v57 = vld [vmem:[#allocation54_spill] sm:$0xff] }
 0x964   :  { %v2709_v33 = vsub.f32 1.0, %v2708_v49  ;;  %vm2733_vm10 = vmor %vm2731_vm8, %vm2732_vm5 }
 0x965   :  { %v2728_v43 = vsub.f32 1.0, %v2727_v27  ;;  %v2754_v18 = vsel %vm2753_vm14, %v3420_v53, %v2750_v10 }
 0x966   :  { %v2710_v62 = vmul.f32 %v3422_v63, %v2709_v33  ;;  %v2759_v9 = vsel %vm2756_vm15, %v2758_v38, %v2754_v18 }
 0x967   :  { %v2729_v32 = vmul.f32 %v3424_v8, %v2728_v43 }
 0x968   :  { %v2711_v28 = vadd.f32 %v3422_v63, %v2710_v62 }
 0x969   :  { %v2730_v25 = vadd.f32 %v3424_v8, %v2729_v32 }
 0x96a   :  { %v2715_v20 = vsel %vm2714_vm7, %v3422_v63, %v2711_v28 }
 0x96b   :  { %v2720_v46 = vsel %vm2717_vm9, %v2719_v35, %v2715_v20  ;;  %v2734_v0 = vsel %vm2733_vm10, %v3424_v8, %v2730_v25 }
 0x96c   :  { %v2765_v16 = vmul.f32 %v3426_v14, %v2720_v46  ;;  %v2739_v58 = vsel %vm2736_vm11, %v2738_v39, %v2734_v0 }
 0x96d   :  { %v2764_v56 = vmul.f32 %v2762_v45, %v2739_v58 }
 0x96f   :  { %v5512_v3 = vadd.f32 %v2765_v16, %v2764_v56 }
 0x971   :  { %3427 = vtanh.f32 %v5512_v3  ;;  %v2916_v39 = vrot.slane %v5512_v3, 6 }
 0x977   :  { %v3428_v6 = vpop.eup %3427 }
 0x978   :  { %v2768_v13 = vmul.f32 %v3428_v6, %v2759_v9 }
 0x97a   :  { %v2770_v11 = vrot.slane %v2768_v13, 6  ;;  %v3107_v13 = vld [vmem:[%s5611_s6 + $0x78] sm:$0xff] }
 0x97c   :  { %v5516_v59 = vadd.f32 %v2770_v11, %v5449_v52  ;;  %2789 = vmatmul.f32.vlgmr.msrb.gmra.mxu2 %v2770_v11  ;;  %2809 = vmatmul.f32.vlgmr.msrb.gmra.mxu3 %v2770_v11 }
 0x97d   :  { %2829 = vmatmul.f32.vlgmr.msra.gmra.mxu0 %v2770_v11  ;;  %2849 = vmatmul.f32.vlgmr.msra.gmra.mxu1 %v2770_v11 }
 0x97e   :  { %3112 = vmatpush.msrb.mxu2 %v3107_v13 }
 0x9fa   :  { %v2850_v51 = vpop.f32.mrf.mxu1  ;;  %v2830_v55 = vpop.f32.mrf.mxu0 }
 0x9fb   :  { %v2856_v47 = vadd.f32 %v2850_v51, %v6187_v5  ;;  %v2855_v54 = vadd.f32 %v2830_v55, %v6190_v57  ;;  %v3106_v51 = vld [vmem:[%s5611_s6 + $0x70] sm:$0xff] }
 0x9fc   :  { %3113 = vmatpush.msrb.mxu2 %v3106_v51 }
 0x9fd   :  { %v3221_v12 = vmul.f32 -1.442695, %v2856_v47 }
 0x9ff   :  { %3429 = vpow2.f32 %v3221_v12  ;;  %v2790_v1 = vpop.f32.mrf.mxu2  ;;  %v2810_v7 = vpop.f32.mrf.mxu3 }
 0xa00   :  { %v2853_v17 = vadd.f32 %v2790_v1, %v6188_v61  ;;  %v2854_v24 = vadd.f32 %v2810_v7, %v6189_v60  ;;  %v3105_v1 = vld [vmem:[%s5611_s6 + $0x68] sm:$0xff] }
 0xa01   :  { %3114 = vmatpush.msrb.mxu2 %v3105_v1 }
 0xa02   :  { %v3219_v42 = vmul.f32 -1.442695, %v2853_v17  ;;  %v3220_v50 = vmul.f32 -1.442695, %v2854_v24 }
 0xa04   :  { %3431 = vpow2.f32 %v3219_v42 }
 0xa05   :  { %v3430_v52 = vpop.eup %3429  ;;  %3433 = vpow2.f32 %v3220_v50  ;;  %v3103_v50 = vld [vmem:[%s5611_s6 + $0x58] sm:$0xff] }
 0xa06   :  { %v2899_v48 = vadd.f32 1.0, %v3430_v52 }
 0xa08   :  { %3435 = vrcp.f32 %v2899_v48  ;;  %v2911_v58 = vand.u32 2147483648, %v2899_v48  ;;  %vm2905_vm9 = vweird.f32 %v2899_v48  ;;  %v2909_v56 = vand.u32 2147483647, %v2899_v48 }
 0xa0a   :  { %v3432_v23 = vpop.eup %3431  ;;  %v2912_v22 = vor.u32 1.1754944e-38, %v2911_v58  ;;  %vm2910_vm11 = vcmp.eq.f32.partialorder %v2909_v56, 8.507059e+37 }
 0xa0b   :  { %v3434_v34 = vpop.eup %3433  ;;  %v2860_v4 = vadd.f32 1.0, %v3432_v23  ;;  %v3102_v23 = vld [vmem:[%s5611_s6 + $0x50] sm:$0xff] }
 0xa0c   :  { %v2879_v30 = vadd.f32 1.0, %v3434_v34 }
 0xa0d   :  { %3437 = vrcp.f32 %v2860_v4  ;;  %v2872_v49 = vand.u32 2147483648, %v2860_v4  ;;  %v2870_v33 = vand.u32 2147483647, %v2860_v4  ;;  %vm2866_vm2 = vweird.f32 %v2860_v4 }
 0xa0e   :  { %3439 = vrcp.f32 %v2879_v30  ;;  %v3436_v44 = vpop.eup %3435  ;;  %v2891_v21 = vand.u32 2147483648, %v2879_v30  ;;  %v2889_v62 = vand.u32 2147483647, %v2879_v30  ;;  %vm2885_vm4 = vweird.f32 %v2879_v30 }
 0xa0f   :  { %v2901_v15 = vmul.f32 %v3436_v44, %v2899_v48  ;;  %3441 = vtanh.f32 %v2855_v54  ;;  %v2873_v32 = vor.u32 1.1754944e-38, %v2872_v49  ;;  %vm2871_vm5 = vcmp.eq.f32.partialorder %v2870_v33, 8.507059e+37  ;;  %v3098_v54 = vld [vmem:[%s5611_s6 + $0x30] sm:$0xff]  ;;  %v3095_v49 = vld [vmem:[%s5611_s6 + $0x18] sm:$0xff] }
 0xa10   :  { %v2892_v28 = vor.u32 1.1754944e-38, %v2891_v21  ;;  %vm2890_vm7 = vcmp.eq.f32.partialorder %v2889_v62, 8.507059e+37  ;;  %vm2906_vm8 = vweird.f32 %v3436_v44 }
 0xa11   :  { %v2902_v41 = vsub.f32 1.0, %v2901_v15  ;;  %vm2907_vm10 = vmor %vm2905_vm9, %vm2906_vm8  ;;  %vm3139_vm8 = vcmask 130048   ;;  %vm3163_vm9 = vcmask 25600  }
 0xa13   :  { %v3438_v37 = vpop.eup %3437  ;;  %v2903_v14 = vmul.f32 %v3436_v44, %v2902_v41 }
 0xa14   :  { %v3440_v53 = vpop.eup %3439  ;;  %v2862_v63 = vmul.f32 %v3438_v37, %v2860_v4  ;;  %vm2867_vm0 = vweird.f32 %v3438_v37 }
 0xa15   :  { %v2881_v29 = vmul.f32 %v3440_v53, %v2879_v30  ;;  %vm2886_vm1 = vweird.f32 %v3440_v53  ;;  %vm2868_vm3 = vmor %vm2866_vm2, %vm2867_vm0  ;;  %v3442_v35 = vpop.eup %3441  ;;  %v2904_v16 = vadd.f32 %v3436_v44, %v2903_v14  ;;  %v3099_v30 = vld [vmem:[%s5611_s6 + $0x38] sm:$0xff] }
 0xa16   :  { %v2863_v8 = vsub.f32 1.0, %v2862_v63  ;;  %vm2887_vm6 = vmor %vm2885_vm4, %vm2886_vm1 }
 0xa17   :  { %v2882_v27 = vsub.f32 1.0, %v2881_v29  ;;  %v2908_v10 = vsel %vm2907_vm10, %v3436_v44, %v2904_v16  ;;  %v3097_v29 = vld [vmem:[%s5611_s6 + $0x28] sm:$0xff] }
 0xa18   :  { %v2864_v31 = vmul.f32 %v3438_v37, %v2863_v8  ;;  %v2913_v18 = vsel %vm2910_vm11, %v2912_v22, %v2908_v10  ;;  %v3096_v8 = vld [vmem:[%s5611_s6 + $0x20] sm:$0xff] }
 0xa19   :  { %v2883_v43 = vmul.f32 %v3440_v53, %v2882_v27 }
 0xa1a   :  { %v2865_v26 = vadd.f32 %v3438_v37, %v2864_v31  ;;  %v3094_v31 = vld [vmem:[%s5611_s6 + $0x10] sm:$0xff] }
 0xa1b   :  { %v2884_v36 = vadd.f32 %v3440_v53, %v2883_v43  ;;  %v3093_v43 = vld [vmem:[%s5611_s6 + $0x8] sm:$0xff] }
 0xa1c   :  { %v2869_v19 = vsel %vm2868_vm3, %v3438_v37, %v2865_v26 }
 0xa1d   :  { %v2874_v25 = vsel %vm2871_vm5, %v2873_v32, %v2869_v19  ;;  %v2888_v20 = vsel %vm2887_vm6, %v3440_v53, %v2884_v36  ;;  %v3092_v32 = vld [vmem:[%s5611_s6] sm:$0xff] }
 0xa1e   :  { %v2919_v46 = vmul.f32 %v3442_v35, %v2874_v25  ;;  %v2893_v0 = vsel %vm2890_vm7, %v2892_v28, %v2888_v20 }
 0xa1f   :  { %v2918_v45 = vmul.f32 %v2916_v39, %v2893_v0 }
 0xa21   :  { %v5523_v40 = vadd.f32 %v2919_v46, %v2918_v45 }
 0xa23   :  { %3443 = vtanh.f32 %v5523_v40  ;;  %v3079_v22 = vrot.slane %v5523_v40, 6 }
 0xa29   :  { %v3444_v2 = vpop.eup %3443 }
 0xa2a   :  { %v2922_v3 = vmul.f32 %v3444_v2, %v2913_v18 }
 0xa2c   :  { %v5527_v38 = vadd.f32 %v2922_v3, %v5516_v59  ;;  %2940 = vmatmul.f32.vlgmr.msra.gmra.mxu2 %v2922_v3  ;;  %2960 = vmatmul.f32.vlgmr.msra.gmra.mxu3 %v2922_v3 }
 0xa2d   :  { %2980 = vmatmul.f32.vlgmr.msrb.gmra.mxu0 %v2922_v3  ;;  %3000 = vmatmul.f32.vlgmr.msrb.gmra.mxu1 %v2922_v3 }
 0xaaa   :  { %v3001_v6 = vpop.f32.mrf.mxu1  ;;  %v2981_v53 = vpop.f32.mrf.mxu0 }
 0xaab   :  { %v3011_v9 = vrot.slane %v3001_v6, 6  ;;  %v3010_v15 = vrot.slane %v2981_v53, 6 }
 0xaad   :  { %v3019_v11 = vadd.f32 %v3011_v9, %v6187_v5  ;;  %v3104_v5 = vld [vmem:[%s5611_s6 + $0x60] sm:$0xff]  ;;  %v3018_v21 = vadd.f32 %v3010_v15, %v6190_v57 }
 0xaae   :  { %3115 = vmatpush.msrb.mxu2 %v3104_v5 }
 0xaaf   :  { %v3224_v59 = vmul.f32 -1.442695, %v3019_v11  ;;  %v2941_v47 = vpop.f32.mrf.mxu2  ;;  %v2961_v12 = vpop.f32.mrf.mxu3 }
 0xab0   :  { %v3008_v7 = vrot.slane %v2941_v47, 6  ;;  %v3009_v17 = vrot.slane %v2961_v12, 6  ;;  %3116 = vmatpush.msrb.mxu2 %v3103_v50 }
 0xab1   :  { %3445 = vpow2.f32 %v3224_v59 }
 0xab2   :  { %v3016_v24 = vadd.f32 %v3008_v7, %v6188_v61  ;;  %v3017_v42 = vadd.f32 %v3009_v17, %v6189_v60  ;;  %3117 = vmatpush.msrb.mxu2 %v3102_v23  ;;  %v3101_v61 = vld [vmem:[%s5611_s6 + $0x48] sm:$0xff]  ;;  %v3100_v60 = vld [vmem:[%s5611_s6 + $0x40] sm:$0xff] }
 0xab3   :  { %v3235_v23 = vld [vmem:[%s5612_s7] ss:$0 sm:$0xff] }
 0xab4   :  { %v3222_v52 = vmul.f32 -1.442695, %v3016_v24  ;;  %v3223_v48 = vmul.f32 -1.442695, %v3017_v42  ;;  %3118 = vmatpush.msrb.mxu2 %v3101_v61 }
 0xab6   :  { %3447 = vpow2.f32 %v3222_v52  ;;  %3119 = vmatpush.msrb.mxu2 %v3100_v60  ;;  %v3134_v52 = vld [vmem:[%s5613_s8 + $0x8] sm:$0xff]  ;;  %v3236_v60 = vld [vmem:[%s5614_s9] ss:$0 sm:$0xff] }
 0xab7   :  { %v3446_v34 = vpop.eup %3445  ;;  %3449 = vpow2.f32 %v3223_v48  ;;  %v3133_v48 = vld [vmem:[%s5613_s8] sm:$0xff]  ;;  %3157 = vmatpush.msrb.mxu3 %v3134_v52 }
 0xab8   :  { %v5556_v4 = vadd.f32 1.0, %v3446_v34  ;;  %3120 = vmatpush.msrb.mxu2 %v3099_v30 }
 0xab9   :  { %3158 = vmatpush.msrb.mxu3 %v3133_v48 }
 0xaba   :  { %3451 = vrcp.f32 %v5556_v4  ;;  %3121 = vmatpush.msrb.mxu2 %v3098_v54  ;;  %v3074_v59 = vand.u32 2147483648, %v5556_v4  ;;  %vm3068_vm5 = vweird.f32 %v5556_v4  ;;  %v3072_v47 = vand.u32 2147483647, %v5556_v4 }
 0xabc   :  { %v3448_v55 = vpop.eup %3447  ;;  %3122 = vmatpush.msrb.mxu2 %v3097_v29  ;;  %v3075_v40 = vor.u32 1.1754944e-38, %v3074_v59  ;;  %vm3073_vm7 = vcmp.eq.f32.partialorder %v3072_v47, 8.507059e+37 }
 0xabd   :  { %v3450_v44 = vpop.eup %3449  ;;  %v3023_v37 = vadd.f32 1.0, %v3448_v55 }
 0xabe   :  { %v3042_v63 = vadd.f32 1.0, %v3450_v44  ;;  %3123 = vmatpush.msrb.mxu2 %v3096_v8 }
 0xabf   :  { %3453 = vrcp.f32 %v3023_v37  ;;  %v3035_v28 = vand.u32 2147483648, %v3023_v37  ;;  %v3033_v25 = vand.u32 2147483647, %v3023_v37  ;;  %vm3029_vm14 = vweird.f32 %v3023_v37 }
 0xac0   :  { %3455 = vrcp.f32 %v3042_v63  ;;  %v3452_v27 = vpop.eup %3451  ;;  %3124 = vmatpush.msrb.mxu2 %v3095_v49  ;;  %v3054_v20 = vand.u32 2147483648, %v3042_v63  ;;  %v3052_v14 = vand.u32 2147483647, %v3042_v63  ;;  %vm3048_vm0 = vweird.f32 %v3042_v63 }
 0xac1   :  { %v3064_v36 = vmul.f32 %v3452_v27, %v5556_v4  ;;  %3457 = vtanh.f32 %v3018_v21  ;;  %v3036_v45 = vor.u32 1.1754944e-38, %v3035_v28  ;;  %vm3034_vm1 = vcmp.eq.f32.partialorder %v3033_v25, 8.507059e+37 }
 0xac2   :  { %3125 = vmatpush.msrb.mxu2 %v3094_v31  ;;  %v3055_v56 = vor.u32 1.1754944e-38, %v3054_v20  ;;  %vm3053_vm3 = vcmp.eq.f32.partialorder %v3052_v14, 8.507059e+37  ;;  %vm3069_vm4 = vweird.f32 %v3452_v27 }
 0xac3   :  { %v3065_v46 = vsub.f32 1.0, %v3064_v36  ;;  %vm3070_vm6 = vmor %vm3068_vm5, %vm3069_vm4 }
 0xac4   :  { %3126 = vmatpush.msrb.mxu2 %v3093_v43 }
 0xac5   :  { %v3454_v33 = vpop.eup %3453  ;;  %v3066_v3 = vmul.f32 %v3452_v27, %v3065_v46 }
 0xac6   :  { %v3456_v62 = vpop.eup %3455  ;;  %v3025_v41 = vmul.f32 %v3454_v33, %v3023_v37  ;;  %vm3030_vm12 = vweird.f32 %v3454_v33  ;;  %3127 = vmatpush.msrb.mxu2 %v3092_v32 }
 0xac7   :  { %v3044_v26 = vmul.f32 %v3456_v62, %v3042_v63  ;;  %vm3049_vm13 = vweird.f32 %v3456_v62  ;;  %vm3031_vm15 = vmor %vm3029_vm14, %vm3030_vm12  ;;  %v3458_v10 = vpop.eup %3457  ;;  %v3067_v51 = vadd.f32 %v3452_v27, %v3066_v3 }
 0xac8   :  { %v3026_v19 = vsub.f32 1.0, %v3025_v41  ;;  %vm3050_vm2 = vmor %vm3048_vm0, %vm3049_vm13 }
 0xac9   :  { %v3045_v35 = vsub.f32 1.0, %v3044_v26  ;;  %v3071_v12 = vsel %vm3070_vm6, %v3452_v27, %v3067_v51 }
 0xaca   :  { %v3027_v57 = vmul.f32 %v3454_v33, %v3026_v19  ;;  %v3076_v7 = vsel %vm3073_vm7, %v3075_v40, %v3071_v12 }
 0xacb   :  { %v3046_v39 = vmul.f32 %v3456_v62, %v3045_v35 }
 0xacc   :  { %v3028_v0 = vadd.f32 %v3454_v33, %v3027_v57 }
 0xacd   :  { %v3047_v16 = vadd.f32 %v3456_v62, %v3046_v39 }
 0xace   :  { %v3032_v58 = vsel %vm3031_vm15, %v3454_v33, %v3028_v0 }
 0xacf   :  { %v3037_v2 = vsel %vm3034_vm1, %v3036_v45, %v3032_v58  ;;  %v3051_v18 = vsel %vm3050_vm2, %v3456_v62, %v3047_v16 }
 0xad0   :  { %v3082_v6 = vmul.f32 %v3458_v10, %v3037_v2  ;;  %v3056_v9 = vsel %vm3053_vm3, %v3055_v56, %v3051_v18 }
 0xad1   :  { %v3081_v13 = vmul.f32 %v3079_v22, %v3056_v9 }
 0xad3   :  { %v3083_v11 = vadd.f32 %v3082_v6, %v3081_v13 }
 0xad5   :  { %3459 = vtanh.f32 %v3083_v11 }
 0xadb   :  { %v3460_v1 = vpop.eup %3459 }
 0xadc   :  { %v3085_v17 = vmul.f32 %v3460_v1, %v3076_v7 }
 0xade   :  { %v3087_v5 = vrot.slane %v3085_v17, 2 }
 0xae0   :  { %v3089_v24 = vadd.f32 %v3087_v5, %v5527_v38 }
 0xae2   :  { %v3090_v42 = vmul.f32 0.071428575, %v3089_v24 }
 0xae4   :  { %3461 = vtanh.f32 %v3090_v42 }
 0xaea   :  { %v3462_v50 = vpop.eup %3461 }
 0xaeb   :  { %3128 = vmatmul.f32.vlgmr.msrb.gmra.mxu2 %v3462_v50 }
 0xb6e   :  { %v3129_v34 = vpop.f32.mrf.mxu2 }
 0xb6f   :  { %v3130_v38 = vadd.f32 %v3235_v23, %v3129_v34 }
 0xb71   :  { %3463 = vtanh.f32 %v3130_v38 }
 0xb77   :  { %v3464_v61 = vpop.eup %3463 }
 0xb78   :  { %3225 = vmatmul.msk.f32.vlgmr.msrb.gmra.mxu3 %vm3139_vm8, %v3464_v61 }
 0xbfb   :  { %v3160_v4 = vpop.f32.mrf.mxu3 }
 0xbfc   :  { %v3161_v30 = vadd.f32 %v3236_v60, %v3160_v4 }
 0xbfe   :  { %3164 = vst.msk [vmem:[#allocation8] sm:$0x3] %vm3163_vm9, %v3161_v30 }
 0xbff   :  { %3175 = dma.vmem_to_hbm [thread:$0]  %s3171_s25, 32, %s3173_s3, [#allocation4]  }
 0xc00   :  { %3757 = dma.done.wait [#allocation4], 32  }
 0xc01   :  { %3758 = vsyncadd [#allocation4], 4294967264 }
 0xc02   :  { %3180 = vsyncpa [#allocation3], 1 }
 0xc03   :  { %3181 = vsyncpa [#allocation6], 1 }
 0xc04   :  { %3182 = vsyncpa [#allocation4], 1 }

</bundles_post_ra>
